<compile_context>
chip_gen: v7x
topology: tpu7x:2x2x1
jax: 0.10.0
libtpu: 0.0.40
codegen_flags: <defaults>
</compile_context>

<pallas_src>
import jax
import jax.numpy as jnp
from jax.experimental import pallas as pl
from jax.experimental.pallas import tpu as pltpu  # noqa: F401  (TPU backend assumed)

# --- configuration (small, consistent with the module) ---------------------------------
NRINGS = 8        # nrings
BATCH = 2
IN_DIM = 32       # raw per-ring feature dim consumed by the synthetic ring extractor
FEAT_DIM = 32     # self.feature_dim == self.view_feature_dim
NHEADS = 4
HEAD_DIM = FEAT_DIM // NHEADS


# --- fused kernel: per-ring embedding + MHA over rings + mean over rings ----------------
def fused_rings_attention_kernel(x_ref, wr_ref, br_ref,
                                 wq_ref, wk_ref, wv_ref, wo_ref,
                                 bq_ref, bk_ref, bv_ref, bo_ref, o_ref):
    # x_ref : (B, R, Din)                 raw input, batch-major (module layout)
    # wr_ref: (R, Din, D)  br_ref: (R, 1, D)       per-ring linear extractors
    # wq/wk/wv_ref: (H, D, Dh)  bq/bk/bv_ref: (H, 1, Dh)   head-split, scale folded into q
    # wo_ref: (H, Dh, D)   (1/R of the final mean folded in)     bo_ref: (1, D)
    # o_ref : (B, D)
    B = x_ref.shape[0]
    D = wr_ref.shape[2]
    H = wq_ref.shape[0]

    # per-ring embeddings, rings-major (seq, batch, embed) like nn.MultiheadAttention
    emb = jnp.einsum('bri,rid->rbd', x_ref[...], wr_ref[...],
                     preferred_element_type=jnp.float32) + br_ref[...]      # (R, B, D)

    acc = jnp.zeros((B, D), jnp.float32)
    for h in range(H):                      # static unroll; weights are pre-split per head
        qh = jnp.dot(emb, wq_ref[h], preferred_element_type=jnp.float32) + bq_ref[h]
        kh = jnp.dot(emb, wk_ref[h], preferred_element_type=jnp.float32) + bk_ref[h]
        vh = jnp.dot(emb, wv_ref[h], preferred_element_type=jnp.float32) + bv_ref[h]
        # (R, B, Dh) x (R, B, Dh) -> (B, R, R) scores (softmax scale already in wq/bq)
        s = jnp.einsum('rbd,sbd->brs', qh, kh, preferred_element_type=jnp.float32)
        s = s - jnp.max(s, axis=-1, keepdims=True)
        p = jnp.exp(s)
        p = p * pl.reciprocal(jnp.sum(p, axis=-1, keepdims=True), approx=True)
        ctx = jnp.einsum('brs,sbd->rbd', p, vh,
                         preferred_element_type=jnp.float32)                # (R, B, Dh)
        # mean over rings commutes with the (linear) output projection; 1/R is in wo_ref.
        acc = acc + jnp.dot(jnp.sum(ctx, axis=0), wo_ref[h],
                            preferred_element_type=jnp.float32)             # (B, D)
    o_ref[...] = acc + bo_ref[...]
    # TODO(synk): dropout inside nn.MultiheadAttention is a no-op here (dropout=0.0).


# --- host-side parameter preparation (one-time transform) -------------------------------
def prepare_kernel_params(params, nrings=NRINGS, nheads=NHEADS):
    (w_rings, b_rings, wq, wk, wv, wo, bq, bk, bv, bo) = params
    D = wq.shape[0]
    dh = D // nheads
    scale = 1.0 / (dh ** 0.5)
    # fold softmax scale into the query projection
    wq_s, bq_s = wq * scale, bq * scale

    def split_in(w):    # (D, D) -> (H, D, Dh): per-head column blocks of the projection
        return jnp.transpose(w.reshape(D, nheads, dh), (1, 0, 2))

    def split_b(b):     # (1, D) -> (H, 1, Dh)
        return jnp.transpose(b.reshape(1, nheads, dh), (1, 0, 2))

    wq_h, wk_h, wv_h = split_in(wq_s), split_in(wk), split_in(wv)
    bq_h, bk_h, bv_h = split_b(bq_s), split_b(bk), split_b(bv)
    # per-head row blocks of the output projection; fold the 1/R of the final mean
    wo_h = wo.reshape(nheads, dh, D) * (1.0 / nrings)
    return (w_rings, b_rings, wq_h, wk_h, wv_h, wo_h, bq_h, bk_h, bv_h, bo)


# --- wrapper -----------------------------------------------------------------------------
def base3d_rings_extractor(x, kparams, reverse=False):
    """x: (B, R, Din) float32.  kparams from prepare_kernel_params.  Returns (B, FEAT_DIM)."""
    if reverse:
        x = jnp.swapaxes(x, 1, 2)  # mirrors `x = x.transpose(1, 2)` in forward()
    (w_rings, b_rings, wq_h, wk_h, wv_h, wo_h, bq_h, bk_h, bv_h, bo) = kparams
    B, R, Din = x.shape
    # correctness guard: the per-ring extractor params must match the (possibly reversed) layout
    assert (R, Din) == (w_rings.shape[0], w_rings.shape[1]), (
        "ring-extractor params do not match input layout (check `reverse` / nrings)")
    D = wo_h.shape[-1]

    out = pl.pallas_call(
        fused_rings_attention_kernel,
        out_shape=jax.ShapeDtypeStruct((B, D), jnp.float32),
    )(x, w_rings, b_rings, wq_h, wk_h, wv_h, wo_h, bq_h, bk_h, bv_h, bo)
    return out


# --- plain-JAX reference (mirrors the PyTorch forward, canonical params) -----------------
def reference(x, params):
    (w_rings, b_rings, wq, wk, wv, wo, bq, bk, bv, bo) = params
    B, R, Din = x.shape
    D = wq.shape[0]
    # cat([ring_ext.get_embedding(x[:, i]).unsqueeze(1)], 1).transpose(0, 1) -> (R, B, D)
    emb = jnp.einsum('bri,rid->rbd', x, w_rings) + b_rings
    q = (emb @ wq + bq) * (1.0 / (HEAD_DIM ** 0.5))
    k = emb @ wk + bk
    v = emb @ wv + bv
    qh = q.reshape(R, B, NHEADS, HEAD_DIM)
    kh = k.reshape(R, B, NHEADS, HEAD_DIM)
    vh = v.reshape(R, B, NHEADS, HEAD_DIM)
    scores = jnp.einsum('rbhd,sbhd->bhrs', qh, kh)
    attn = jax.nn.softmax(scores, axis=-1)
    o = jnp.einsum('bhrs,sbhd->rbhd', attn, vh).reshape(R, B, D)
    o = o @ wo + bo
    return jnp.mean(o, axis=0)


def make_params(key):
    ks = jax.random.split(key, 10)
    s = 0.1
    w_rings = s * jax.random.normal(ks[0], (NRINGS, IN_DIM, FEAT_DIM), jnp.float32)
    b_rings = s * jax.random.normal(ks[1], (NRINGS, 1, FEAT_DIM), jnp.float32)
    # nn.MultiheadAttention params (pre-transposed so y = x @ W):
    wq = s * jax.random.normal(ks[2], (FEAT_DIM, FEAT_DIM), jnp.float32)
    wk = s * jax.random.normal(ks[3], (FEAT_DIM, FEAT_DIM), jnp.float32)
    wv = s * jax.random.normal(ks[4], (FEAT_DIM, FEAT_DIM), jnp.float32)
    wo = s * jax.random.normal(ks[5], (FEAT_DIM, FEAT_DIM), jnp.float32)
    bq = s * jax.random.normal(ks[6], (1, FEAT_DIM), jnp.float32)
    bk = s * jax.random.normal(ks[7], (1, FEAT_DIM), jnp.float32)
    bv = s * jax.random.normal(ks[8], (1, FEAT_DIM), jnp.float32)
    bo = s * jax.random.normal(ks[9], (1, FEAT_DIM), jnp.float32)
    return (w_rings, b_rings, wq, wk, wv, wo, bq, bk, bv, bo)


if __name__ == "__main__":
    key = jax.random.PRNGKey(0)
    k_x, k_p = jax.random.split(key)
    x = jax.random.normal(k_x, (BATCH, NRINGS, IN_DIM), jnp.float32)
    params = make_params(k_p)
    kparams = prepare_kernel_params(params)          # one-time host-side transform

    out = jax.jit(base3d_rings_extractor)(x, kparams)
    out = jax.block_until_ready(out)

    ref = reference(x, params)
    assert out.shape == (BATCH, FEAT_DIM), out.shape
    err = float(jnp.max(jnp.abs(out - ref)))
    # tolerance accommodates the approx (EUP) reciprocal in the softmax normalization
    assert jnp.allclose(out, ref, atol=2e-3, rtol=2e-3), err
    print("KERNEL_OK")
</pallas_src>

<mosaic_0001>
module attributes {stable_mosaic.version = 11 : i64} {
  func.func @fused_rings_attention_kernel(%arg0: memref<2x8x32xf32, #tpu.memory_space<vmem>>, %arg1: memref<8x32x32xf32, #tpu.memory_space<vmem>>, %arg2: memref<8x1x32xf32, #tpu.memory_space<vmem>>, %arg3: memref<4x32x8xf32, #tpu.memory_space<vmem>>, %arg4: memref<4x32x8xf32, #tpu.memory_space<vmem>>, %arg5: memref<4x32x8xf32, #tpu.memory_space<vmem>>, %arg6: memref<4x8x32xf32, #tpu.memory_space<vmem>>, %arg7: memref<4x1x8xf32, #tpu.memory_space<vmem>>, %arg8: memref<4x1x8xf32, #tpu.memory_space<vmem>>, %arg9: memref<4x1x8xf32, #tpu.memory_space<vmem>>, %arg10: memref<1x32xf32, #tpu.memory_space<vmem>>, %arg11: memref<2x32xf32, #tpu.memory_space<vmem>>) attributes {dimension_semantics = [], scalar_prefetch = 0 : i64, scratch_operands = 0 : i64, tpu.core_type = #tpu.core_type<tc>} {
    %c0 = arith.constant 0 : index
    %c0_0 = arith.constant 0 : index
    %c0_1 = arith.constant 0 : index
    %0 = vector.load %arg0[%c0, %c0_0, %c0_1] : memref<2x8x32xf32, #tpu.memory_space<vmem>>, vector<2x8x32xf32>
    %c0_2 = arith.constant 0 : index
    %c0_3 = arith.constant 0 : index
    %c0_4 = arith.constant 0 : index
    %1 = vector.load %arg1[%c0_2, %c0_3, %c0_4] : memref<8x32x32xf32, #tpu.memory_space<vmem>>, vector<8x32x32xf32>
    "tpu.trace_start"() <{level = 10 : i32, message = "bri,rid->rbd"}> : () -> ()
    %cst = arith.constant dense<0.000000e+00> : vector<8x2x32xf32>
    %2 = tpu.matmul %0, %1, %cst {dimension_numbers = #tpu.dot_dimension_numbers<[2], [1], [0], [2], [0, 1, 0, 0, 1, 2], [1], [0]>} : vector<2x8x32xf32>, vector<8x32x32xf32>, vector<8x2x32xf32> -> vector<8x2x32xf32>
    "tpu.trace_stop"() : () -> ()
    %c0_5 = arith.constant 0 : index
    %c0_6 = arith.constant 0 : index
    %c0_7 = arith.constant 0 : index
    %3 = vector.load %arg2[%c0_5, %c0_6, %c0_7] : memref<8x1x32xf32, #tpu.memory_space<vmem>>, vector<8x1x32xf32>
    %4 = vector.broadcast %3 : vector<8x1x32xf32> to vector<8x2x32xf32>
    %5 = arith.addf %2, %4 : vector<8x2x32xf32>
    %cst_8 = arith.constant 0.000000e+00 : f32
    %6 = vector.broadcast %cst_8 : f32 to vector<2x32xf32>
    %c0_9 = arith.constant 0 : index
    %c0_10 = arith.constant 0 : index
    %c0_11 = arith.constant 0 : index
    %7 = vector.load %arg3[%c0_9, %c0_10, %c0_11] : memref<4x32x8xf32, #tpu.memory_space<vmem>>, vector<1x32x8xf32>
    %8 = vector.shape_cast %7 : vector<1x32x8xf32> to vector<32x8xf32>
    %cst_12 = arith.constant dense<0.000000e+00> : vector<8x2x8xf32>
    %9 = tpu.matmul %5, %8, %cst_12 {dimension_numbers = #tpu.dot_dimension_numbers<[2], [0], [0, 1], [1], [0, 0, 0, 1, 1, 1], [], []>} : vector<8x2x32xf32>, vector<32x8xf32>, vector<8x2x8xf32> -> vector<8x2x8xf32>
    %c0_13 = arith.constant 0 : index
    %c0_14 = arith.constant 0 : index
    %c0_15 = arith.constant 0 : index
    %10 = vector.load %arg7[%c0_13, %c0_14, %c0_15] : memref<4x1x8xf32, #tpu.memory_space<vmem>>, vector<1x1x8xf32>
    %11 = vector.shape_cast %10 : vector<1x1x8xf32> to vector<1x8xf32>
    %12 = vector.shape_cast %11 : vector<1x8xf32> to vector<1x1x8xf32>
    %13 = vector.broadcast %12 : vector<1x1x8xf32> to vector<8x2x8xf32>
    %14 = arith.addf %9, %13 : vector<8x2x8xf32>
    %c0_16 = arith.constant 0 : index
    %c0_17 = arith.constant 0 : index
    %c0_18 = arith.constant 0 : index
    %15 = vector.load %arg4[%c0_16, %c0_17, %c0_18] : memref<4x32x8xf32, #tpu.memory_space<vmem>>, vector<1x32x8xf32>
    %16 = vector.shape_cast %15 : vector<1x32x8xf32> to vector<32x8xf32>
    %cst_19 = arith.constant dense<0.000000e+00> : vector<8x2x8xf32>
    %17 = tpu.matmul %5, %16, %cst_19 {dimension_numbers = #tpu.dot_dimension_numbers<[2], [0], [0, 1], [1], [0, 0, 0, 1, 1, 1], [], []>} : vector<8x2x32xf32>, vector<32x8xf32>, vector<8x2x8xf32> -> vector<8x2x8xf32>
    %c0_20 = arith.constant 0 : index
    %c0_21 = arith.constant 0 : index
    %c0_22 = arith.constant 0 : index
    %18 = vector.load %arg8[%c0_20, %c0_21, %c0_22] : memref<4x1x8xf32, #tpu.memory_space<vmem>>, vector<1x1x8xf32>
    %19 = vector.shape_cast %18 : vector<1x1x8xf32> to vector<1x8xf32>
    %20 = vector.shape_cast %19 : vector<1x8xf32> to vector<1x1x8xf32>
    %21 = vector.broadcast %20 : vector<1x1x8xf32> to vector<8x2x8xf32>
    %22 = arith.addf %17, %21 : vector<8x2x8xf32>
    %c0_23 = arith.constant 0 : index
    %c0_24 = arith.constant 0 : index
    %c0_25 = arith.constant 0 : index
    %23 = vector.load %arg5[%c0_23, %c0_24, %c0_25] : memref<4x32x8xf32, #tpu.memory_space<vmem>>, vector<1x32x8xf32>
    %24 = vector.shape_cast %23 : vector<1x32x8xf32> to vector<32x8xf32>
    %cst_26 = arith.constant dense<0.000000e+00> : vector<8x2x8xf32>
    %25 = tpu.matmul %5, %24, %cst_26 {dimension_numbers = #tpu.dot_dimension_numbers<[2], [0], [0, 1], [1], [0, 0, 0, 1, 1, 1], [], []>} : vector<8x2x32xf32>, vector<32x8xf32>, vector<8x2x8xf32> -> vector<8x2x8xf32>
    %c0_27 = arith.constant 0 : index
    %c0_28 = arith.constant 0 : index
    %c0_29 = arith.constant 0 : index
    %26 = vector.load %arg9[%c0_27, %c0_28, %c0_29] : memref<4x1x8xf32, #tpu.memory_space<vmem>>, vector<1x1x8xf32>
    %27 = vector.shape_cast %26 : vector<1x1x8xf32> to vector<1x8xf32>
    %28 = vector.shape_cast %27 : vector<1x8xf32> to vector<1x1x8xf32>
    %29 = vector.broadcast %28 : vector<1x1x8xf32> to vector<8x2x8xf32>
    %30 = arith.addf %25, %29 : vector<8x2x8xf32>
    "tpu.trace_start"() <{level = 10 : i32, message = "rbd,sbd->brs"}> : () -> ()
    %cst_30 = arith.constant dense<0.000000e+00> : vector<2x8x8xf32>
    %31 = tpu.matmul %14, %22, %cst_30 {dimension_numbers = #tpu.dot_dimension_numbers<[2], [2], [0], [0], [0, 1, 0, 0, 1, 0], [1], [1]>} : vector<8x2x8xf32>, vector<8x2x8xf32>, vector<2x8x8xf32> -> vector<2x8x8xf32>
    "tpu.trace_stop"() : () -> ()
    %cst_31 = arith.constant dense<0xFF800000> : vector<2x8xf32>
    %32 = vector.multi_reduction <maximumf>, %31, %cst_31 [2] : vector<2x8x8xf32> to vector<2x8xf32>
    %33 = vector.shape_cast %32 : vector<2x8xf32> to vector<2x8x1xf32>
    %34 = vector.broadcast %33 : vector<2x8x1xf32> to vector<2x8x8xf32>
    %35 = arith.subf %31, %34 : vector<2x8x8xf32>
    %36 = math.exp %35 : vector<2x8x8xf32>
    %cst_32 = arith.constant dense<0.000000e+00> : vector<2x8xf32>
    %37 = vector.multi_reduction <add>, %36, %cst_32 [2] : vector<2x8x8xf32> to vector<2x8xf32>
    %38 = vector.shape_cast %37 : vector<2x8xf32> to vector<2x8x1xf32>
    %39 = tpu.reciprocal %38 {approx = true} : vector<2x8x1xf32> -> vector<2x8x1xf32>
    %40 = vector.broadcast %39 : vector<2x8x1xf32> to vector<2x8x8xf32>
    %41 = arith.mulf %36, %40 : vector<2x8x8xf32>
    "tpu.trace_start"() <{level = 10 : i32, message = "brs,sbd->rbd"}> : () -> ()
    %cst_33 = arith.constant dense<0.000000e+00> : vector<2x8x8xf32>
    %42 = tpu.matmul %30, %41, %cst_33 {dimension_numbers = #tpu.dot_dimension_numbers<[0], [2], [2], [1], [0, 1, 0, 2, 1, 1], [1], [0]>} : vector<8x2x8xf32>, vector<2x8x8xf32>, vector<2x8x8xf32> -> vector<2x8x8xf32>
    %43 = tpu.transpose %42, [2, 0, 1] : vector<2x8x8xf32> -> vector<8x2x8xf32>
    "tpu.trace_stop"() : () -> ()
    %cst_34 = arith.constant dense<0.000000e+00> : vector<2x8xf32>
    %44 = vector.multi_reduction <add>, %43, %cst_34 [0] : vector<8x2x8xf32> to vector<2x8xf32>
    %c0_35 = arith.constant 0 : index
    %c0_36 = arith.constant 0 : index
    %c0_37 = arith.constant 0 : index
    %45 = vector.load %arg6[%c0_35, %c0_36, %c0_37] : memref<4x8x32xf32, #tpu.memory_space<vmem>>, vector<1x8x32xf32>
    %46 = vector.shape_cast %45 : vector<1x8x32xf32> to vector<8x32xf32>
    %cst_38 = arith.constant dense<0.000000e+00> : vector<2x32xf32>
    %47 = tpu.matmul %44, %46, %cst_38 {dimension_numbers = #tpu.dot_dimension_numbers<[1], [0], [0], [1], [0, 0, 1, 1], [], []>} : vector<2x8xf32>, vector<8x32xf32>, vector<2x32xf32> -> vector<2x32xf32>
    %48 = arith.addf %6, %47 : vector<2x32xf32>
    %c1 = arith.constant 1 : index
    %c0_39 = arith.constant 0 : index
    %c0_40 = arith.constant 0 : index
    %49 = vector.load %arg3[%c1, %c0_39, %c0_40] : memref<4x32x8xf32, #tpu.memory_space<vmem>>, vector<1x32x8xf32>
    %50 = vector.shape_cast %49 : vector<1x32x8xf32> to vector<32x8xf32>
    %cst_41 = arith.constant dense<0.000000e+00> : vector<8x2x8xf32>
    %51 = tpu.matmul %5, %50, %cst_41 {dimension_numbers = #tpu.dot_dimension_numbers<[2], [0], [0, 1], [1], [0, 0, 0, 1, 1, 1], [], []>} : vector<8x2x32xf32>, vector<32x8xf32>, vector<8x2x8xf32> -> vector<8x2x8xf32>
    %c1_42 = arith.constant 1 : index
    %c0_43 = arith.constant 0 : index
    %c0_44 = arith.constant 0 : index
    %52 = vector.load %arg7[%c1_42, %c0_43, %c0_44] : memref<4x1x8xf32, #tpu.memory_space<vmem>>, vector<1x1x8xf32>
    %53 = vector.shape_cast %52 : vector<1x1x8xf32> to vector<1x8xf32>
    %54 = vector.shape_cast %53 : vector<1x8xf32> to vector<1x1x8xf32>
    %55 = vector.broadcast %54 : vector<1x1x8xf32> to vector<8x2x8xf32>
    %56 = arith.addf %51, %55 : vector<8x2x8xf32>
    %c1_45 = arith.constant 1 : index
    %c0_46 = arith.constant 0 : index
    %c0_47 = arith.constant 0 : index
    %57 = vector.load %arg4[%c1_45, %c0_46, %c0_47] : memref<4x32x8xf32, #tpu.memory_space<vmem>>, vector<1x32x8xf32>
    %58 = vector.shape_cast %57 : vector<1x32x8xf32> to vector<32x8xf32>
    %cst_48 = arith.constant dense<0.000000e+00> : vector<8x2x8xf32>
    %59 = tpu.matmul %5, %58, %cst_48 {dimension_numbers = #tpu.dot_dimension_numbers<[2], [0], [0, 1], [1], [0, 0, 0, 1, 1, 1], [], []>} : vector<8x2x32xf32>, vector<32x8xf32>, vector<8x2x8xf32> -> vector<8x2x8xf32>
    %c1_49 = arith.constant 1 : index
    %c0_50 = arith.constant 0 : index
    %c0_51 = arith.constant 0 : index
    %60 = vector.load %arg8[%c1_49, %c0_50, %c0_51] : memref<4x1x8xf32, #tpu.memory_space<vmem>>, vector<1x1x8xf32>
    %61 = vector.shape_cast %60 : vector<1x1x8xf32> to vector<1x8xf32>
    %62 = vector.shape_cast %61 : vector<1x8xf32> to vector<1x1x8xf32>
    %63 = vector.broadcast %62 : vector<1x1x8xf32> to vector<8x2x8xf32>
    %64 = arith.addf %59, %63 : vector<8x2x8xf32>
    %c1_52 = arith.constant 1 : index
    %c0_53 = arith.constant 0 : index
    %c0_54 = arith.constant 0 : index
    %65 = vector.load %arg5[%c1_52, %c0_53, %c0_54] : memref<4x32x8xf32, #tpu.memory_space<vmem>>, vector<1x32x8xf32>
    %66 = vector.shape_cast %65 : vector<1x32x8xf32> to vector<32x8xf32>
    %cst_55 = arith.constant dense<0.000000e+00> : vector<8x2x8xf32>
    %67 = tpu.matmul %5, %66, %cst_55 {dimension_numbers = #tpu.dot_dimension_numbers<[2], [0], [0, 1], [1], [0, 0, 0, 1, 1, 1], [], []>} : vector<8x2x32xf32>, vector<32x8xf32>, vector<8x2x8xf32> -> vector<8x2x8xf32>
    %c1_56 = arith.constant 1 : index
    %c0_57 = arith.constant 0 : index
    %c0_58 = arith.constant 0 : index
    %68 = vector.load %arg9[%c1_56, %c0_57, %c0_58] : memref<4x1x8xf32, #tpu.memory_space<vmem>>, vector<1x1x8xf32>
    %69 = vector.shape_cast %68 : vector<1x1x8xf32> to vector<1x8xf32>
    %70 = vector.shape_cast %69 : vector<1x8xf32> to vector<1x1x8xf32>
    %71 = vector.broadcast %70 : vector<1x1x8xf32> to vector<8x2x8xf32>
    %72 = arith.addf %67, %71 : vector<8x2x8xf32>
    "tpu.trace_start"() <{level = 10 : i32, message = "rbd,sbd->brs"}> : () -> ()
    %cst_59 = arith.constant dense<0.000000e+00> : vector<2x8x8xf32>
    %73 = tpu.matmul %56, %64, %cst_59 {dimension_numbers = #tpu.dot_dimension_numbers<[2], [2], [0], [0], [0, 1, 0, 0, 1, 0], [1], [1]>} : vector<8x2x8xf32>, vector<8x2x8xf32>, vector<2x8x8xf32> -> vector<2x8x8xf32>
    "tpu.trace_stop"() : () -> ()
    %cst_60 = arith.constant dense<0xFF800000> : vector<2x8xf32>
    %74 = vector.multi_reduction <maximumf>, %73, %cst_60 [2] : vector<2x8x8xf32> to vector<2x8xf32>
    %75 = vector.shape_cast %74 : vector<2x8xf32> to vector<2x8x1xf32>
    %76 = vector.broadcast %75 : vector<2x8x1xf32> to vector<2x8x8xf32>
    %77 = arith.subf %73, %76 : vector<2x8x8xf32>
    %78 = math.exp %77 : vector<2x8x8xf32>
    %cst_61 = arith.constant dense<0.000000e+00> : vector<2x8xf32>
    %79 = vector.multi_reduction <add>, %78, %cst_61 [2] : vector<2x8x8xf32> to vector<2x8xf32>
    %80 = vector.shape_cast %79 : vector<2x8xf32> to vector<2x8x1xf32>
    %81 = tpu.reciprocal %80 {approx = true} : vector<2x8x1xf32> -> vector<2x8x1xf32>
    %82 = vector.broadcast %81 : vector<2x8x1xf32> to vector<2x8x8xf32>
    %83 = arith.mulf %78, %82 : vector<2x8x8xf32>
    "tpu.trace_start"() <{level = 10 : i32, message = "brs,sbd->rbd"}> : () -> ()
    %cst_62 = arith.constant dense<0.000000e+00> : vector<2x8x8xf32>
    %84 = tpu.matmul %72, %83, %cst_62 {dimension_numbers = #tpu.dot_dimension_numbers<[0], [2], [2], [1], [0, 1, 0, 2, 1, 1], [1], [0]>} : vector<8x2x8xf32>, vector<2x8x8xf32>, vector<2x8x8xf32> -> vector<2x8x8xf32>
    %85 = tpu.transpose %84, [2, 0, 1] : vector<2x8x8xf32> -> vector<8x2x8xf32>
    "tpu.trace_stop"() : () -> ()
    %cst_63 = arith.constant dense<0.000000e+00> : vector<2x8xf32>
    %86 = vector.multi_reduction <add>, %85, %cst_63 [0] : vector<8x2x8xf32> to vector<2x8xf32>
    %c1_64 = arith.constant 1 : index
    %c0_65 = arith.constant 0 : index
    %c0_66 = arith.constant 0 : index
    %87 = vector.load %arg6[%c1_64, %c0_65, %c0_66] : memref<4x8x32xf32, #tpu.memory_space<vmem>>, vector<1x8x32xf32>
    %88 = vector.shape_cast %87 : vector<1x8x32xf32> to vector<8x32xf32>
    %cst_67 = arith.constant dense<0.000000e+00> : vector<2x32xf32>
    %89 = tpu.matmul %86, %88, %cst_67 {dimension_numbers = #tpu.dot_dimension_numbers<[1], [0], [0], [1], [0, 0, 1, 1], [], []>} : vector<2x8xf32>, vector<8x32xf32>, vector<2x32xf32> -> vector<2x32xf32>
    %90 = arith.addf %48, %89 : vector<2x32xf32>
    %c2 = arith.constant 2 : index
    %c0_68 = arith.constant 0 : index
    %c0_69 = arith.constant 0 : index
    %91 = vector.load %arg3[%c2, %c0_68, %c0_69] : memref<4x32x8xf32, #tpu.memory_space<vmem>>, vector<1x32x8xf32>
    %92 = vector.shape_cast %91 : vector<1x32x8xf32> to vector<32x8xf32>
    %cst_70 = arith.constant dense<0.000000e+00> : vector<8x2x8xf32>
    %93 = tpu.matmul %5, %92, %cst_70 {dimension_numbers = #tpu.dot_dimension_numbers<[2], [0], [0, 1], [1], [0, 0, 0, 1, 1, 1], [], []>} : vector<8x2x32xf32>, vector<32x8xf32>, vector<8x2x8xf32> -> vector<8x2x8xf32>
    %c2_71 = arith.constant 2 : index
    %c0_72 = arith.constant 0 : index
    %c0_73 = arith.constant 0 : index
    %94 = vector.load %arg7[%c2_71, %c0_72, %c0_73] : memref<4x1x8xf32, #tpu.memory_space<vmem>>, vector<1x1x8xf32>
    %95 = vector.shape_cast %94 : vector<1x1x8xf32> to vector<1x8xf32>
    %96 = vector.shape_cast %95 : vector<1x8xf32> to vector<1x1x8xf32>
    %97 = vector.broadcast %96 : vector<1x1x8xf32> to vector<8x2x8xf32>
    %98 = arith.addf %93, %97 : vector<8x2x8xf32>
    %c2_74 = arith.constant 2 : index
    %c0_75 = arith.constant 0 : index
    %c0_76 = arith.constant 0 : index
    %99 = vector.load %arg4[%c2_74, %c0_75, %c0_76] : memref<4x32x8xf32, #tpu.memory_space<vmem>>, vector<1x32x8xf32>
    %100 = vector.shape_cast %99 : vector<1x32x8xf32> to vector<32x8xf32>
    %cst_77 = arith.constant dense<0.000000e+00> : vector<8x2x8xf32>
    %101 = tpu.matmul %5, %100, %cst_77 {dimension_numbers = #tpu.dot_dimension_numbers<[2], [0], [0, 1], [1], [0, 0, 0, 1, 1, 1], [], []>} : vector<8x2x32xf32>, vector<32x8xf32>, vector<8x2x8xf32> -> vector<8x2x8xf32>
    %c2_78 = arith.constant 2 : index
    %c0_79 = arith.constant 0 : index
    %c0_80 = arith.constant 0 : index
    %102 = vector.load %arg8[%c2_78, %c0_79, %c0_80] : memref<4x1x8xf32, #tpu.memory_space<vmem>>, vector<1x1x8xf32>
    %103 = vector.shape_cast %102 : vector<1x1x8xf32> to vector<1x8xf32>
    %104 = vector.shape_cast %103 : vector<1x8xf32> to vector<1x1x8xf32>
    %105 = vector.broadcast %104 : vector<1x1x8xf32> to vector<8x2x8xf32>
    %106 = arith.addf %101, %105 : vector<8x2x8xf32>
    %c2_81 = arith.constant 2 : index
    %c0_82 = arith.constant 0 : index
    %c0_83 = arith.constant 0 : index
    %107 = vector.load %arg5[%c2_81, %c0_82, %c0_83] : memref<4x32x8xf32, #tpu.memory_space<vmem>>, vector<1x32x8xf32>
    %108 = vector.shape_cast %107 : vector<1x32x8xf32> to vector<32x8xf32>
    %cst_84 = arith.constant dense<0.000000e+00> : vector<8x2x8xf32>
    %109 = tpu.matmul %5, %108, %cst_84 {dimension_numbers = #tpu.dot_dimension_numbers<[2], [0], [0, 1], [1], [0, 0, 0, 1, 1, 1], [], []>} : vector<8x2x32xf32>, vector<32x8xf32>, vector<8x2x8xf32> -> vector<8x2x8xf32>
    %c2_85 = arith.constant 2 : index
    %c0_86 = arith.constant 0 : index
    %c0_87 = arith.constant 0 : index
    %110 = vector.load %arg9[%c2_85, %c0_86, %c0_87] : memref<4x1x8xf32, #tpu.memory_space<vmem>>, vector<1x1x8xf32>
    %111 = vector.shape_cast %110 : vector<1x1x8xf32> to vector<1x8xf32>
    %112 = vector.shape_cast %111 : vector<1x8xf32> to vector<1x1x8xf32>
    %113 = vector.broadcast %112 : vector<1x1x8xf32> to vector<8x2x8xf32>
    %114 = arith.addf %109, %113 : vector<8x2x8xf32>
    "tpu.trace_start"() <{level = 10 : i32, message = "rbd,sbd->brs"}> : () -> ()
    %cst_88 = arith.constant dense<0.000000e+00> : vector<2x8x8xf32>
    %115 = tpu.matmul %98, %106, %cst_88 {dimension_numbers = #tpu.dot_dimension_numbers<[2], [2], [0], [0], [0, 1, 0, 0, 1, 0], [1], [1]>} : vector<8x2x8xf32>, vector<8x2x8xf32>, vector<2x8x8xf32> -> vector<2x8x8xf32>
    "tpu.trace_stop"() : () -> ()
    %cst_89 = arith.constant dense<0xFF800000> : vector<2x8xf32>
    %116 = vector.multi_reduction <maximumf>, %115, %cst_89 [2] : vector<2x8x8xf32> to vector<2x8xf32>
    %117 = vector.shape_cast %116 : vector<2x8xf32> to vector<2x8x1xf32>
    %118 = vector.broadcast %117 : vector<2x8x1xf32> to vector<2x8x8xf32>
    %119 = arith.subf %115, %118 : vector<2x8x8xf32>
    %120 = math.exp %119 : vector<2x8x8xf32>
    %cst_90 = arith.constant dense<0.000000e+00> : vector<2x8xf32>
    %121 = vector.multi_reduction <add>, %120, %cst_90 [2] : vector<2x8x8xf32> to vector<2x8xf32>
    %122 = vector.shape_cast %121 : vector<2x8xf32> to vector<2x8x1xf32>
    %123 = tpu.reciprocal %122 {approx = true} : vector<2x8x1xf32> -> vector<2x8x1xf32>
    %124 = vector.broadcast %123 : vector<2x8x1xf32> to vector<2x8x8xf32>
    %125 = arith.mulf %120, %124 : vector<2x8x8xf32>
    "tpu.trace_start"() <{level = 10 : i32, message = "brs,sbd->rbd"}> : () -> ()
    %cst_91 = arith.constant dense<0.000000e+00> : vector<2x8x8xf32>
    %126 = tpu.matmul %114, %125, %cst_91 {dimension_numbers = #tpu.dot_dimension_numbers<[0], [2], [2], [1], [0, 1, 0, 2, 1, 1], [1], [0]>} : vector<8x2x8xf32>, vector<2x8x8xf32>, vector<2x8x8xf32> -> vector<2x8x8xf32>
    %127 = tpu.transpose %126, [2, 0, 1] : vector<2x8x8xf32> -> vector<8x2x8xf32>
    "tpu.trace_stop"() : () -> ()
    %cst_92 = arith.constant dense<0.000000e+00> : vector<2x8xf32>
    %128 = vector.multi_reduction <add>, %127, %cst_92 [0] : vector<8x2x8xf32> to vector<2x8xf32>
    %c2_93 = arith.constant 2 : index
    %c0_94 = arith.constant 0 : index
    %c0_95 = arith.constant 0 : index
    %129 = vector.load %arg6[%c2_93, %c0_94, %c0_95] : memref<4x8x32xf32, #tpu.memory_space<vmem>>, vector<1x8x32xf32>
    %130 = vector.shape_cast %129 : vector<1x8x32xf32> to vector<8x32xf32>
    %cst_96 = arith.constant dense<0.000000e+00> : vector<2x32xf32>
    %131 = tpu.matmul %128, %130, %cst_96 {dimension_numbers = #tpu.dot_dimension_numbers<[1], [0], [0], [1], [0, 0, 1, 1], [], []>} : vector<2x8xf32>, vector<8x32xf32>, vector<2x32xf32> -> vector<2x32xf32>
    %132 = arith.addf %90, %131 : vector<2x32xf32>
    %c3 = arith.constant 3 : index
    %c0_97 = arith.constant 0 : index
    %c0_98 = arith.constant 0 : index
    %133 = vector.load %arg3[%c3, %c0_97, %c0_98] : memref<4x32x8xf32, #tpu.memory_space<vmem>>, vector<1x32x8xf32>
    %134 = vector.shape_cast %133 : vector<1x32x8xf32> to vector<32x8xf32>
    %cst_99 = arith.constant dense<0.000000e+00> : vector<8x2x8xf32>
    %135 = tpu.matmul %5, %134, %cst_99 {dimension_numbers = #tpu.dot_dimension_numbers<[2], [0], [0, 1], [1], [0, 0, 0, 1, 1, 1], [], []>} : vector<8x2x32xf32>, vector<32x8xf32>, vector<8x2x8xf32> -> vector<8x2x8xf32>
    %c3_100 = arith.constant 3 : index
    %c0_101 = arith.constant 0 : index
    %c0_102 = arith.constant 0 : index
    %136 = vector.load %arg7[%c3_100, %c0_101, %c0_102] : memref<4x1x8xf32, #tpu.memory_space<vmem>>, vector<1x1x8xf32>
    %137 = vector.shape_cast %136 : vector<1x1x8xf32> to vector<1x8xf32>
    %138 = vector.shape_cast %137 : vector<1x8xf32> to vector<1x1x8xf32>
    %139 = vector.broadcast %138 : vector<1x1x8xf32> to vector<8x2x8xf32>
    %140 = arith.addf %135, %139 : vector<8x2x8xf32>
    %c3_103 = arith.constant 3 : index
    %c0_104 = arith.constant 0 : index
    %c0_105 = arith.constant 0 : index
    %141 = vector.load %arg4[%c3_103, %c0_104, %c0_105] : memref<4x32x8xf32, #tpu.memory_space<vmem>>, vector<1x32x8xf32>
    %142 = vector.shape_cast %141 : vector<1x32x8xf32> to vector<32x8xf32>
    %cst_106 = arith.constant dense<0.000000e+00> : vector<8x2x8xf32>
    %143 = tpu.matmul %5, %142, %cst_106 {dimension_numbers = #tpu.dot_dimension_numbers<[2], [0], [0, 1], [1], [0, 0, 0, 1, 1, 1], [], []>} : vector<8x2x32xf32>, vector<32x8xf32>, vector<8x2x8xf32> -> vector<8x2x8xf32>
    %c3_107 = arith.constant 3 : index
    %c0_108 = arith.constant 0 : index
    %c0_109 = arith.constant 0 : index
    %144 = vector.load %arg8[%c3_107, %c0_108, %c0_109] : memref<4x1x8xf32, #tpu.memory_space<vmem>>, vector<1x1x8xf32>
    %145 = vector.shape_cast %144 : vector<1x1x8xf32> to vector<1x8xf32>
    %146 = vector.shape_cast %145 : vector<1x8xf32> to vector<1x1x8xf32>
    %147 = vector.broadcast %146 : vector<1x1x8xf32> to vector<8x2x8xf32>
    %148 = arith.addf %143, %147 : vector<8x2x8xf32>
    %c3_110 = arith.constant 3 : index
    %c0_111 = arith.constant 0 : index
    %c0_112 = arith.constant 0 : index
    %149 = vector.load %arg5[%c3_110, %c0_111, %c0_112] : memref<4x32x8xf32, #tpu.memory_space<vmem>>, vector<1x32x8xf32>
    %150 = vector.shape_cast %149 : vector<1x32x8xf32> to vector<32x8xf32>
    %cst_113 = arith.constant dense<0.000000e+00> : vector<8x2x8xf32>
    %151 = tpu.matmul %5, %150, %cst_113 {dimension_numbers = #tpu.dot_dimension_numbers<[2], [0], [0, 1], [1], [0, 0, 0, 1, 1, 1], [], []>} : vector<8x2x32xf32>, vector<32x8xf32>, vector<8x2x8xf32> -> vector<8x2x8xf32>
    %c3_114 = arith.constant 3 : index
    %c0_115 = arith.constant 0 : index
    %c0_116 = arith.constant 0 : index
    %152 = vector.load %arg9[%c3_114, %c0_115, %c0_116] : memref<4x1x8xf32, #tpu.memory_space<vmem>>, vector<1x1x8xf32>
    %153 = vector.shape_cast %152 : vector<1x1x8xf32> to vector<1x8xf32>
    %154 = vector.shape_cast %153 : vector<1x8xf32> to vector<1x1x8xf32>
    %155 = vector.broadcast %154 : vector<1x1x8xf32> to vector<8x2x8xf32>
    %156 = arith.addf %151, %155 : vector<8x2x8xf32>
    "tpu.trace_start"() <{level = 10 : i32, message = "rbd,sbd->brs"}> : () -> ()
    %cst_117 = arith.constant dense<0.000000e+00> : vector<2x8x8xf32>
    %157 = tpu.matmul %140, %148, %cst_117 {dimension_numbers = #tpu.dot_dimension_numbers<[2], [2], [0], [0], [0, 1, 0, 0, 1, 0], [1], [1]>} : vector<8x2x8xf32>, vector<8x2x8xf32>, vector<2x8x8xf32> -> vector<2x8x8xf32>
    "tpu.trace_stop"() : () -> ()
    %cst_118 = arith.constant dense<0xFF800000> : vector<2x8xf32>
    %158 = vector.multi_reduction <maximumf>, %157, %cst_118 [2] : vector<2x8x8xf32> to vector<2x8xf32>
    %159 = vector.shape_cast %158 : vector<2x8xf32> to vector<2x8x1xf32>
    %160 = vector.broadcast %159 : vector<2x8x1xf32> to vector<2x8x8xf32>
    %161 = arith.subf %157, %160 : vector<2x8x8xf32>
    %162 = math.exp %161 : vector<2x8x8xf32>
    %cst_119 = arith.constant dense<0.000000e+00> : vector<2x8xf32>
    %163 = vector.multi_reduction <add>, %162, %cst_119 [2] : vector<2x8x8xf32> to vector<2x8xf32>
    %164 = vector.shape_cast %163 : vector<2x8xf32> to vector<2x8x1xf32>
    %165 = tpu.reciprocal %164 {approx = true} : vector<2x8x1xf32> -> vector<2x8x1xf32>
    %166 = vector.broadcast %165 : vector<2x8x1xf32> to vector<2x8x8xf32>
    %167 = arith.mulf %162, %166 : vector<2x8x8xf32>
    "tpu.trace_start"() <{level = 10 : i32, message = "brs,sbd->rbd"}> : () -> ()
    %cst_120 = arith.constant dense<0.000000e+00> : vector<2x8x8xf32>
    %168 = tpu.matmul %156, %167, %cst_120 {dimension_numbers = #tpu.dot_dimension_numbers<[0], [2], [2], [1], [0, 1, 0, 2, 1, 1], [1], [0]>} : vector<8x2x8xf32>, vector<2x8x8xf32>, vector<2x8x8xf32> -> vector<2x8x8xf32>
    %169 = tpu.transpose %168, [2, 0, 1] : vector<2x8x8xf32> -> vector<8x2x8xf32>
    "tpu.trace_stop"() : () -> ()
    %cst_121 = arith.constant dense<0.000000e+00> : vector<2x8xf32>
    %170 = vector.multi_reduction <add>, %169, %cst_121 [0] : vector<8x2x8xf32> to vector<2x8xf32>
    %c3_122 = arith.constant 3 : index
    %c0_123 = arith.constant 0 : index
    %c0_124 = arith.constant 0 : index
    %171 = vector.load %arg6[%c3_122, %c0_123, %c0_124] : memref<4x8x32xf32, #tpu.memory_space<vmem>>, vector<1x8x32xf32>
    %172 = vector.shape_cast %171 : vector<1x8x32xf32> to vector<8x32xf32>
    %cst_125 = arith.constant dense<0.000000e+00> : vector<2x32xf32>
    %173 = tpu.matmul %170, %172, %cst_125 {dimension_numbers = #tpu.dot_dimension_numbers<[1], [0], [0], [1], [0, 0, 1, 1], [], []>} : vector<2x8xf32>, vector<8x32xf32>, vector<2x32xf32> -> vector<2x32xf32>
    %174 = arith.addf %132, %173 : vector<2x32xf32>
    %c0_126 = arith.constant 0 : index
    %c0_127 = arith.constant 0 : index
    %175 = vector.load %arg10[%c0_126, %c0_127] : memref<1x32xf32, #tpu.memory_space<vmem>>, vector<1x32xf32>
    %176 = vector.broadcast %175 : vector<1x32xf32> to vector<2x32xf32>
    %177 = arith.addf %174, %176 : vector<2x32xf32>
    %c0_128 = arith.constant 0 : index
    %c0_129 = arith.constant 0 : index
    %178 = vector.load %arg11[%c0_128, %c0_129] : memref<2x32xf32, #tpu.memory_space<vmem>>, vector<2x32xf32>
    tpu.vector_store %arg11[%c0_128, %c0_129], %177 {strides = array<i32>} : memref<2x32xf32, #tpu.memory_space<vmem>>, vector<2x32xf32>,
    return
  }
}

</mosaic_0001>

<bundles_post_ra>
// kernel: base3d_rings_extractor.1
= control target key start
LH: loop header
LB: loop body
LE: loop exit
PB: predicated region body
PF: predicated region fallthrough
CT: control target
= control target key end

     0   :  { %v141_v3 = vlaneseq  ;;  %v11406_v4 = vmov 0.0|0.0   ;;  %vm11407_vm0 = vmmov 0   ;;  %v11408_v12 = vmov 0.0   ;;  %s12487_s0 = inlined_call_operand.vmem [shape: f32[2,8,32], index: 0, kind: input, shape index: {}]   ;;  %s12488_s1 = inlined_call_operand.vmem [shape: f32[8,32,32], index: 1, kind: input, shape index: {}]   ;;  %s12489_s2 = inlined_call_operand.vmem [shape: f32[8,1,32], index: 2, kind: input, shape index: {}]   ;;  %s12490_s3 = inlined_call_operand.vmem [shape: f32[4,32,8], index: 3, kind: input, shape index: {}]   ;;  %s12491_s4 = inlined_call_operand.vmem [shape: f32[4,32,8], index: 4, kind: input, shape index: {}]   ;;  %s12492_s5 = inlined_call_operand.vmem [shape: f32[4,32,8], index: 5, kind: input, shape index: {}]   ;;  %s12493_s6 = inlined_call_operand.vmem [shape: f32[4,8,32], index: 6, kind: input, shape index: {}]   ;;  %s12494_s7 = inlined_call_operand.vmem [shape: f32[4,1,8], index: 7, kind: input, shape index: {}]   ;;  %s12495_s8 = inlined_call_operand.vmem [shape: f32[4,1,8], index: 8, kind: input, shape index: {}]   ;;  %s12496_s9 = inlined_call_operand.vmem [shape: f32[4,1,8], index: 9, kind: input, shape index: {}]   ;;  %s12497_s10 = inlined_call_operand.vmem [shape: f32[1,32], index: 10, kind: input, shape index: {}]   ;;  %s12498_s11 = inlined_call_operand.hbm [shape: f32[2,32], index: 11, kind: output, shape index: {}]  }
   0x1   :  { %v41_v0 = vld [vmem:[%s12488_s1] sm:$0xff]  ;;  %v42_v1 = vld [vmem:[%s12488_s1 + $0x8] sm:$0xff]  ;;  %11200 = vmatprep.subr.bf16.mxu0 %v11406_v4  ;;  %11206 = vmatprep.subr.bf16.mxu1 %v11406_v4  ;;  %v43_v7 = vld [vmem:[%s12488_s1 + $0x10] sm:$0xff]  ;;  %v11409_v14 = vmov 1983009808   ;;  %vm197_vm1 = vcmask 261120  }
   0x2   :  { %v45_v2 = vld [vmem:[%s12488_s1 + $0x20] sm:$0xff]  ;;  %v11201_v5 = vpack.c.bf16 %v42_v1, %v41_v0  ;;  %v46_v6 = vld [vmem:[%s12488_s1 + $0x28] sm:$0xff]  ;;  %v44_v8 = vld [vmem:[%s12488_s1 + $0x18] sm:$0xff]  ;;  %10888 = vmatprep.mubr.msk.f32.mxu0 %vm11407_vm0, %v11408_v12  ;;  %v139_v15 = vunpack.c.l.s4 %v11409_v14  ;;  %10899 = vmatprep.mubr.msk.f32.mxu1 %vm11407_vm0, %v11408_v12  ;;  %v142_v19 = vshrl.u32 %v141_v3, 7  ;;  %v11410_v20 = vmov 1934713408  }
   0x3   :  { %v11207_v9 = vpack.c.bf16 %v46_v6, %v45_v2  ;;  %v47_v10 = vld [vmem:[%s12488_s1 + $0x30] sm:$0xff]  ;;  %v48_v11 = vld [vmem:[%s12488_s1 + $0x38] sm:$0xff]  ;;  %v10597_v13 = vld.sshfl [vmem:[%s12487_s0] sm:$0xff pattern:$0x76325410]  ;;  %v11204_v16 = vpack.c.bf16 %v44_v8, %v43_v7  ;;  %v164_v21 = vunpack.c.l.s4 %v11410_v20 }
   0x4   :  { %11202 = vmatpush3.bf16.msra.mxu0 %v11201_v5  ;;  %v10598_v17 = vld.sshfl [vmem:[%s12487_s0 + $0x8] sm:$0xff pattern:$0x76325410]  ;;  %v11210_v18 = vpack.c.bf16 %v48_v11, %v47_v10  ;;  %v140_v22 = vunpack.c.0.s8 %v139_v15  ;;  %v49_v25 = vld [vmem:[%s12488_s1 + $0x40] sm:$0xff]  ;;  %v51_v36 = vld [vmem:[%s12488_s1 + $0x50] sm:$0xff] }
   0x5   :  { %11208 = vmatpush3.bf16.msra.mxu1 %v11207_v9  ;;  %11203 = vmatprep.subr.bf16.mxu0 %v11406_v4  ;;  %v161_v23 = vcombine.low %v10597_v13, %v10598_v17  ;;  %v165_v24 = vunpack.c.0.s8 %v164_v21  ;;  %v50_v26 = vld [vmem:[%s12488_s1 + $0x48] sm:$0xff]  ;;  %v53_v28 = vld [vmem:[%s12488_s1 + $0x60] sm:$0xff]  ;;  %v162_v30 = vcombine.high %v10597_v13, %v10598_v17  ;;  %v52_v37 = vld [vmem:[%s12488_s1 + $0x58] sm:$0xff] }
   0x6   :  { %11209 = vmatprep.subr.bf16.mxu1 %v11406_v4  ;;  %v54_v29 = vld [vmem:[%s12488_s1 + $0x68] sm:$0xff]  ;;  %v11213_v31 = vpack.c.bf16 %v50_v26, %v49_v25  ;;  %v39_v32 = vld [vmem:[%s12487_s0] sm:$0xff]  ;;  %v11532_v34 = vsub.s32 %v140_v22, %v142_v19  ;;  %v55_v42 = vld [vmem:[%s12488_s1 + $0x70] sm:$0xff] }
   0x7   :  { %v11516_v27 = vsub.s32 %v165_v24, %v142_v19  ;;  %v40_v33 = vld [vmem:[%s12487_s0 + $0x8] sm:$0xff]  ;;  %v130_v38 = vcombine.high %v39_v32, %v11408_v12  ;;  %v11219_v40 = vpack.c.bf16 %v54_v29, %v53_v28  ;;  %v56_v43 = vld [vmem:[%s12488_s1 + $0x78] sm:$0xff] }
   0x8   :  { %11205 = vmatpush3.bf16.msra.mxu0 %v11204_v16  ;;  %v146_v39 = vcombine.high %v40_v33, %v11408_v12 }
   0x9   :  { %11211 = vmatpush3.bf16.msra.mxu1 %v11210_v18  ;;  %11212 = vmatprep.subr.bf16.mxu0 %v11406_v4  ;;  %v169_v35 = vrot.slane %v161_v23, %v11516_v27 }
   0xa   :  { %11218 = vmatprep.subr.bf16.mxu1 %v11406_v4 }
   0xb   :  { %10889 = vmatmul.mubr.msk.f32.vlgmr.msra.gmra.mrb[0].mxu0 %vm197_vm1, %v169_v35  ;;  %v193_v41 = vcombine.high %v169_v35, %v11408_v12 }
   0xc   :  { %16 = vsyncpa [#allocation3], 0  ;;  %11214 = vmatpush3.bf16.msra.mxu0 %v11213_v31  ;;  %v11216_v44 = vpack.c.bf16 %v52_v37, %v51_v36  ;;  %10910 = vmatprep.mubr.msk.f32.mxu0 %vm11407_vm0, %v11408_v12  ;;  %v176_v45 = vrot.slane %v162_v30, %v11516_v27  ;;  %v57_v46 = vld [vmem:[%s12488_s1 + $0x80] sm:$0xff]  ;;  %v58_v47 = vld [vmem:[%s12488_s1 + $0x88] sm:$0xff]  ;;  %v144_v48 = vrot.slane %v130_v38, %v11532_v34  ;;  %vm2000_vm2 = vcmask 64512   ;;  %s11411_s17 = smov [#allocation2]  }
   0xd   :  { %10900 = vmatmul.mubr.msk.f32.vlgmr.msra.gmra.mrb[0].mxu1 %vm197_vm1, %v193_v41  ;;  %11215 = vmatprep.subr.bf16.mxu0 %v11406_v4  ;;  %v160_v49 = vrot.slane %v146_v39, %v11532_v34  ;;  %v11222_v50 = vpack.c.bf16 %v56_v43, %v55_v42  ;;  %v61_v51 = vld [vmem:[%s12488_s1 + $0xa0] sm:$0xff]  ;;  %v62_v52 = vld [vmem:[%s12488_s1 + $0xa8] sm:$0xff]  ;;  %v11225_v53 = vpack.c.bf16 %v58_v47, %v57_v46  ;;  %v59_v55 = vld [vmem:[%s12488_s1 + $0x90] sm:$0xff]  ;;  %vm3168_vm3 = vcmask 58368   ;;  %s10581_s18 = sshll.u32 %s11411_s17, 4  ;;  %s10582_s18 = int_to_ptr.vmem [resolvable:$true] %s10581_s18 }
   0xe   :  { %11220 = vmatpush3.bf16.msra.mxu1 %v11219_v40  ;;  %10921 = vmatprep.mubr.msk.f32.mxu1 %vm11407_vm0, %v11408_v12  ;;  %v194_v54 = vcombine.high %v176_v45, %v11408_v12  ;;  %v60_v56 = vld [vmem:[%s12488_s1 + $0x98] sm:$0xff]  ;;  %v11231_v58 = vpack.c.bf16 %v62_v52, %v61_v51  ;;  %v63_v59 = vld [vmem:[%s12488_s1 + $0xb0] sm:$0xff]  ;;  %v65_v63 = vld [vmem:[%s12488_s1 + $0xc0] sm:$0xff]  ;;  %vm10573_vm4 = vcmask 254976   ;;  %s11382_s19 = scalar_lea.vmem %s10582_s18, 32  ;;  %p11387_p1 = scmp.lt.s32.totalorder %s10582_s18, %s10582_s18 }
   0xf   :  { %11221 = vmatprep.subr.bf16.mxu1 %v11406_v4  ;;  %v177_v57 = vcombine.low %v144_v48, %v160_v49  ;;  %v64_v60 = vld [vmem:[%s12488_s1 + $0xb8] sm:$0xff]  ;;  %v11228_v61 = vpack.c.bf16 %v60_v56, %v59_v55  ;;  %v66_v0 = vld [vmem:[%s12488_s1 + $0xc8] sm:$0xff]  ;;  %v69_v2 = vld [vmem:[%s12488_s1 + $0xe0] sm:$0xff]  ;;  %v178_v9 = vcombine.high %v144_v48, %v160_v49  ;;  %p11383_p0 = scmp.ne.s32.totalorder %s10582_s18, %s11382_s19  ;;  %p11388_p2 = scmp.lt.s32.totalorder %s11382_s19, %s11382_s19 }
  0x10   :  { %11217 = vmatpush3.bf16.msra.mxu0 %v11216_v44  ;;  %v11234_v1 = vpack.c.bf16 %v64_v60, %v63_v59  ;;  %v70_v3 = vld [vmem:[%s12488_s1 + $0xe8] sm:$0xff]  ;;  %v11237_v5 = vpack.c.bf16 %v66_v0, %v65_v63  ;;  %v67_v7 = vld [vmem:[%s12488_s1 + $0xd0] sm:$0xff]  ;;  %v68_v8 = vld [vmem:[%s12488_s1 + $0xd8] sm:$0xff] }
  0x11   :  { %11224 = vmatprep.subr.bf16.mxu0 %v11406_v4  ;;  %v185_v62 = vrot.slane %v177_v57, %v11516_v27  ;;  %v11243_v10 = vpack.c.bf16 %v70_v3, %v69_v2  ;;  %v71_v11 = vld [vmem:[%s12488_s1 + $0xf0] sm:$0xff]  ;;  %v72_v13 = vld [vmem:[%s12488_s1 + $0xf8] sm:$0xff]  ;;  %v11240_v14 = vpack.c.bf16 %v68_v8, %v67_v7  ;;  %v192_v15 = vrot.slane %v178_v9, %v11516_v27  ;;  %v782_v18 = vld [vmem:[%s12490_s3] sm:$0xff]  ;;  %p11389_p3 = por %p11388_p2, %p11387_p1 }
  0x12   :  { %11223 = vmatpush3.bf16.msra.mxu1 %v11222_v50  ;;  %v11246_v16 = vpack.c.bf16 %v72_v13, %v71_v11  ;;  %v783_v19 = vld [vmem:[%s12490_s3 + $0x8] sm:$0xff]  ;;  %v784_v23 = vld [vmem:[%s12490_s3 + $0x10] sm:$0xff]  ;;  %v785_v24 = vld [vmem:[%s12490_s3 + $0x18] sm:$0xff] }
  0x13   :  { %10911 = vmatmul.mubr.msk.f32.vlgmr.msra.gmra.mrb[2].mxu0 %vm197_vm1, %v176_v45  ;;  %11230 = vmatprep.subr.bf16.mxu1 %v11406_v4  ;;  %v195_v6 = vcombine.high %v185_v62, %v11408_v12  ;;  %v196_v17 = vcombine.high %v192_v15, %v11408_v12  ;;  %v11248_v20 = vpack.c.bf16 %v783_v19, %v782_v18  ;;  %v968_v21 = vld [vmem:[%s12491_s4 + $0x8] sm:$0xff]  ;;  %v969_v26 = vld [vmem:[%s12491_s4 + $0x10] sm:$0xff]  ;;  %v970_v28 = vld [vmem:[%s12491_s4 + $0x18] sm:$0xff]  ;;  %p11390_p4 = pnand %p11389_p3, %p11383_p0 }
  0x14   :  { %11226 = vmatpush3.bf16.msra.mxu0 %v11225_v53  ;;  %10932 = vmatprep.mubr.msk.f32.mxu0 %vm11407_vm0, %v11408_v12  ;;  %v11252_v25 = vpack.c.bf16 %v785_v24, %v784_v23  ;;  %v11260_v29 = vpack.c.bf16 %v970_v28, %v969_v26  ;;  %v1106_v30 = vld [vmem:[%s12492_s5] sm:$0xff]  ;;  %v1107_v31 = vld [vmem:[%s12492_s5 + $0x8] sm:$0xff]  ;;  %v1109_v11 = vld [vmem:[%s12492_s5 + $0x18] sm:$0xff] }
  0x15   :  { %10922 = vmatmul.mubr.msk.f32.vlgmr.msra.gmra.mrb[2].mxu1 %vm197_vm1, %v194_v54  ;;  %11227 = vmatprep.subr.bf16.mxu0 %v11406_v4  ;;  %v11264_v32 = vpack.c.bf16 %v1107_v31, %v1106_v30  ;;  %v10589_v33 = vld [vmem:[%s12489_s2] ss:$0 sm:$0xff]  ;;  %v10590_v36 = vld [vmem:[%s12489_s2 + $0x1] ss:$0 sm:$0xff]  ;;  %v10591_v43 = vld [vmem:[%s12489_s2 + $0x2] ss:$0 sm:$0xff] }
  0x16   :  { %11232 = vmatpush3.bf16.msra.mxu1 %v11231_v58  ;;  %10943 = vmatprep.mubr.msk.f32.mxu1 %vm11407_vm0, %v11408_v12  ;;  %v10592_v45 = vld [vmem:[%s12489_s2 + $0x3] ss:$0 sm:$0xff]  ;;  %v10593_v52 = vld [vmem:[%s12489_s2 + $0x4] ss:$0 sm:$0xff]  ;;  %v10594_v56 = vld [vmem:[%s12489_s2 + $0x5] ss:$0 sm:$0xff] }
  0x17   :  { %11233 = vmatprep.subr.bf16.mxu1 %v11406_v4  ;;  %v10595_v0 = vld [vmem:[%s12489_s2 + $0x6] ss:$0 sm:$0xff]  ;;  %v10596_v2 = vld [vmem:[%s12489_s2 + $0x7] ss:$0 sm:$0xff]  ;;  %v10610_v18 = vld [vmem:[%s12495_s8] ss:$0 sm:$0xff] }
  0x18   :  { %11229 = vmatpush3.bf16.msra.mxu0 %v11228_v61 }
  0x19   :  { %11236 = vmatprep.subr.bf16.mxu0 %v11406_v4 }
  0x1a   :  { %11235 = vmatpush3.bf16.msra.mxu1 %v11234_v1 }
  0x1b   :  { %10933 = vmatmul.mubr.msk.f32.vlgmr.msra.gmra.mrb[4].mxu0 %vm197_vm1, %v185_v62  ;;  %11242 = vmatprep.subr.bf16.mxu1 %v11406_v4 }
  0x1c   :  { %11238 = vmatpush3.bf16.msra.mxu0 %v11237_v5  ;;  %10954 = vmatprep.mubr.msk.f32.mxu0 %vm11407_vm0, %v11408_v12 }
  0x1d   :  { %10944 = vmatmul.mubr.msk.f32.vlgmr.msra.gmra.mrb[4].mxu1 %vm197_vm1, %v195_v6  ;;  %11239 = vmatprep.subr.bf16.mxu0 %v11406_v4 }
  0x1e   :  { %11244 = vmatpush3.bf16.msra.mxu1 %v11243_v10  ;;  %10965 = vmatprep.mubr.msk.f32.mxu1 %vm11407_vm0, %v11408_v12  ;;  %v1108_v10 = vld [vmem:[%s12492_s5 + $0x10] sm:$0xff] }
  0x1f   :  { %11245 = vmatprep.subr.bf16.mxu1 %v11406_v4  ;;  %v967_v4 = vld [vmem:[%s12491_s4] sm:$0xff] }
  0x20   :  { %11241 = vmatpush3.bf16.msra.mxu0 %v11240_v14  ;;  %v11256_v22 = vpack.c.bf16 %v968_v21, %v967_v4 }
  0x21   :  { %11249 = vmatprep.subr.bf16.mxu0 %v11248_v20 }
  0x22   :  { %11247 = vmatpush3.bf16.msra.mxu1 %v11246_v16  ;;  %v11268_v16 = vpack.c.bf16 %v1109_v11, %v1108_v10 }
  0x23   :  { %10955 = vmatmul.mubr.msk.f32.vlgmr.msra.gmra.mrb[6].mxu0 %vm197_vm1, %v192_v15  ;;  %11257 = vmatprep.subr.bf16.mxu1 %v11256_v22 }
  0x24   :  { %11251 = vmatpush3.bf16.msra.mxu0 %v11248_v20  ;;  %v977_v20 = vcombine.low %v10610_v18, %v10610_v18 }
  0x25   :  { %10966 = vmatmul.mubr.msk.f32.vlgmr.msra.gmra.mrb[6].mxu1 %vm197_vm1, %v196_v17  ;;  %11253 = vmatprep.subr.bf16.mxu0 %v11252_v25  ;;  %v10607_v17 = vld [vmem:[%s12494_s7] ss:$0 sm:$0xff] }
  0x26   :  { %11259 = vmatpush3.bf16.msra.mxu1 %v11256_v22  ;;  %v834_v19 = vcombine.low %v10607_v17, %v10607_v17  ;;  %v984_v21 = vrot.slane %v977_v20, %v11532_v34 }
  0x27   :  { %11261 = vmatprep.subr.bf16.mxu1 %v11260_v29 }
  0x28   :  { %11255 = vmatpush3.bf16.msra.mxu0 %v11252_v25  ;;  %v841_v4 = vrot.slane %v834_v19, %v11532_v34  ;;  %v985_v23 = vcombine.low %v984_v21, %v984_v21 }
  0x29   :  { %11265 = vmatprep.subr.bf16.mxu0 %v11264_v32 }
  0x2a   :  { %11263 = vmatpush3.bf16.msra.mxu1 %v11260_v29  ;;  %v842_v22 = vcombine.low %v841_v4, %v841_v4 }
  0x2b   :  { %11001 = vmatprep.subr.mxu1 %v11408_v12 }
  0xde   :  { %v267_v35 = vpop.f32.mrb[0].mxu0 }
  0xdf   :  { %v268_v37 = vadd.f32 %v10589_v33, %v267_v35  ;;  %v10890_v38 = vpop.f32.mrb[1].mxu0 }
  0xe0   :  { %v340_v39 = vpop.f32.mrb[0].mxu1 }
  0xe1   :  { %v341_v40 = vadd.f32 %v10590_v36, %v340_v39  ;;  %v10901_v41 = vpop.f32.mrb[1].mxu1 }
  0xe3   :  { %v800_v42 = vcombine.low %v268_v37, %v341_v40 }
  0xe5   :  { %v808_v53 = vrot.slane %v800_v42, %v11532_v34 }
  0xe6   :  { %v413_v44 = vpop.f32.mrb[2].mxu0 }
  0xe7   :  { %v414_v46 = vadd.f32 %v10591_v43, %v413_v44  ;;  %v10912_v47 = vpop.f32.mrb[3].mxu0 }
  0xe8   :  { %v486_v48 = vpop.f32.mrb[2].mxu1 }
  0xe9   :  { %v487_v49 = vadd.f32 %v10592_v45, %v486_v48  ;;  %v10923_v50 = vpop.f32.mrb[3].mxu1 }
  0xeb   :  { %v801_v51 = vcombine.low %v414_v46, %v487_v49 }
  0xed   :  { %v815_v54 = vrot.slane %v801_v51, %v11532_v34 }
  0xee   :  { %v559_v55 = vpop.f32.mrb[4].mxu0 }
  0xef   :  { %v11687_v57 = vcombine.low %v808_v53, %v815_v54  ;;  %v560_v58 = vadd.f32 %v10593_v52, %v559_v55  ;;  %v10934_v59 = vpop.f32.mrb[5].mxu0 }
  0xf0   :  { %v632_v60 = vpop.f32.mrb[4].mxu1 }
  0xf1   :  { %v633_v61 = vadd.f32 %v10594_v56, %v632_v60  ;;  %v10945_v62 = vpop.f32.mrb[5].mxu1  ;;  %10976 = vmatprep.mubr.msk.f32.mxu0 %vm197_vm1, %v11687_v57  ;;  %10987 = vmatprep.mubr.msk.f32.mxu1 %vm197_vm1, %v11687_v57 }
  0xf3   :  { %v817_v63 = vcombine.low %v560_v58, %v633_v61 }
  0xf5   :  { %v825_v13 = vrot.slane %v817_v63, %v11532_v34 }
  0xf6   :  { %v705_v1 = vpop.f32.mrb[6].mxu0 }
  0xf7   :  { %v706_v3 = vadd.f32 %v10595_v0, %v705_v1  ;;  %v10956_v5 = vpop.f32.mrb[7].mxu0 }
  0xf8   :  { %v778_v6 = vpop.f32.mrb[6].mxu1 }
  0xf9   :  { %v779_v7 = vadd.f32 %v10596_v2, %v778_v6  ;;  %v10967_v8 = vpop.f32.mrb[7].mxu1 }
  0xfb   :  { %v818_v9 = vcombine.low %v706_v3, %v779_v7 }
  0xfd   :  { %v832_v14 = vrot.slane %v818_v9, %v11532_v34 }
  0xff   :  { %v11707_v15 = vcombine.low %v825_v13, %v832_v14 }
 0x101   :  { %10977 = vmatmul.mubr.msk.f32.vlgmr.msra.gmra.mrb[8].mxu0 %vm197_vm1, %v11707_v15  ;;  %10988 = vmatmul.mubr.msk.f32.vlgmr.msra.gmra.mrb[8].mxu1 %vm197_vm1, %v11707_v15 }
 0x102   :  { %11267 = vmatpush3.bf16.msra.mxu0 %v11264_v32  ;;  %10998 = vmatprep.mubr.msk.f32.mxu0 %vm197_vm1, %v11687_v57 }
 0x103   :  { %11269 = vmatprep.subr.bf16.mxu0 %v11268_v16  ;;  %11003 = vmatprep.mubr.msk.f32.mxu1 %vm11407_vm0, %v11408_v12 }
 0x106   :  { %11271 = vmatpush3.bf16.msra.mxu0 %v11268_v16 }
 0x107   :  { %11011 = vmatprep.subr.mxu0 %v11408_v12 }
 0x109   :  { %10999 = vmatmul.mubr.msk.f32.vlgmr.msra.gmra.mrb[10].mxu0 %vm197_vm1, %v11707_v15 }
 0x10a   :  { %11013 = vmatprep.mubr.msk.f32.mxu0 %vm11407_vm0, %v11408_v12 }
 0x1d4   :  { %v10978_v24 = vpop.f32.mrb[8].mxu0  ;;  %v10989_v25 = vpop.f32.mrb[8].mxu1 }
 0x1d5   :  { %v920_v26 = vadd.f32 %v10978_v24, %v842_v22  ;;  %v1059_v28 = vadd.f32 %v10989_v25, %v985_v23  ;;  %v914_v29 = vpop.f32.mrb[9].mxu0  ;;  %v1053_v30 = vpop.f32.mrb[9].mxu1  ;;  %v10613_v25 = vld [vmem:[%s12496_s9] ss:$0 sm:$0xff] }
 0x1d6   :  { %v915_v31 = vadd.f32 %v914_v29, %v842_v22  ;;  %v1054_v32 = vadd.f32 %v1053_v30, %v985_v23 }
 0x1d7   :  { %v942_v33 = vcombine.high %v920_v26, %v920_v26  ;;  %v949_v35 = vrot.slane %v920_v26, %v11532_v34  ;;  %v1088_v36 = vrot.slane %v1059_v28, %v11532_v34  ;;  %v1081_v52 = vcombine.high %v1059_v28, %v1059_v28 }
 0x1d8   :  { %v925_v37 = vcombine.high %v915_v31, %v915_v31  ;;  %v932_v38 = vrot.slane %v915_v31, %v11532_v34  ;;  %v1064_v41 = vcombine.high %v1054_v32, %v1054_v32  ;;  %v1071_v47 = vrot.slane %v1054_v32, %v11532_v34 }
 0x1d9   :  { %v956_v39 = vrot.slane %v942_v33, %v11532_v34  ;;  %v957_v40 = vcombine.high %v949_v35, %v949_v35  ;;  %1409 = vxpose.xlu0.b32.start.end [1/1] (short) (narrow) %v1088_v36, 8  ;;  %v1096_v42 = vcombine.high %v1088_v36, %v1088_v36  ;;  %v1095_v1 = vrot.slane %v1081_v52, %v11532_v34 }
 0x1da   :  { %v939_v43 = vrot.slane %v925_v37, %v11532_v34  ;;  %v940_v44 = vcombine.high %v932_v38, %v932_v38  ;;  %v1078_v54 = vrot.slane %v1064_v41, %v11532_v34  ;;  %v1079_v59 = vcombine.high %v1071_v47, %v1071_v47 }
 0x1db   :  { %v958_v45 = vcombine.high %v956_v39, %v956_v39  ;;  %v1263_v46 = vcombine.low %v949_v35, %v957_v40  ;;  %1441 = vxpose.xlu1.b32.start.end [1/1] (short) (narrow) %v1096_v42, 8  ;;  %v1097_v9 = vcombine.high %v1095_v1, %v1095_v1  ;;  %v1116_v36 = vcombine.low %v10613_v25, %v10613_v25 }
 0x1dc   :  { %v941_v48 = vcombine.high %v939_v43, %v939_v43  ;;  %v1245_v49 = vcombine.low %v932_v38, %v940_v44  ;;  %v11736_v50 = vpop.f32.mrb[10].mxu0  ;;  %v1080_v0 = vcombine.high %v1078_v54, %v1078_v54 }
 0x1dd   :  { %v1272_v51 = vcombine.low %v956_v39, %v958_v45  ;;  %v11738_v53 = vpop.f32.mrb[11].mxu0  ;;  %1281 = vxpose.xlu0.b32.start.end [1/1] (short) (narrow) %v1071_v47, 8  ;;  %v1270_v56 = vrot.slane %v1263_v46, %v11516_v27  ;;  %v1123_v46 = vrot.slane %v1116_v36, %v11532_v34 }
 0x1de   :  { %v1254_v55 = vcombine.low %v939_v43, %v941_v48  ;;  %v1252_v60 = vrot.slane %v1245_v49, %v11516_v27 }
 0x1df   :  { %v1279_v58 = vrot.slane %v1272_v51, %v11516_v27  ;;  %1345 = vxpose.xlu1.b32.start.end [1/1] (short) (narrow) %v1078_v54, 8 }
 0x1e0   :  { %v1261_v61 = vrot.slane %v1254_v55, %v11516_v27 }
 0x1e1   :  { %v1984_v62 = vcombine.low %v1270_v56, %v1279_v58  ;;  %v10618_v63 = vcombine.high %v1270_v56, %v1279_v58  ;;  %1313 = vxpose.xlu0.b32.start.end [1/1] (short) (narrow) %v1079_v59, 8  ;;  %v1124_v56 = vcombine.low %v1123_v46, %v1123_v46 }
 0x1e2   :  { %v1983_v2 = vcombine.low %v1252_v60, %v1261_v61  ;;  %v10617_v3 = vcombine.high %v1252_v60, %v1261_v61 }
 0x1e3   :  { %v11747_v5 = vrot.slane %v1984_v62, %v11532_v34  ;;  %v11750_v6 = vrot.slane %v10618_v63, %v11532_v34  ;;  %1377 = vxpose.xlu1.b32.start.end [1/1] (short) (narrow) %v1080_v0, 8  ;;  %v1193_v0 = vadd.f32 %v11738_v53, %v1124_v56 }
 0x1e4   :  { %v11753_v7 = vrot.slane %v1983_v2, %v11532_v34  ;;  %v11756_v8 = vrot.slane %v10617_v3, %v11532_v34 }
 0x1e5   :  { %1473 = vxpose.xlu0.b32.start.end [1/1] (short) (narrow) %v1095_v1, 8 }
 0x1e6   :  { %v1999_v10 = vcombine.low %v11753_v7, %v11747_v5  ;;  %v2093_v11 = vcombine.low %v11756_v8, %v11750_v6 }
 0x1e7   :  { %1505 = vxpose.xlu1.b32.start.end [1/1] (short) (narrow) %v1097_v9, 8 }
 0x259   :  { %v1425_v13 = vpop.trf.xlu0 }
 0x25b   :  { %v1457_v14 = vpop.trf.xlu1 }
 0x25d   :  { %v1297_v16 = vpop.trf.xlu0 }
 0x25f   :  { %v1361_v17 = vpop.trf.xlu1 }
 0x260   :  { %v1537_v20 = vcombine.low %v1297_v16, %v1361_v17  ;;  %v1538_v37 = vcombine.high %v1297_v16, %v1361_v17  ;;  %v1210_v17 = vrot.slane %v1193_v0, %v11532_v34 }
 0x261   :  { %v1329_v18 = vpop.trf.xlu0 }
 0x262   :  { %v1545_v26 = vrot.slane %v1537_v20, %v11532_v34  ;;  %v1552_v47 = vrot.slane %v1538_v37, %v11532_v34 }
 0x263   :  { %v1393_v19 = vpop.trf.xlu1 }
 0x264   :  { %v1553_v4 = vcombine.low %v1329_v18, %v1393_v19  ;;  %v1554_v30 = vcombine.high %v1329_v18, %v1393_v19  ;;  %v1198_v18 = vadd.f32 %v11736_v50, %v1124_v56  ;;  %v1218_v19 = vcombine.high %v1210_v17, %v1210_v17 }
 0x265   :  { %v1489_v21 = vpop.trf.xlu0 }
 0x266   :  { %v1561_v22 = vrot.slane %v1553_v4, %v11532_v34  ;;  %v1569_v23 = vcombine.low %v1425_v13, %v1489_v21  ;;  %v1570_v31 = vcombine.high %v1425_v13, %v1489_v21  ;;  %v1568_v41 = vrot.slane %v1554_v30, %v11532_v34 }
 0x267   :  { %v1521_v24 = vpop.trf.xlu1  ;;  %v1203_v13 = vcombine.high %v1193_v0, %v1193_v0  ;;  %v1227_v20 = vrot.slane %v1198_v18, %v11532_v34 }
 0x268   :  { %v1585_v28 = vcombine.low %v1457_v14, %v1521_v24  ;;  %v1586_v29 = vcombine.high %v1457_v14, %v1521_v24  ;;  %v1577_v32 = vrot.slane %v1569_v23, %v11532_v34  ;;  %v1601_v35 = vcombine.low %v1545_v26, %v1561_v22 }
 0x269   :  { %v1584_v42 = vrot.slane %v1570_v31, %v11532_v34  ;;  %v1602_v45 = vcombine.high %v1545_v26, %v1561_v22  ;;  %v1617_v55 = vcombine.low %v1552_v47, %v1568_v41  ;;  %v1618_v63 = vcombine.high %v1552_v47, %v1568_v41 }
 0x26a   :  { %v1593_v33 = vrot.slane %v1585_v28, %v11532_v34  ;;  %v1600_v38 = vrot.slane %v1586_v29, %v11532_v34  ;;  %v1609_v43 = vrot.slane %v1601_v35, %v11516_v27  ;;  %v1217_v53 = vrot.slane %v1203_v13, %v11532_v34 }
 0x26b   :  { %v1616_v54 = vrot.slane %v1602_v45, %v11516_v27  ;;  %v1625_v62 = vrot.slane %v1617_v55, %v11516_v27  ;;  %v1632_v9 = vrot.slane %v1618_v63, %v11516_v27  ;;  %v1235_v21 = vcombine.high %v1227_v20, %v1227_v20 }
 0x26c   :  { %v1633_v39 = vcombine.low %v1577_v32, %v1593_v33  ;;  %v1634_v40 = vcombine.high %v1577_v32, %v1593_v33  ;;  %v1649_v52 = vcombine.low %v1584_v42, %v1600_v38  ;;  %v1650_v61 = vcombine.high %v1584_v42, %v1600_v38 }
 0x26d   :  { %v1219_v4 = vcombine.high %v1217_v53, %v1217_v53 }
 0x26e   :  { %v1641_v44 = vrot.slane %v1633_v39, %v11516_v27  ;;  %v1648_v51 = vrot.slane %v1634_v40, %v11516_v27  ;;  %v1657_v60 = vrot.slane %v1649_v52, %v11516_v27  ;;  %v1664_v3 = vrot.slane %v1650_v61, %v11516_v27 }
 0x270   :  { %v1666_v48 = vcombine.high %v1609_v43, %v1641_v44  ;;  %v1665_v49 = vcombine.low %v1609_v43, %v1641_v44  ;;  %v1668_v58 = vcombine.high %v1616_v54, %v1648_v51  ;;  %v1667_v59 = vcombine.low %v1616_v54, %v1648_v51 }
 0x271   :  { %v1670_v1 = vcombine.high %v1625_v62, %v1657_v60  ;;  %v1669_v2 = vcombine.low %v1625_v62, %v1657_v60  ;;  %v1672_v14 = vcombine.high %v1632_v9, %v1664_v3  ;;  %v1671_v16 = vcombine.low %v1632_v9, %v1664_v3 }
 0x272   :  { %1705 = vxpose.xlu1.b32.start.end [1/1] (short) (narrow) %v1666_v48, 8  ;;  %1673 = vxpose.xlu0.b32.start.end [1/1] (short) (narrow) %v1665_v49, 8  ;;  %v1220_v48 = vcombine.high %v1198_v18, %v1198_v18 }
 0x274   :  { %v1234_v6 = vrot.slane %v1220_v48, %v11532_v34 }
 0x276   :  { %1769 = vxpose.xlu1.b32.start.end [1/1] (short) (narrow) %v1668_v58, 8  ;;  %1737 = vxpose.xlu0.b32.start.end [1/1] (short) (narrow) %v1667_v59, 8  ;;  %v1236_v8 = vcombine.high %v1234_v6, %v1234_v6 }
 0x27a   :  { %1833 = vxpose.xlu1.b32.start.end [1/1] (short) (narrow) %v1670_v1, 8  ;;  %1801 = vxpose.xlu0.b32.start.end [1/1] (short) (narrow) %v1669_v2, 8 }
 0x27e   :  { %1897 = vxpose.xlu1.b32.start.end [1/1] (short) (narrow) %v1672_v14, 8  ;;  %1865 = vxpose.xlu0.b32.start.end [1/1] (short) (narrow) %v1671_v16, 8 }
 0x282   :  { %2188 = vxpose.xlu1.b32.start.end [1/1] (short) (narrow) %v1210_v17, 8  ;;  %2220 = vxpose.xlu0.b32.start.end [1/1] (short) (narrow) %v1218_v19, 8 }
 0x286   :  { %2284 = vxpose.xlu1.b32.start.end [1/1] (short) (narrow) %v1219_v4, 8  ;;  %2252 = vxpose.xlu0.b32.start.end [1/1] (short) (narrow) %v1217_v53, 8 }
 0x28a   :  { %2348 = vxpose.xlu1.b32.start.end [1/1] (short) (narrow) %v1235_v21, 8  ;;  %2316 = vxpose.xlu0.b32.start.end [1/1] (short) (narrow) %v1227_v20, 8 }
 0x2f2   :  { %v1721_v22 = vpop.trf.xlu1  ;;  %v1689_v23 = vpop.trf.xlu0 }
 0x2f6   :  { %v1785_v24 = vpop.trf.xlu1  ;;  %v1753_v25 = vpop.trf.xlu0 }
 0x2f7   :  { %v1937_v26 = vcombine.low %v1721_v22, %v1785_v24  ;;  %v1929_v28 = vcombine.low %v1689_v23, %v1753_v25 }
 0x2f9   :  { %v1944_v30 = vrot.slane %v1937_v26, %v11532_v34  ;;  %v1936_v31 = vrot.slane %v1929_v28, %v11532_v34 }
 0x2fa   :  { %v1849_v50 = vpop.trf.xlu1  ;;  %v1817_v29 = vpop.trf.xlu0 }
 0x2fb   :  { %v1961_v37 = vcombine.low %v1936_v31, %v1944_v30 }
 0x2fd   :  { %v1968_v41 = vrot.slane %v1961_v37, %v11516_v27 }
 0x2fe   :  { %v1913_v32 = vpop.trf.xlu1  ;;  %v1881_v33 = vpop.trf.xlu0 }
 0x2ff   :  { %v1953_v35 = vcombine.low %v1849_v50, %v1913_v32  ;;  %v1945_v36 = vcombine.low %v1817_v29, %v1881_v33 }
 0x301   :  { %v1960_v38 = vrot.slane %v1953_v35, %v11532_v34  ;;  %v1952_v39 = vrot.slane %v1945_v36, %v11532_v34 }
 0x302   :  { %v2204_v56 = vpop.trf.xlu1 }
 0x303   :  { %v1969_v40 = vcombine.low %v1952_v39, %v1960_v38 }
 0x305   :  { %v1976_v42 = vrot.slane %v1969_v40, %v11516_v27 }
 0x306   :  { %v2300_v60 = vpop.trf.xlu1 }
 0x307   :  { %v1977_v43 = vcombine.low %v1968_v41, %v1976_v42  ;;  %v1978_v44 = vcombine.high %v1968_v41, %v1976_v42 }
 0x309   :  { %11002 = vmatpush3.msra.mxu1 %v1977_v43 }
 0x30a   :  { %11004 = vmatmul.mubr.msk.f32.vlgmr.msra.gmra.mrb[10].mxu1 %vm2000_vm2, %v1999_v10  ;;  %11006 = vmatprep.subr.mxu1 %v11408_v12  ;;  %v2364_v61 = vpop.trf.xlu1 }
 0x30b   :  { %11007 = vmatpush3.msra.mxu1 %v1978_v44  ;;  %11008 = vmatprep.mubr.msk.f32.mxu1 %vm11407_vm0, %v11408_v12 }
 0x30c   :  { %11016 = vmatprep.subr.mxu1 %v11408_v12 }
 0x30e   :  { %11009 = vmatmul.mubr.msk.f32.vlgmr.msra.gmra.mrb[12].mxu1 %vm2000_vm2, %v2093_v11  ;;  %v2236_v11 = vpop.trf.xlu0 }
 0x30f   :  { %11018 = vmatprep.mubr.msk.f32.mxu1 %vm11407_vm0, %v11408_v12  ;;  %v2460_v62 = vcombine.low %v2236_v11, %v2300_v60  ;;  %v2461_v23 = vcombine.high %v2236_v11, %v2300_v60 }
 0x311   :  { %v2468_v2 = vrot.slane %v2460_v62, %v11532_v34  ;;  %v2475_v30 = vrot.slane %v2461_v23, %v11532_v34 }
 0x312   :  { %v2268_v49 = vpop.trf.xlu0 }
 0x313   :  { %v2444_v63 = vcombine.low %v2204_v56, %v2268_v49  ;;  %v2445_v24 = vcombine.high %v2204_v56, %v2268_v49  ;;  %v10632_v49 = vld [vmem:[%s12491_s4 + $0x20] sm:$0xff] }
 0x315   :  { %v2452_v3 = vrot.slane %v2444_v63, %v11532_v34  ;;  %v2459_v31 = vrot.slane %v2445_v24, %v11532_v34  ;;  %v10624_v24 = vld [vmem:[%s12490_s3 + $0x20] sm:$0xff] }
 0x316   :  { %v2332_v51 = vpop.trf.xlu0 }
 0x317   :  { %v2508_v18 = vcombine.low %v2452_v3, %v2468_v2  ;;  %v2509_v26 = vcombine.high %v2452_v3, %v2468_v2  ;;  %v2524_v37 = vcombine.low %v2459_v31, %v2475_v30  ;;  %v2525_v43 = vcombine.high %v2459_v31, %v2475_v30  ;;  %v10627_v30 = vld [vmem:[%s12490_s3 + $0x38] sm:$0xff] }
 0x319   :  { %v2516_v53 = vrot.slane %v2508_v18, %v11516_v27  ;;  %v2523_v33 = vrot.slane %v2509_v26, %v11516_v27  ;;  %v2532_v40 = vrot.slane %v2524_v37, %v11516_v27  ;;  %v10642_v37 = vld [vmem:[%s12492_s5 + $0x30] sm:$0xff] }
 0x3dd   :  { %v11807_v45 = vpop.f32.mrb[10].mxu1 }
 0x3de   :  { %v11005_v5 = vpop.f32.mrb[11].mxu1  ;;  %v2166_v7 = vsel %vm2000_vm2, %v11807_v45, -inf }
 0x3df   :  { %2167 = vmax.xlane.f32.xlu1 %v2166_v7  ;;  %v2539_v7 = vrot.slane %v2525_v43, %v11516_v27 }
 0x3e1   :  { %v2162_v10 = vpop.f32.mrb[12].mxu1 }
 0x3e2   :  { %v11010_v46 = vpop.f32.mrb[13].mxu1  ;;  %v2169_v47 = vsel %vm2000_vm2, %v2162_v10, -inf }
 0x3e3   :  { %2170 = vmax.xlane.f32.xlu0 %v2169_v47 }
 0x410   :  { %2380 = vxpose.xlu0.b32.start.end [1/1] (short) (narrow) %v1234_v6, 8 }
 0x412   :  { %2412 = vxpose.xlu1.b32.start.end [1/1] (short) (narrow) %v1236_v8, 8 }
 0x46c   :  { %v2168_v0 = vpop.xlane.xlu1 %2167 }
 0x46d   :  { %v2172_v47 = vsub.f32 %v11807_v45, %v2168_v0 }
 0x46f   :  { %v2174_v48 = vmul.f32 1.442695, %v2172_v47 }
 0x470   :  { %v2171_v52 = vpop.xlane.xlu0 %2170 }
 0x471   :  { %v2173_v54 = vsub.f32 %v2162_v10, %v2171_v52 }
 0x473   :  { %v2176_v55 = vmul.f32 1.442695, %v2173_v54 }
 0x475   :  { %11350 = vpow2.f32 %v2176_v55 }
 0x476   :  { %11352 = vpow2.f32 %v2174_v48 }
 0x47f   :  { %v11813_v58 = vpop.eup %11350 }
 0x480   :  { %v2181_v59 = vsel %vm2000_vm2, %v11813_v58, 0.0  ;;  %v11353_v6 = vpop.eup %11352 }
 0x481   :  { %2182 = vadd.xlane.f32.xlu0 %v2181_v59  ;;  %v2178_v8 = vsel %vm2000_vm2, %v11353_v6, 0.0 }
 0x490   :  { %v2396_v1 = vpop.trf.xlu0 }
 0x491   :  { %v2476_v9 = vcombine.low %v2332_v51, %v2396_v1  ;;  %v2477_v25 = vcombine.high %v2332_v51, %v2396_v1  ;;  %v10633_v51 = vld [vmem:[%s12491_s4 + $0x28] sm:$0xff] }
 0x492   :  { %v2428_v13 = vpop.trf.xlu1  ;;  %v11280_v54 = vpack.c.bf16 %v10633_v51, %v10632_v49 }
 0x493   :  { %v2492_v14 = vcombine.low %v2364_v61, %v2428_v13  ;;  %v2484_v16 = vrot.slane %v2476_v9, %v11532_v34  ;;  %v2493_v4 = vcombine.high %v2364_v61, %v2428_v13  ;;  %v2491_v32 = vrot.slane %v2477_v25, %v11532_v34  ;;  %v10625_v25 = vld [vmem:[%s12490_s3 + $0x28] sm:$0xff] }
 0x495   :  { %v2500_v17 = vrot.slane %v2492_v14, %v11532_v34  ;;  %v2507_v28 = vrot.slane %v2493_v4, %v11532_v34 }
 0x497   :  { %v2540_v19 = vcombine.low %v2484_v16, %v2500_v17  ;;  %v2541_v22 = vcombine.high %v2484_v16, %v2500_v17  ;;  %v2556_v36 = vcombine.low %v2491_v32, %v2507_v28  ;;  %v2557_v42 = vcombine.high %v2491_v32, %v2507_v28 }
 0x498   :  { %v11272_v28 = vpack.c.bf16 %v10625_v25, %v10624_v24 }
 0x499   :  { %v2548_v20 = vrot.slane %v2540_v19, %v11516_v27  ;;  %v2555_v29 = vrot.slane %v2541_v22, %v11516_v27  ;;  %v2564_v39 = vrot.slane %v2556_v36, %v11516_v27  ;;  %v2571_v5 = vrot.slane %v2557_v42, %v11516_v27  ;;  %v10634_v19 = vld [vmem:[%s12491_s4 + $0x30] sm:$0xff] }
 0x49b   :  { %v2572_v21 = vcombine.low %v2516_v53, %v2548_v20  ;;  %v2573_v50 = vcombine.high %v2516_v53, %v2548_v20  ;;  %v2574_v35 = vcombine.low %v2523_v33, %v2555_v29  ;;  %v2575_v38 = vcombine.high %v2523_v33, %v2555_v29  ;;  %v10635_v53 = vld [vmem:[%s12491_s4 + $0x38] sm:$0xff]  ;;  %v10626_v29 = vld [vmem:[%s12490_s3 + $0x30] sm:$0xff]  ;;  %v10640_v33 = vld [vmem:[%s12492_s5 + $0x20] sm:$0xff] }
 0x49c   :  { %v2576_v41 = vcombine.low %v2532_v40, %v2564_v39  ;;  %v2577_v44 = vcombine.high %v2532_v40, %v2564_v39  ;;  %v2578_v10 = vcombine.low %v2539_v7, %v2571_v5  ;;  %v2579_v46 = vcombine.high %v2539_v7, %v2571_v5  ;;  %v10637_v40 = vld [vmem:[%s12495_s8 + $0x1] ss:$0 sm:$0xff] }
 0x49d   :  { %2580 = vxpose.xlu1.b32.start.end [1/1] (short) (narrow) %v2572_v21, 8  ;;  %v11284_v22 = vpack.c.bf16 %v10635_v53, %v10634_v19  ;;  %v11276_v32 = vpack.c.bf16 %v10627_v30, %v10626_v29 }
 0x4a1   :  { %2612 = vxpose.xlu1.b32.start.end [1/1] (short) (narrow) %v2573_v50, 8 }
 0x4a5   :  { %2644 = vxpose.xlu1.b32.start.end [1/1] (short) (narrow) %v2574_v35, 8  ;;  %v10641_v35 = vld [vmem:[%s12492_s5 + $0x28] sm:$0xff] }
 0x4a6   :  { %v11288_v36 = vpack.c.bf16 %v10641_v35, %v10640_v33 }
 0x4a9   :  { %2676 = vxpose.xlu1.b32.start.end [1/1] (short) (narrow) %v2575_v38, 8  ;;  %v10643_v38 = vld [vmem:[%s12492_s5 + $0x38] sm:$0xff] }
 0x4aa   :  { %v11292_v39 = vpack.c.bf16 %v10643_v38, %v10642_v37 }
 0x4ad   :  { %2708 = vxpose.xlu1.b32.start.end [1/1] (short) (narrow) %v2576_v41, 8  ;;  %v3338_v41 = vcombine.low %v10637_v40, %v10637_v40 }
 0x4b1   :  { %2740 = vxpose.xlu1.b32.start.end [1/1] (short) (narrow) %v2577_v44, 8  ;;  %v3345_v44 = vrot.slane %v3338_v41, %v11532_v34 }
 0x4b3   :  { %v3346_v5 = vcombine.low %v3345_v44, %v3345_v44 }
 0x4b5   :  { %2772 = vxpose.xlu1.b32.start.end [1/1] (short) (narrow) %v2578_v10, 8 }
 0x4b9   :  { %2804 = vxpose.xlu1.b32.start.end [1/1] (short) (narrow) %v2579_v46, 8 }
 0x4e0   :  { %2179 = vadd.xlane.f32.xlu1 %v2178_v8 }
 0x50e   :  { %v2183_v11 = vpop.xlane.xlu0 %2182 }
 0x50f   :  { %11354 = vrcp.f32 %v2183_v11 }
 0x519   :  { %v11355_v52 = vpop.eup %11354 }
 0x51a   :  { %v2187_v45 = vmul.f32 %v11355_v52, %v11813_v58 }
 0x51c   :  { %11017 = vmatpush3.xpose.msk.msra.mxu1 %vm2000_vm2, %v2187_v45 }
 0x51d   :  { %v2596_v55 = vpop.trf.xlu1  ;;  %11281 = vmatprep.subr.bf16.mxu1 %v11280_v54 }
 0x521   :  { %v2628_v56 = vpop.trf.xlu1 }
 0x525   :  { %v2660_v59 = vpop.trf.xlu1 }
 0x526   :  { %v2836_v1 = vcombine.low %v2596_v55, %v2660_v59 }
 0x528   :  { %v2843_v13 = vrot.slane %v2836_v1, %v11532_v34 }
 0x529   :  { %v2692_v60 = vpop.trf.xlu1 }
 0x52a   :  { %v2844_v63 = vcombine.low %v2628_v56, %v2692_v60  ;;  %v10629_v56 = vld [vmem:[%s12494_s7 + $0x1] ss:$0 sm:$0xff] }
 0x52b   :  { %v3197_v59 = vcombine.low %v10629_v56, %v10629_v56 }
 0x52c   :  { %v2851_v2 = vrot.slane %v2844_v63, %v11532_v34 }
 0x52d   :  { %v2724_v61 = vpop.trf.xlu1 }
 0x52e   :  { %v2868_v58 = vcombine.low %v2843_v13, %v2851_v2 }
 0x530   :  { %v2875_v20 = vrot.slane %v2868_v58, %v11516_v27 }
 0x531   :  { %v2756_v62 = vpop.trf.xlu1 }
 0x535   :  { %v2788_v0 = vpop.trf.xlu1 }
 0x536   :  { %v2852_v3 = vcombine.low %v2724_v61, %v2788_v0 }
 0x538   :  { %v2859_v16 = vrot.slane %v2852_v3, %v11532_v34 }
 0x539   :  { %v2820_v9 = vpop.trf.xlu1 }
 0x53a   :  { %v2860_v14 = vcombine.low %v2756_v62, %v2820_v9  ;;  %v3204_v62 = vrot.slane %v3197_v59, %v11532_v34 }
 0x53c   :  { %v2867_v17 = vrot.slane %v2860_v14, %v11532_v34  ;;  %v3205_v63 = vcombine.low %v3204_v62, %v3204_v62 }
 0x53e   :  { %v2876_v18 = vcombine.low %v2859_v16, %v2867_v17 }
 0x540   :  { %v2883_v4 = vrot.slane %v2876_v18, %v11516_v27 }
 0x542   :  { %v2885_v21 = vcombine.high %v2875_v20, %v2883_v4  ;;  %v2884_v31 = vcombine.low %v2875_v20, %v2883_v4 }
 0x544   :  { %11019 = vmatmul.mubr.msk.f32.vlgmr.msra.gmra.mrb[14].mxu1 %vm2000_vm2, %v2885_v21 }
 0x545   :  { %11283 = vmatpush3.bf16.msra.mxu1 %v11280_v54  ;;  %11040 = vmatprep.mubr.msk.f32.mxu1 %vm197_vm1, %v11687_v57 }
 0x546   :  { %11285 = vmatprep.subr.bf16.mxu1 %v11284_v22 }
 0x549   :  { %11287 = vmatpush3.bf16.msra.mxu1 %v11284_v22 }
 0x54a   :  { %11054 = vmatprep.subr.mxu1 %v11408_v12 }
 0x54c   :  { %11041 = vmatmul.mubr.msk.f32.vlgmr.msra.gmra.mrb[16].mxu1 %vm197_vm1, %v11707_v15 }
 0x54d   :  { %11056 = vmatprep.mubr.msk.f32.mxu1 %vm11407_vm0, %v11408_v12 }
 0x56d   :  { %v2180_v23 = vpop.xlane.xlu1 %2179 }
 0x56e   :  { %11356 = vrcp.f32 %v2180_v23 }
 0x578   :  { %v11357_v26 = vpop.eup %11356 }
 0x579   :  { %v2186_v50 = vmul.f32 %v11357_v26, %v11353_v6 }
 0x57b   :  { %11012 = vmatpush3.xpose.msk.msra.mxu0 %vm2000_vm2, %v2186_v50 }
 0x57c   :  { %11273 = vmatprep.subr.bf16.mxu0 %v11272_v28 }
 0x57e   :  { %11014 = vmatmul.mubr.msk.f32.vlgmr.msra.gmra.mrb[12].mxu0 %vm2000_vm2, %v2884_v31 }
 0x57f   :  { %11275 = vmatpush3.bf16.msra.mxu0 %v11272_v28  ;;  %11029 = vmatprep.mubr.msk.f32.mxu0 %vm197_vm1, %v11687_v57 }
 0x580   :  { %11277 = vmatprep.subr.bf16.mxu0 %v11276_v32 }
 0x583   :  { %11279 = vmatpush3.bf16.msra.mxu0 %v11276_v32 }
 0x584   :  { %11289 = vmatprep.subr.bf16.mxu0 %v11288_v36 }
 0x586   :  { %11030 = vmatmul.mubr.msk.f32.vlgmr.msra.gmra.mrb[14].mxu0 %vm197_vm1, %v11707_v15 }
 0x587   :  { %11291 = vmatpush3.bf16.msra.mxu0 %v11288_v36  ;;  %11051 = vmatprep.mubr.msk.f32.mxu0 %vm197_vm1, %v11687_v57 }
 0x588   :  { %11293 = vmatprep.subr.bf16.mxu0 %v11292_v39 }
 0x58b   :  { %11295 = vmatpush3.bf16.msra.mxu0 %v11292_v39 }
 0x58c   :  { %11064 = vmatprep.subr.mxu0 %v11408_v12 }
 0x58e   :  { %11052 = vmatmul.mubr.msk.f32.vlgmr.msra.gmra.mrb[16].mxu0 %vm197_vm1, %v11707_v15 }
 0x58f   :  { %11066 = vmatprep.mubr.msk.f32.mxu0 %vm11407_vm0, %v11408_v12 }
 0x617   :  { %v11903_v42 = vpop.f32.mrb[14].mxu1 }
 0x618   :  { %v11020_v43 = vpop.f32.mrb[15].mxu1 }
 0x61f   :  { %v11042_v7 = vpop.f32.mrb[16].mxu1 }
 0x620   :  { %v3414_v10 = vpop.f32.mrb[17].mxu1  ;;  %v3420_v47 = vadd.f32 %v11042_v7, %v3346_v5 }
 0x621   :  { %v3415_v46 = vadd.f32 %v3414_v10, %v3346_v5 }
 0x622   :  { %v3449_v8 = vrot.slane %v3420_v47, %v11532_v34  ;;  %v3442_v11 = vcombine.high %v3420_v47, %v3420_v47  ;;  %v10645_v47 = vld [vmem:[%s12496_s9 + $0x1] ss:$0 sm:$0xff] }
 0x623   :  { %v3432_v48 = vrot.slane %v3415_v46, %v11532_v34  ;;  %v3425_v51 = vcombine.high %v3415_v46, %v3415_v46 }
 0x624   :  { %v3457_v49 = vcombine.high %v3449_v8, %v3449_v8  ;;  %v3456_v52 = vrot.slane %v3442_v11, %v11532_v34 }
 0x625   :  { %3644 = vxpose.xlu0.b32.start.end [1/1] (short) (narrow) %v3432_v48, 8  ;;  %v3440_v6 = vcombine.high %v3432_v48, %v3432_v48  ;;  %v3439_v54 = vrot.slane %v3425_v51, %v11532_v34 }
 0x626   :  { %v3458_v55 = vcombine.high %v3456_v52, %v3456_v52 }
 0x627   :  { %3676 = vxpose.xlu1.b32.start.end [1/1] (short) (narrow) %v3440_v6, 8  ;;  %v3441_v45 = vcombine.high %v3439_v54, %v3439_v54 }
 0x629   :  { %3772 = vxpose.xlu0.b32.start.end [1/1] (short) (narrow) %v3449_v8, 8 }
 0x62d   :  { %3804 = vxpose.xlu0.b32.start.end [1/1] (short) (narrow) %v3457_v49, 8 }
 0x631   :  { %3836 = vxpose.xlu0.b32.start.end [1/1] (short) (narrow) %v3456_v52, 8  ;;  %v3479_v52 = vcombine.low %v10645_v47, %v10645_v47 }
 0x635   :  { %3708 = vxpose.xlu0.b32.start.end [1/1] (short) (narrow) %v3439_v54, 8 }
 0x639   :  { %3740 = vxpose.xlu0.b32.start.end [1/1] (short) (narrow) %v3441_v45, 8 }
 0x63d   :  { %3868 = vxpose.xlu0.b32.start.end [1/1] (short) (narrow) %v3458_v55, 8 }
 0x651   :  { %v11913_v60 = vpop.f32.mrb[12].mxu0 }
 0x652   :  { %v11015_v61 = vpop.f32.mrb[13].mxu0 }
 0x659   :  { %v11031_v0 = vpop.f32.mrb[14].mxu0 }
 0x65a   :  { %v3279_v1 = vadd.f32 %v11031_v0, %v3205_v63  ;;  %v3273_v2 = vpop.f32.mrb[15].mxu0 }
 0x65b   :  { %v3274_v3 = vadd.f32 %v3273_v2, %v3205_v63 }
 0x65c   :  { %v3301_v9 = vcombine.high %v3279_v1, %v3279_v1  ;;  %v3308_v13 = vrot.slane %v3279_v1, %v11532_v34 }
 0x65d   :  { %v3284_v14 = vcombine.high %v3274_v3, %v3274_v3  ;;  %v3291_v58 = vrot.slane %v3274_v3, %v11532_v34 }
 0x65e   :  { %v3315_v16 = vrot.slane %v3301_v9, %v11532_v34  ;;  %v3316_v17 = vcombine.high %v3308_v13, %v3308_v13  ;;  %v3486_v9 = vrot.slane %v3479_v52, %v11532_v34 }
 0x65f   :  { %v3298_v18 = vrot.slane %v3284_v14, %v11532_v34  ;;  %v3299_v19 = vcombine.high %v3291_v58, %v3291_v58 }
 0x660   :  { %v3317_v53 = vcombine.high %v3315_v16, %v3315_v16  ;;  %v3626_v20 = vcombine.low %v3308_v13, %v3316_v17 }
 0x661   :  { %v3300_v4 = vcombine.high %v3298_v18, %v3298_v18  ;;  %v3608_v21 = vcombine.low %v3291_v58, %v3299_v19  ;;  %v11920_v22 = vpop.f32.mrb[16].mxu0 }
 0x662   :  { %v3635_v23 = vcombine.low %v3315_v16, %v3317_v53  ;;  %v3555_v24 = vpop.f32.mrb[17].mxu0  ;;  %v3633_v26 = vrot.slane %v3626_v20, %v11516_v27 }
 0x663   :  { %v3617_v25 = vcombine.low %v3298_v18, %v3300_v4  ;;  %v3615_v50 = vrot.slane %v3608_v21, %v11516_v27  ;;  %v3487_v4 = vcombine.low %v3486_v9, %v3486_v9 }
 0x664   :  { %v3642_v28 = vrot.slane %v3635_v23, %v11516_v27 }
 0x665   :  { %v3624_v29 = vrot.slane %v3617_v25, %v11516_v27 }
 0x666   :  { %v4347_v30 = vcombine.low %v3633_v26, %v3642_v28  ;;  %v10650_v31 = vcombine.high %v3633_v26, %v3642_v28 }
 0x667   :  { %v4346_v32 = vcombine.low %v3615_v50, %v3624_v29  ;;  %v10649_v33 = vcombine.high %v3615_v50, %v3624_v29  ;;  %v3556_v29 = vadd.f32 %v3555_v24, %v3487_v4 }
 0x668   :  { %v11927_v35 = vrot.slane %v4347_v30, %v11532_v34  ;;  %v11930_v36 = vrot.slane %v10650_v31, %v11532_v34 }
 0x669   :  { %v11933_v37 = vrot.slane %v4346_v32, %v11532_v34  ;;  %v11936_v38 = vrot.slane %v10649_v33, %v11532_v34 }
 0x66b   :  { %v4362_v39 = vcombine.low %v11933_v37, %v11927_v35  ;;  %v4455_v40 = vcombine.low %v11936_v38, %v11930_v36 }
 0x6a5   :  { %v3660_v41 = vpop.trf.xlu0 }
 0x6a7   :  { %v3692_v10 = vpop.trf.xlu1 }
 0x6a9   :  { %v3788_v43 = vpop.trf.xlu0 }
 0x6ad   :  { %v3820_v44 = vpop.trf.xlu0 }
 0x6b1   :  { %v3852_v5 = vpop.trf.xlu0 }
 0x6b2   :  { %v3932_v8 = vcombine.low %v3788_v43, %v3852_v5  ;;  %v3933_v11 = vcombine.high %v3788_v43, %v3852_v5  ;;  %v3561_v5 = vadd.f32 %v11920_v22, %v3487_v4 }
 0x6b4   :  { %v3940_v61 = vrot.slane %v3932_v8, %v11532_v34  ;;  %v3947_v62 = vrot.slane %v3933_v11, %v11532_v34  ;;  %v3590_v47 = vrot.slane %v3561_v5, %v11532_v34 }
 0x6b5   :  { %v3724_v7 = vpop.trf.xlu0 }
 0x6b6   :  { %v3900_v48 = vcombine.low %v3660_v41, %v3724_v7  ;;  %v3901_v54 = vcombine.high %v3660_v41, %v3724_v7  ;;  %v3566_v41 = vcombine.high %v3556_v29, %v3556_v29  ;;  %v3573_v7 = vrot.slane %v3556_v29, %v11532_v34 }
 0x6b7   :  { %v3598_v8 = vcombine.high %v3590_v47, %v3590_v47 }
 0x6b8   :  { %v3908_v55 = vrot.slane %v3900_v48, %v11532_v34  ;;  %v3915_v13 = vrot.slane %v3901_v54, %v11532_v34  ;;  %v3580_v24 = vrot.slane %v3566_v41, %v11532_v34  ;;  %v3581_v11 = vcombine.high %v3573_v7, %v3573_v7 }
 0x6b9   :  { %v3756_v46 = vpop.trf.xlu0 }
 0x6ba   :  { %v3916_v6 = vcombine.low %v3692_v10, %v3756_v46  ;;  %v3917_v49 = vcombine.high %v3692_v10, %v3756_v46  ;;  %v3583_v46 = vcombine.high %v3561_v5, %v3561_v5  ;;  %v3582_v48 = vcombine.high %v3580_v24, %v3580_v24 }
 0x6bc   :  { %v3924_v51 = vrot.slane %v3916_v6, %v11532_v34  ;;  %v3931_v63 = vrot.slane %v3917_v49, %v11532_v34  ;;  %v3597_v49 = vrot.slane %v3583_v46, %v11532_v34 }
 0x6bd   :  { %v3884_v45 = vpop.trf.xlu0 }
 0x6be   :  { %v3948_v56 = vcombine.low %v3820_v44, %v3884_v45  ;;  %v3949_v59 = vcombine.high %v3820_v44, %v3884_v45  ;;  %v3965_v2 = vcombine.high %v3908_v55, %v3924_v51  ;;  %v3964_v3 = vcombine.low %v3908_v55, %v3924_v51 }
 0x6bf   :  { %v3980_v17 = vcombine.low %v3915_v13, %v3931_v63  ;;  %v3981_v50 = vcombine.high %v3915_v13, %v3931_v63  ;;  %v3599_v22 = vcombine.high %v3597_v49, %v3597_v49 }
 0x6c0   :  { %v3956_v0 = vrot.slane %v3948_v56, %v11532_v34  ;;  %v3963_v1 = vrot.slane %v3949_v59, %v11532_v34  ;;  %v3979_v18 = vrot.slane %v3965_v2, %v11516_v27  ;;  %v3972_v53 = vrot.slane %v3964_v3, %v11516_v27 }
 0x6c1   :  { %v3988_v28 = vrot.slane %v3980_v17, %v11516_v27  ;;  %v3995_v33 = vrot.slane %v3981_v50, %v11516_v27 }
 0x6c2   :  { %v3997_v14 = vcombine.high %v3940_v61, %v3956_v0  ;;  %v3996_v58 = vcombine.low %v3940_v61, %v3956_v0  ;;  %v4012_v16 = vcombine.low %v3947_v62, %v3963_v1  ;;  %v4013_v26 = vcombine.high %v3947_v62, %v3963_v1 }
 0x6c4   :  { %v4011_v19 = vrot.slane %v3997_v14, %v11516_v27  ;;  %v4004_v20 = vrot.slane %v3996_v58, %v11516_v27  ;;  %v4020_v25 = vrot.slane %v4012_v16, %v11516_v27  ;;  %v4027_v32 = vrot.slane %v4013_v26, %v11516_v27 }
 0x6c6   :  { %v4031_v21 = vcombine.high %v3979_v18, %v4011_v19  ;;  %v4028_v23 = vcombine.low %v3972_v53, %v4004_v20  ;;  %v4033_v30 = vcombine.high %v3988_v28, %v4020_v25  ;;  %v4029_v31 = vcombine.high %v3972_v53, %v4004_v20 }
 0x6c7   :  { %v4035_v43 = vcombine.high %v3995_v33, %v4027_v32  ;;  %v4030_v44 = vcombine.low %v3979_v18, %v4011_v19  ;;  %v4032_v10 = vcombine.low %v3988_v28, %v4020_v25  ;;  %v4034_v6 = vcombine.low %v3995_v33, %v4027_v32 }
 0x6c8   :  { %4132 = vxpose.xlu1.b32.start.end [1/1] (short) (narrow) %v4031_v21, 8  ;;  %4036 = vxpose.xlu0.b32.start.end [1/1] (short) (narrow) %v4028_v23, 8 }
 0x6cc   :  { %4196 = vxpose.xlu1.b32.start.end [1/1] (short) (narrow) %v4033_v30, 8  ;;  %4068 = vxpose.xlu0.b32.start.end [1/1] (short) (narrow) %v4029_v31, 8 }
 0x6d0   :  { %4260 = vxpose.xlu1.b32.start.end [1/1] (short) (narrow) %v4035_v43, 8  ;;  %4100 = vxpose.xlu0.b32.start.end [1/1] (short) (narrow) %v4030_v44, 8 }
 0x6d4   :  { %4550 = vxpose.xlu1.b32.start.end [1/1] (short) (narrow) %v3573_v7, 8  ;;  %4164 = vxpose.xlu0.b32.start.end [1/1] (short) (narrow) %v4032_v10, 8 }
 0x6d8   :  { %4646 = vxpose.xlu1.b32.start.end [1/1] (short) (narrow) %v3582_v48, 8  ;;  %4228 = vxpose.xlu0.b32.start.end [1/1] (short) (narrow) %v4034_v6, 8 }
 0x6dc   :  { %4710 = vxpose.xlu1.b32.start.end [1/1] (short) (narrow) %v3598_v8, 8  ;;  %4582 = vxpose.xlu0.b32.start.end [1/1] (short) (narrow) %v3581_v11, 8 }
 0x6e0   :  { %4774 = vxpose.xlu1.b32.start.end [1/1] (short) (narrow) %v3599_v22, 8  ;;  %4614 = vxpose.xlu0.b32.start.end [1/1] (short) (narrow) %v3580_v24, 8 }
 0x6e4   :  { %4678 = vxpose.xlu0.b32.start.end [1/1] (short) (narrow) %v3590_v47, 8 }
 0x6e8   :  { %4742 = vxpose.xlu0.b32.start.end [1/1] (short) (narrow) %v3597_v49, 8 }
 0x748   :  { %v4052_v51 = vpop.trf.xlu0  ;;  %v4148_v52 = vpop.trf.xlu1 }
 0x74c   :  { %v4084_v54 = vpop.trf.xlu0  ;;  %v4212_v45 = vpop.trf.xlu1 }
 0x74d   :  { %v4300_v63 = vcombine.low %v4084_v54, %v4148_v52 }
 0x74f   :  { %v4307_v9 = vrot.slane %v4300_v63, %v11532_v34 }
 0x750   :  { %v4116_v55 = vpop.trf.xlu0  ;;  %v4276_v56 = vpop.trf.xlu1 }
 0x751   :  { %v4292_v59 = vcombine.low %v4052_v51, %v4116_v55  ;;  %v4316_v1 = vcombine.low %v4212_v45, %v4276_v56 }
 0x753   :  { %v4299_v0 = vrot.slane %v4292_v59, %v11532_v34  ;;  %v4323_v58 = vrot.slane %v4316_v1, %v11532_v34 }
 0x754   :  { %v4180_v61 = vpop.trf.xlu0  ;;  %v4566_v62 = vpop.trf.xlu1 }
 0x755   :  { %v4324_v14 = vcombine.low %v4299_v0, %v4307_v9 }
 0x757   :  { %v4331_v20 = vrot.slane %v4324_v14, %v11516_v27 }
 0x758   :  { %v4244_v2 = vpop.trf.xlu0  ;;  %v4662_v3 = vpop.trf.xlu1 }
 0x759   :  { %v4308_v13 = vcombine.low %v4180_v61, %v4244_v2 }
 0x75b   :  { %v4315_v16 = vrot.slane %v4308_v13, %v11532_v34 }
 0x75c   :  { %v4598_v17 = vpop.trf.xlu0  ;;  %v4726_v18 = vpop.trf.xlu1 }
 0x75d   :  { %v4332_v19 = vcombine.low %v4315_v16, %v4323_v58  ;;  %v4823_v53 = vcombine.high %v4598_v17, %v4662_v3  ;;  %v4822_v21 = vcombine.low %v4598_v17, %v4662_v3 }
 0x75f   :  { %v4339_v4 = vrot.slane %v4332_v19, %v11516_v27  ;;  %v4837_v26 = vrot.slane %v4823_v53, %v11532_v34  ;;  %v4830_v32 = vrot.slane %v4822_v21, %v11532_v34 }
 0x760   :  { %v4630_v23 = vpop.trf.xlu0  ;;  %v4790_v29 = vpop.trf.xlu1 }
 0x761   :  { %v4340_v25 = vcombine.low %v4331_v20, %v4339_v4  ;;  %v4806_v28 = vcombine.low %v4566_v62, %v4630_v23  ;;  %v4807_v50 = vcombine.high %v4566_v62, %v4630_v23  ;;  %v4341_v30 = vcombine.high %v4331_v20, %v4339_v4 }
 0x762   :  { %v4854_v43 = vcombine.low %v4726_v18, %v4790_v29  ;;  %v4855_v7 = vcombine.high %v4726_v18, %v4790_v29 }
 0x763   :  { %11055 = vmatpush3.msra.mxu1 %v4340_v25  ;;  %v4821_v31 = vrot.slane %v4807_v50, %v11532_v34  ;;  %v4814_v33 = vrot.slane %v4806_v28, %v11532_v34 }
 0x764   :  { %11057 = vmatmul.mubr.msk.f32.vlgmr.msra.gmra.mrb[18].mxu1 %vm2000_vm2, %v4362_v39  ;;  %11059 = vmatprep.subr.mxu1 %v11408_v12  ;;  %v4694_v41 = vpop.trf.xlu0  ;;  %v4862_v39 = vrot.slane %v4854_v43, %v11532_v34  ;;  %v4869_v10 = vrot.slane %v4855_v7, %v11532_v34 }
 0x765   :  { %11060 = vmatpush3.msra.mxu1 %v4341_v30  ;;  %11061 = vmatprep.mubr.msk.f32.mxu1 %vm11407_vm0, %v11408_v12  ;;  %v4886_v44 = vcombine.low %v4821_v31, %v4837_v26  ;;  %v4887_v5 = vcombine.high %v4821_v31, %v4837_v26  ;;  %v4870_v37 = vcombine.low %v4814_v33, %v4830_v32 }
 0x766   :  { %11069 = vmatprep.subr.mxu1 %v11408_v12  ;;  %v4871_v6 = vcombine.high %v4814_v33, %v4830_v32 }
 0x767   :  { %v4878_v36 = vrot.slane %v4870_v37, %v11516_v27  ;;  %v4894_v56 = vrot.slane %v4886_v44, %v11516_v27  ;;  %v4901_v61 = vrot.slane %v4887_v5, %v11516_v27 }
 0x768   :  { %11062 = vmatmul.mubr.msk.f32.vlgmr.msra.gmra.mrb[20].mxu1 %vm2000_vm2, %v4455_v40  ;;  %v4758_v35 = vpop.trf.xlu0  ;;  %v4885_v22 = vrot.slane %v4871_v6, %v11516_v27 }
 0x769   :  { %v4838_v24 = vcombine.low %v4694_v41, %v4758_v35  ;;  %v4839_v46 = vcombine.high %v4694_v41, %v4758_v35  ;;  %11071 = vmatprep.mubr.msk.f32.mxu1 %vm11407_vm0, %v11408_v12 }
 0x76b   :  { %v4846_v47 = vrot.slane %v4838_v24, %v11532_v34  ;;  %v4853_v48 = vrot.slane %v4839_v46, %v11532_v34 }
 0x76d   :  { %v4918_v38 = vcombine.low %v4853_v48, %v4869_v10  ;;  %v4919_v40 = vcombine.high %v4853_v48, %v4869_v10  ;;  %v4902_v8 = vcombine.low %v4846_v47, %v4862_v39  ;;  %v4903_v11 = vcombine.high %v4846_v47, %v4862_v39 }
 0x76f   :  { %v4910_v49 = vrot.slane %v4902_v8, %v11516_v27  ;;  %v4917_v51 = vrot.slane %v4903_v11, %v11516_v27  ;;  %v4926_v59 = vrot.slane %v4918_v38, %v11516_v27  ;;  %v4933_v62 = vrot.slane %v4919_v40, %v11516_v27 }
 0x771   :  { %v4935_v52 = vcombine.high %v4878_v36, %v4910_v49  ;;  %v4934_v54 = vcombine.low %v4878_v36, %v4910_v49  ;;  %v4936_v45 = vcombine.low %v4885_v22, %v4917_v51  ;;  %v4937_v55 = vcombine.high %v4885_v22, %v4917_v51  ;;  %v10667_v51 = vld [vmem:[%s12491_s4 + $0x40] sm:$0xff] }
 0x772   :  { %v4938_v63 = vcombine.low %v4894_v56, %v4926_v59  ;;  %v4939_v0 = vcombine.high %v4894_v56, %v4926_v59  ;;  %v4940_v1 = vcombine.low %v4901_v61, %v4933_v62  ;;  %v4941_v2 = vcombine.high %v4901_v61, %v4933_v62 }
 0x773   :  { %4974 = vxpose.xlu0.b32.start.end [1/1] (short) (narrow) %v4935_v52, 8  ;;  %4942 = vxpose.xlu1.b32.start.end [1/1] (short) (narrow) %v4934_v54, 8  ;;  %v10668_v52 = vld [vmem:[%s12491_s4 + $0x48] sm:$0xff] }
 0x774   :  { %v11304_v62 = vpack.c.bf16 %v10668_v52, %v10667_v51 }
 0x777   :  { %5006 = vxpose.xlu0.b32.start.end [1/1] (short) (narrow) %v4936_v45, 8  ;;  %5038 = vxpose.xlu1.b32.start.end [1/1] (short) (narrow) %v4937_v55, 8 }
 0x7f3   :  { %v4990_v3 = vpop.trf.xlu0  ;;  %v4958_v9 = vpop.trf.xlu1 }
 0x7f7   :  { %v5022_v13 = vpop.trf.xlu0  ;;  %v5054_v14 = vpop.trf.xlu1 }
 0x7f8   :  { %v5198_v58 = vcombine.low %v4958_v9, %v5022_v13  ;;  %v5206_v16 = vcombine.low %v4990_v3, %v5054_v14  ;;  %v3184_v3 = vld [vmem:[%s12493_s6] sm:$0xff] }
 0x7fa   :  { %v5205_v17 = vrot.slane %v5198_v58, %v11532_v34  ;;  %v5213_v18 = vrot.slane %v5206_v16, %v11532_v34 }
 0x7fc   :  { %v5230_v19 = vcombine.low %v5205_v17, %v5213_v18 }
 0x7fe   :  { %v5237_v54 = vrot.slane %v5230_v19, %v11516_v27 }
 0x837   :  { %v4431_v53 = vpop.f32.mrb[18].mxu1 }
 0x838   :  { %v11058_v20 = vpop.f32.mrb[19].mxu1  ;;  %v4528_v4 = vsel %vm2000_vm2, %v4431_v53, -inf }
 0x839   :  { %4529 = vmax.xlane.f32.xlu0 %v4528_v4 }
 0x83b   :  { %v4524_v21 = vpop.f32.mrb[20].mxu1 }
 0x83c   :  { %v11063_v23 = vpop.f32.mrb[21].mxu1  ;;  %v4531_v25 = vsel %vm2000_vm2, %v4524_v21, -inf }
 0x83d   :  { %4532 = vmax.xlane.f32.xlu1 %v4531_v25 }
 0x866   :  { %5070 = vxpose.xlu0.b32.start.end [1/1] (short) (narrow) %v4938_v63, 8 }
 0x870   :  { %5102 = vxpose.xlu1.b32.start.end [1/1] (short) (narrow) %v4939_v0, 8 }
 0x8c6   :  { %v4530_v26 = vpop.xlane.xlu0 %4529 }
 0x8c7   :  { %v4534_v28 = vsub.f32 %v4431_v53, %v4530_v26 }
 0x8c9   :  { %v4536_v50 = vmul.f32 1.442695, %v4534_v28 }
 0x8ca   :  { %v4533_v29 = vpop.xlane.xlu1 %4532 }
 0x8cb   :  { %11358 = vpow2.f32 %v4536_v50  ;;  %v4535_v30 = vsub.f32 %v4524_v21, %v4533_v29 }
 0x8cd   :  { %v4538_v31 = vmul.f32 1.442695, %v4535_v30 }
 0x8cf   :  { %11360 = vpow2.f32 %v4538_v31 }
 0x8d5   :  { %v11359_v32 = vpop.eup %11358 }
 0x8d6   :  { %v4540_v33 = vsel %vm2000_vm2, %v11359_v32, 0.0 }
 0x8d7   :  { %4541 = vadd.xlane.f32.xlu0 %v4540_v33  ;;  %v10669_v33 = vld [vmem:[%s12491_s4 + $0x50] sm:$0xff] }
 0x8d9   :  { %v11361_v41 = vpop.eup %11360 }
 0x8da   :  { %v4543_v43 = vsel %vm2000_vm2, %v11361_v41, 0.0 }
 0x8db   :  { %4544 = vadd.xlane.f32.xlu1 %v4543_v43 }
 0x8e6   :  { %v5086_v44 = vpop.trf.xlu0 }
 0x8f0   :  { %v5118_v5 = vpop.trf.xlu1 }
 0x904   :  { %5134 = vxpose.xlu0.b32.start.end [1/1] (short) (narrow) %v4940_v1, 8 }
 0x908   :  { %3038 = vxpose.xlu0.b32.start.end [1/1] (short) (narrow) %v11913_v60, 8 }
 0x90e   :  { %5166 = vxpose.xlu1.b32.start.end [1/1] (short) (narrow) %v4941_v2, 8 }
 0x912   :  { %3070 = vxpose.xlu1.b32.start.end [1/1] (short) (narrow) %v11903_v42, 8 }
 0x964   :  { %v4542_v7 = vpop.xlane.xlu0 %4541 }
 0x965   :  { %11362 = vrcp.f32 %v4542_v7 }
 0x968   :  { %v4545_v35 = vpop.xlane.xlu1 %4544 }
 0x969   :  { %11364 = vrcp.f32 %v4545_v35 }
 0x96f   :  { %v11363_v37 = vpop.eup %11362 }
 0x970   :  { %v4548_v39 = vmul.f32 %v11363_v37, %v11359_v32 }
 0x972   :  { %11065 = vmatpush3.xpose.msk.msra.mxu0 %vm2000_vm2, %v4548_v39 }
 0x973   :  { %v11365_v10 = vpop.eup %11364  ;;  %11074 = vmatprep.subr.mxu0 %v11408_v12 }
 0x974   :  { %v4549_v24 = vmul.f32 %v11365_v10, %v11361_v41  ;;  %v10670_v41 = vld [vmem:[%s12491_s4 + $0x58] sm:$0xff]  ;;  %v10672_v10 = vld [vmem:[%s12495_s8 + $0x2] ss:$0 sm:$0xff] }
 0x976   :  { %11070 = vmatpush3.xpose.msk.msra.mxu1 %vm2000_vm2, %v4549_v24  ;;  %v5846_v24 = vcombine.low %v10672_v10, %v10672_v10 }
 0x977   :  { %11079 = vmatprep.subr.mxu1 %v11408_v12 }
 0x984   :  { %v5150_v60 = vpop.trf.xlu0 }
 0x985   :  { %v5214_v42 = vcombine.low %v5086_v44, %v5150_v60 }
 0x987   :  { %v5221_v36 = vrot.slane %v5214_v42, %v11532_v34 }
 0x988   :  { %v3054_v47 = vpop.trf.xlu0 }
 0x989   :  { %v3102_v6 = vcombine.high %v3054_v47, %v11408_v12  ;;  %v3109_v40 = vrot.slane %v3054_v47, %v11532_v34  ;;  %v10656_v47 = vld [vmem:[%s12493_s6 + $0x8] sm:$0xff] }
 0x98b   :  { %v3116_v45 = vrot.slane %v3102_v6, %v11532_v34  ;;  %v10660_v6 = vld [vmem:[%s12490_s3 + $0x48] sm:$0xff] }
 0x98e   :  { %v5182_v46 = vpop.trf.xlu1 }
 0x98f   :  { %v5222_v48 = vcombine.low %v5118_v5, %v5182_v46  ;;  %v11308_v5 = vpack.c.bf16 %v10670_v41, %v10669_v33  ;;  %v5853_v46 = vrot.slane %v5846_v24, %v11532_v34 }
 0x991   :  { %v5229_v38 = vrot.slane %v5222_v48, %v11532_v34  ;;  %v10659_v48 = vld [vmem:[%s12490_s3 + $0x40] sm:$0xff] }
 0x992   :  { %v3086_v8 = vpop.trf.xlu1 }
 0x993   :  { %v5238_v11 = vcombine.low %v5221_v36, %v5229_v38  ;;  %v3117_v49 = vcombine.high %v3086_v8, %v11408_v12  ;;  %v3124_v22 = vrot.slane %v3086_v8, %v11532_v34  ;;  %v5854_v36 = vcombine.low %v5853_v46, %v5853_v46  ;;  %v10675_v46 = vld [vmem:[%s12492_s5 + $0x40] sm:$0xff] }
 0x994   :  { %v12085_v38 = vpack.c.bf16 %v10660_v6, %v10659_v48  ;;  %v10677_v6 = vld [vmem:[%s12492_s5 + $0x50] sm:$0xff] }
 0x995   :  { %v5245_v55 = vrot.slane %v5238_v11, %v11516_v27  ;;  %v3131_v56 = vrot.slane %v3117_v49, %v11532_v34  ;;  %v3132_v59 = vcombine.low %v3109_v40, %v3124_v22  ;;  %v3133_v61 = vcombine.high %v3109_v40, %v3124_v22 }
 0x997   :  { %v5246_v63 = vcombine.low %v5237_v54, %v5245_v55  ;;  %v5247_v0 = vcombine.high %v5237_v54, %v5245_v55  ;;  %v3140_v1 = vrot.slane %v3132_v59, %v11516_v27  ;;  %v3147_v2 = vrot.slane %v3133_v61, %v11516_v27 }
 0x998   :  { %v3148_v9 = vcombine.low %v3116_v45, %v3131_v56  ;;  %v3149_v13 = vcombine.high %v3116_v45, %v3131_v56 }
 0x999   :  { %v3164_v14 = vcombine.high %v3140_v1, %v11408_v12  ;;  %v3165_v58 = vcombine.high %v3147_v2, %v11408_v12  ;;  %v3169_v16 = vsel %vm3168_vm3, %v3140_v1, 0.0  ;;  %11067 = vmatmul.mubr.msk.f32.vlgmr.msra.gmra.mrb[18].mxu0 %vm2000_vm2, %v5246_v63  ;;  %11072 = vmatmul.mubr.msk.f32.vlgmr.msra.gmra.mrb[22].mxu1 %vm2000_vm2, %v5247_v0  ;;  %v3172_v19 = vsel %vm3168_vm3, %v3147_v2, 0.0 }
 0x99a   :  { %v3156_v17 = vrot.slane %v3148_v9, %v11516_v27  ;;  %11080 = vmatpush3.msra.mxu1 %v3184_v3  ;;  %11081 = vmatprep.mubr.msk.f32.mxu1 %vm11407_vm0, %v11408_v12  ;;  %v3163_v20 = vrot.slane %v3149_v13, %v11516_v27 }
 0x99b   :  { %v3170_v18 = vsel %vm3168_vm3, %v3164_v14, 0.0  ;;  %11305 = vmatprep.subr.bf16.mxu1 %v11304_v62  ;;  %11076 = vmatprep.mubr.msk.f32.mxu0 %vm11407_vm0, %v11408_v12  ;;  %v3174_v21 = vsel %vm3168_vm3, %v3165_v58, 0.0 }
 0x99c   :  { %v3171_v53 = vadd.f32 %v3170_v18, %v3169_v16  ;;  %v3166_v4 = vcombine.high %v3156_v17, %v11408_v12  ;;  %v3176_v25 = vsel %vm3168_vm3, %v3156_v17, 0.0  ;;  %v3167_v28 = vcombine.high %v3163_v20, %v11408_v12  ;;  %11075 = vmatpush3.msra.mxu0 %v10656_v47  ;;  %v10676_v47 = vld [vmem:[%s12492_s5 + $0x48] sm:$0xff] }
 0x99d   :  { %v3180_v30 = vsel %vm3168_vm3, %v3163_v20, 0.0  ;;  %11297 = vmatprep.subr.bf16.mxu0 %v12085_v38  ;;  %v11312_v48 = vpack.c.bf16 %v10676_v47, %v10675_v46 }
 0x99e   :  { %v3173_v23 = vadd.f32 %v3172_v19, %v3171_v53  ;;  %v3178_v50 = vsel %vm3168_vm3, %v3166_v4, 0.0  ;;  %v3182_v32 = vsel %vm3168_vm3, %v3167_v28, 0.0 }
 0x9a0   :  { %v3175_v26 = vadd.f32 %v3174_v21, %v3173_v23 }
 0x9a2   :  { %v3177_v29 = vadd.f32 %v3176_v25, %v3175_v26 }
 0x9a4   :  { %v3179_v31 = vadd.f32 %v3178_v50, %v3177_v29 }
 0x9a6   :  { %v3181_v43 = vadd.f32 %v3180_v30, %v3179_v31 }
 0x9a8   :  { %v3183_v44 = vadd.f32 %v3182_v32, %v3181_v43 }
 0x9aa   :  { %11082 = vmatmul.mubr.msk.f32.vlgmr.msra.gmra.mrb[24].mxu1 %vm2000_vm2, %v3183_v44 }
 0x9ab   :  { %11307 = vmatpush3.bf16.msra.mxu1 %v11304_v62  ;;  %11103 = vmatprep.mubr.msk.f32.mxu1 %vm197_vm1, %v11687_v57 }
 0x9ac   :  { %11309 = vmatprep.subr.bf16.mxu1 %v11308_v5 }
 0x9af   :  { %11311 = vmatpush3.bf16.msra.mxu1 %v11308_v5 }
 0x9b0   :  { %11117 = vmatprep.subr.mxu1 %v11408_v12 }
 0x9b2   :  { %11104 = vmatmul.mubr.msk.f32.vlgmr.msra.gmra.mrb[26].mxu1 %vm197_vm1, %v11707_v15 }
 0x9b3   :  { %11119 = vmatprep.mubr.msk.f32.mxu1 %vm11407_vm0, %v11408_v12 }
 0xa6c   :  { %v5320_v7 = vpop.f32.mrb[18].mxu0  ;;  %v5396_v35 = vpop.f32.mrb[22].mxu1 }
 0xa6d   :  { %5432 = vxpose.xlu1.b32.start.end [1/1] (short) (narrow) %v5396_v35, 8  ;;  %v11073_v37 = vpop.f32.mrb[23].mxu1  ;;  %5400 = vxpose.xlu0.b32.start.end [1/1] (short) (narrow) %v5320_v7, 8  ;;  %v11068_v39 = vpop.f32.mrb[19].mxu0  ;;  %v10661_v35 = vld [vmem:[%s12490_s3 + $0x50] sm:$0xff] }
 0xa6e   :  { %v10662_v37 = vld [vmem:[%s12490_s3 + $0x58] sm:$0xff] }
 0xa7d   :  { %v12073_v60 = vpop.f32.mrb[24].mxu1 }
 0xa7e   :  { %v11083_v42 = vpop.f32.mrb[25].mxu1 }
 0xa7f   :  { %v11300_v42 = vpack.c.bf16 %v10662_v37, %v10661_v35 }
 0xa85   :  { %v11105_v40 = vpop.f32.mrb[26].mxu1 }
 0xa86   :  { %v5928_v8 = vadd.f32 %v11105_v40, %v5854_v36  ;;  %v5922_v11 = vpop.f32.mrb[27].mxu1 }
 0xa87   :  { %v5923_v49 = vadd.f32 %v5922_v11, %v5854_v36  ;;  %v10678_v36 = vld [vmem:[%s12492_s5 + $0x58] sm:$0xff] }
 0xa88   :  { %v5957_v22 = vrot.slane %v5928_v8, %v11532_v34  ;;  %v5950_v45 = vcombine.high %v5928_v8, %v5928_v8  ;;  %v11316_v8 = vpack.c.bf16 %v10678_v36, %v10677_v6 }
 0xa89   :  { %v5933_v51 = vcombine.high %v5923_v49, %v5923_v49  ;;  %v5940_v54 = vrot.slane %v5923_v49, %v11532_v34 }
 0xa8a   :  { %6280 = vxpose.xlu0.b32.start.end [1/1] (short) (narrow) %v5957_v22, 8  ;;  %v5965_v52 = vcombine.high %v5957_v22, %v5957_v22  ;;  %v5964_v61 = vrot.slane %v5950_v45, %v11532_v34 }
 0xa8b   :  { %v5948_v55 = vcombine.high %v5940_v54, %v5940_v54  ;;  %v5947_v56 = vrot.slane %v5933_v51, %v11532_v34 }
 0xa8c   :  { %6312 = vxpose.xlu1.b32.start.end [1/1] (short) (narrow) %v5965_v52, 8  ;;  %v5966_v62 = vcombine.high %v5964_v61, %v5964_v61 }
 0xa8d   :  { %v5949_v59 = vcombine.high %v5947_v56, %v5947_v56 }
 0xa8e   :  { %6152 = vxpose.xlu0.b32.start.end [1/1] (short) (narrow) %v5940_v54, 8 }
 0xa90   :  { %6184 = vxpose.xlu1.b32.start.end [1/1] (short) (narrow) %v5948_v55, 8 }
 0xa92   :  { %6216 = vxpose.xlu0.b32.start.end [1/1] (short) (narrow) %v5947_v56, 8 }
 0xa94   :  { %6248 = vxpose.xlu1.b32.start.end [1/1] (short) (narrow) %v5949_v59, 8 }
 0xa96   :  { %6344 = vxpose.xlu0.b32.start.end [1/1] (short) (narrow) %v5964_v61, 8 }
 0xa98   :  { %6376 = vxpose.xlu1.b32.start.end [1/1] (short) (narrow) %v5966_v62, 8 }
 0xaed   :  { %v5416_v63 = vpop.trf.xlu0  ;;  %v5448_v0 = vpop.trf.xlu1 }
 0xaee   :  { %v5464_v1 = vcombine.high %v5416_v63, %v11408_v12  ;;  %v5471_v2 = vrot.slane %v5416_v63, %v11532_v34  ;;  %v5479_v3 = vcombine.high %v5448_v0, %v11408_v12  ;;  %v5486_v9 = vrot.slane %v5448_v0, %v11532_v34 }
 0xaf0   :  { %v5478_v13 = vrot.slane %v5464_v1, %v11532_v34  ;;  %v5493_v14 = vrot.slane %v5479_v3, %v11532_v34  ;;  %v5494_v58 = vcombine.low %v5471_v2, %v5486_v9  ;;  %v5495_v16 = vcombine.high %v5471_v2, %v5486_v9 }
 0xaf2   :  { %v5502_v17 = vrot.slane %v5494_v58, %v11516_v27  ;;  %v5509_v18 = vrot.slane %v5495_v16, %v11516_v27  ;;  %v5510_v19 = vcombine.low %v5478_v13, %v5493_v14  ;;  %v5511_v20 = vcombine.high %v5478_v13, %v5493_v14 }
 0xaf4   :  { %v5526_v53 = vcombine.high %v5502_v17, %v11408_v12  ;;  %v5518_v4 = vrot.slane %v5510_v19, %v11516_v27  ;;  %v5527_v21 = vcombine.high %v5509_v18, %v11408_v12  ;;  %v5530_v23 = vsel %vm3168_vm3, %v5502_v17, 0.0 }
 0xaf5   :  { %v5533_v28 = vsel %vm3168_vm3, %v5509_v18, 0.0  ;;  %v5525_v29 = vrot.slane %v5511_v20, %v11516_v27 }
 0xaf6   :  { %v5531_v25 = vsel %vm3168_vm3, %v5526_v53, 0.0  ;;  %v5528_v30 = vcombine.high %v5518_v4, %v11408_v12  ;;  %v5535_v31 = vsel %vm3168_vm3, %v5527_v21, 0.0  ;;  %v5537_v33 = vsel %vm3168_vm3, %v5518_v4, 0.0 }
 0xaf7   :  { %v5532_v26 = vadd.f32 %v5531_v25, %v5530_v23  ;;  %v5529_v43 = vcombine.high %v5525_v29, %v11408_v12  ;;  %v5541_v7 = vsel %vm3168_vm3, %v5525_v29, 0.0 }
 0xaf8   :  { %v5539_v44 = vsel %vm3168_vm3, %v5528_v30, 0.0 }
 0xaf9   :  { %v5534_v50 = vadd.f32 %v5533_v28, %v5532_v26  ;;  %v5543_v10 = vsel %vm3168_vm3, %v5529_v43, 0.0 }
 0xafb   :  { %v5536_v32 = vadd.f32 %v5535_v31, %v5534_v50 }
 0xafd   :  { %v5538_v41 = vadd.f32 %v5537_v33, %v5536_v32 }
 0xaff   :  { %v5540_v5 = vadd.f32 %v5539_v44, %v5538_v41 }
 0xb01   :  { %v5542_v39 = vadd.f32 %v5541_v7, %v5540_v5 }
 0xb03   :  { %v5544_v24 = vadd.f32 %v5543_v10, %v5542_v39 }
 0xb05   :  { %11077 = vmatmul.mubr.msk.f32.vlgmr.msra.gmra.mrb[20].mxu0 %vm2000_vm2, %v5544_v24 }
 0xb06   :  { %11299 = vmatpush3.bf16.msra.mxu0 %v12085_v38  ;;  %11092 = vmatprep.mubr.msk.f32.mxu0 %vm197_vm1, %v11687_v57 }
 0xb07   :  { %11301 = vmatprep.subr.bf16.mxu0 %v11300_v42 }
 0xb0a   :  { %11303 = vmatpush3.bf16.msra.mxu0 %v11300_v42  ;;  %v6296_v40 = vpop.trf.xlu0 }
 0xb0b   :  { %11313 = vmatprep.subr.bf16.mxu0 %v11312_v48 }
 0xb0c   :  { %v6328_v11 = vpop.trf.xlu1 }
 0xb0d   :  { %11093 = vmatmul.mubr.msk.f32.vlgmr.msra.gmra.mrb[22].mxu0 %vm197_vm1, %v11707_v15 }
 0xb0e   :  { %11315 = vmatpush3.bf16.msra.mxu0 %v11312_v48  ;;  %11114 = vmatprep.mubr.msk.f32.mxu0 %vm197_vm1, %v11687_v57  ;;  %v6168_v38 = vpop.trf.xlu0 }
 0xb0f   :  { %11317 = vmatprep.subr.bf16.mxu0 %v11316_v8 }
 0xb10   :  { %v6200_v49 = vpop.trf.xlu1 }
 0xb12   :  { %11319 = vmatpush3.bf16.msra.mxu0 %v11316_v8  ;;  %v6232_v22 = vpop.trf.xlu0 }
 0xb13   :  { %v6408_v51 = vcombine.low %v6168_v38, %v6232_v22  ;;  %11127 = vmatprep.subr.mxu0 %v11408_v12  ;;  %v6409_v45 = vcombine.high %v6168_v38, %v6232_v22 }
 0xb14   :  { %v6264_v52 = vpop.trf.xlu1 }
 0xb15   :  { %11115 = vmatmul.mubr.msk.f32.vlgmr.msra.gmra.mrb[24].mxu0 %vm197_vm1, %v11707_v15  ;;  %v6424_v54 = vcombine.low %v6200_v49, %v6264_v52  ;;  %v6416_v55 = vrot.slane %v6408_v51, %v11532_v34  ;;  %v6425_v56 = vcombine.high %v6200_v49, %v6264_v52  ;;  %v6423_v9 = vrot.slane %v6409_v45, %v11532_v34 }
 0xb16   :  { %v6360_v59 = vpop.trf.xlu0  ;;  %11129 = vmatprep.mubr.msk.f32.mxu0 %vm11407_vm0, %v11408_v12 }
 0xb17   :  { %v6432_v61 = vrot.slane %v6424_v54, %v11532_v34  ;;  %v6440_v62 = vcombine.low %v6296_v40, %v6360_v59  ;;  %v6441_v63 = vcombine.high %v6296_v40, %v6360_v59  ;;  %v6439_v13 = vrot.slane %v6425_v56, %v11532_v34  ;;  %v10664_v59 = vld [vmem:[%s12494_s7 + $0x2] ss:$0 sm:$0xff] }
 0xb18   :  { %v6392_v0 = vpop.trf.xlu1 }
 0xb19   :  { %v6448_v1 = vrot.slane %v6440_v62, %v11532_v34  ;;  %v6456_v2 = vcombine.low %v6328_v11, %v6392_v0  ;;  %v6457_v3 = vcombine.high %v6328_v11, %v6392_v0  ;;  %v6472_v14 = vcombine.low %v6416_v55, %v6432_v61 }
 0xb1a   :  { %v6455_v58 = vrot.slane %v6441_v63, %v11532_v34  ;;  %v6473_v18 = vcombine.high %v6416_v55, %v6432_v61  ;;  %v6488_v4 = vcombine.low %v6423_v9, %v6439_v13  ;;  %v6489_v30 = vcombine.high %v6423_v9, %v6439_v13 }
 0xb1b   :  { %v6464_v16 = vrot.slane %v6456_v2, %v11532_v34  ;;  %v6471_v17 = vrot.slane %v6457_v3, %v11532_v34  ;;  %v6480_v19 = vrot.slane %v6472_v14, %v11516_v27  ;;  %v5705_v61 = vcombine.low %v10664_v59, %v10664_v59  ;;  %v10680_v2 = vld [vmem:[%s12496_s9 + $0x2] ss:$0 sm:$0xff] }
 0xb1c   :  { %v6487_v23 = vrot.slane %v6473_v18, %v11516_v27  ;;  %v6496_v29 = vrot.slane %v6488_v4, %v11516_v27  ;;  %v6503_v43 = vrot.slane %v6489_v30, %v11516_v27  ;;  %v5987_v9 = vcombine.low %v10680_v2, %v10680_v2 }
 0xb1d   :  { %v6504_v53 = vcombine.low %v6448_v1, %v6464_v16  ;;  %v6505_v20 = vcombine.high %v6448_v1, %v6464_v16  ;;  %v6520_v26 = vcombine.low %v6455_v58, %v6471_v17  ;;  %v6521_v31 = vcombine.high %v6455_v58, %v6471_v17 }
 0xb1e   :  { %v5712_v1 = vrot.slane %v5705_v61, %v11532_v34  ;;  %v5994_v16 = vrot.slane %v5987_v9, %v11532_v34 }
 0xb1f   :  { %v6512_v21 = vrot.slane %v6504_v53, %v11516_v27  ;;  %v6519_v25 = vrot.slane %v6505_v20, %v11516_v27  ;;  %v6528_v41 = vrot.slane %v6520_v26, %v11516_v27  ;;  %v6535_v7 = vrot.slane %v6521_v31, %v11516_v27 }
 0xb20   :  { %v5713_v3 = vcombine.low %v5712_v1, %v5712_v1 }
 0xb21   :  { %v6537_v28 = vcombine.high %v6480_v19, %v6512_v21  ;;  %v6536_v50 = vcombine.low %v6480_v19, %v6512_v21  ;;  %v6539_v32 = vcombine.high %v6487_v23, %v6519_v25  ;;  %v6538_v33 = vcombine.low %v6487_v23, %v6519_v25 }
 0xb22   :  { %v6541_v44 = vcombine.high %v6496_v29, %v6528_v41  ;;  %v6540_v5 = vcombine.low %v6496_v29, %v6528_v41  ;;  %v6543_v35 = vcombine.high %v6503_v43, %v6535_v7  ;;  %v6542_v37 = vcombine.low %v6503_v43, %v6535_v7 }
 0xb23   :  { %6576 = vxpose.xlu1.b32.start.end [1/1] (short) (narrow) %v6537_v28, 8  ;;  %6544 = vxpose.xlu0.b32.start.end [1/1] (short) (narrow) %v6536_v50, 8  ;;  %v5995_v21 = vcombine.low %v5994_v16, %v5994_v16 }
 0xb27   :  { %6640 = vxpose.xlu1.b32.start.end [1/1] (short) (narrow) %v6539_v32, 8  ;;  %6608 = vxpose.xlu0.b32.start.end [1/1] (short) (narrow) %v6538_v33, 8 }
 0xb2b   :  { %6704 = vxpose.xlu1.b32.start.end [1/1] (short) (narrow) %v6541_v44, 8  ;;  %6672 = vxpose.xlu0.b32.start.end [1/1] (short) (narrow) %v6540_v5, 8 }
 0xb2f   :  { %6768 = vxpose.xlu1.b32.start.end [1/1] (short) (narrow) %v6543_v35, 8  ;;  %6736 = vxpose.xlu0.b32.start.end [1/1] (short) (narrow) %v6542_v37, 8 }
 0xba3   :  { %v6592_v39 = vpop.trf.xlu1  ;;  %v6560_v10 = vpop.trf.xlu0 }
 0xba7   :  { %v6656_v24 = vpop.trf.xlu1  ;;  %v6624_v42 = vpop.trf.xlu0 }
 0xba8   :  { %v6808_v46 = vcombine.low %v6592_v39, %v6656_v24  ;;  %v6800_v47 = vcombine.low %v6560_v10, %v6624_v42 }
 0xbaa   :  { %v6815_v36 = vrot.slane %v6808_v46, %v11532_v34  ;;  %v6807_v40 = vrot.slane %v6800_v47, %v11532_v34 }
 0xbab   :  { %v6720_v48 = vpop.trf.xlu1  ;;  %v6688_v6 = vpop.trf.xlu0 }
 0xbac   :  { %v6832_v38 = vcombine.low %v6807_v40, %v6815_v36 }
 0xbae   :  { %v12166_v54 = vrot.slane %v6832_v38, %v11516_v27 }
 0xbaf   :  { %v6784_v8 = vpop.trf.xlu1  ;;  %v6752_v11 = vpop.trf.xlu0 }
 0xbb0   :  { %v6824_v49 = vcombine.low %v6720_v48, %v6784_v8  ;;  %v6816_v22 = vcombine.low %v6688_v6, %v6752_v11 }
 0xbb2   :  { %v6831_v51 = vrot.slane %v6824_v49, %v11532_v34  ;;  %v6823_v52 = vrot.slane %v6816_v22, %v11532_v34 }
 0xbb4   :  { %v6840_v45 = vcombine.low %v6823_v52, %v6831_v51 }
 0xbb6   :  { %v12169_v55 = vrot.slane %v6840_v45, %v11516_v27 }
 0xbb8   :  { %v6848_v56 = vcombine.low %v12166_v54, %v12169_v55  ;;  %v6849_v51 = vcombine.high %v12166_v54, %v12169_v55 }
 0xbba   :  { %11118 = vmatpush3.msra.mxu1 %v6848_v56 }
 0xbbb   :  { %11122 = vmatprep.subr.mxu1 %v11408_v12 }
 0xbd8   :  { %v5616_v62 = vpop.f32.mrb[20].mxu0 }
 0xbd9   :  { %v12178_v63 = vadd.f32 %v12073_v60, %v5616_v62  ;;  %v11078_v0 = vpop.f32.mrb[21].mxu0 }
 0xbe0   :  { %v11094_v13 = vpop.f32.mrb[22].mxu0 }
 0xbe1   :  { %v5787_v14 = vadd.f32 %v11094_v13, %v5713_v3  ;;  %v5781_v58 = vpop.f32.mrb[23].mxu0 }
 0xbe2   :  { %v5782_v17 = vadd.f32 %v5781_v58, %v5713_v3 }
 0xbe3   :  { %v5809_v18 = vcombine.high %v5787_v14, %v5787_v14  ;;  %v5816_v19 = vrot.slane %v5787_v14, %v11532_v34 }
 0xbe4   :  { %v5792_v60 = vcombine.high %v5782_v17, %v5782_v17  ;;  %v5799_v53 = vrot.slane %v5782_v17, %v11532_v34 }
 0xbe5   :  { %v5823_v20 = vrot.slane %v5809_v18, %v11532_v34  ;;  %v5824_v4 = vcombine.high %v5816_v19, %v5816_v19 }
 0xbe6   :  { %v5806_v23 = vrot.slane %v5792_v60, %v11532_v34  ;;  %v5807_v25 = vcombine.high %v5799_v53, %v5799_v53 }
 0xbe7   :  { %v5825_v26 = vcombine.high %v5823_v20, %v5823_v20  ;;  %v6134_v28 = vcombine.low %v5816_v19, %v5824_v4 }
 0xbe8   :  { %v5808_v50 = vcombine.high %v5806_v23, %v5806_v23  ;;  %v6116_v29 = vcombine.low %v5799_v53, %v5807_v25  ;;  %v11116_v30 = vpop.f32.mrb[24].mxu0 }
 0xbe9   :  { %v6143_v31 = vcombine.low %v5823_v20, %v5825_v26  ;;  %v6069_v32 = vadd.f32 %v11116_v30, %v5995_v21  ;;  %v6063_v33 = vpop.f32.mrb[25].mxu0  ;;  %v6141_v44 = vrot.slane %v6134_v28, %v11516_v27 }
 0xbea   :  { %v6125_v41 = vcombine.low %v5806_v23, %v5808_v50  ;;  %v6064_v43 = vadd.f32 %v6063_v33, %v5995_v21  ;;  %v6123_v37 = vrot.slane %v6116_v29, %v11516_v27 }
 0xbeb   :  { %v6150_v5 = vrot.slane %v6143_v31, %v11516_v27  ;;  %v6091_v7 = vcombine.high %v6069_v32, %v6069_v32  ;;  %v6098_v35 = vrot.slane %v6069_v32, %v11532_v34 }
 0xbec   :  { %v6132_v39 = vrot.slane %v6125_v41, %v11516_v27  ;;  %v6081_v10 = vrot.slane %v6064_v43, %v11532_v34  ;;  %v6074_v11 = vcombine.high %v6064_v43, %v6064_v43 }
 0xbed   :  { %v6855_v24 = vcombine.low %v6141_v44, %v6150_v5  ;;  %v10685_v42 = vcombine.high %v6141_v44, %v6150_v5  ;;  %7186 = vxpose.xlu0.b32.start.end [1/1] (short) (narrow) %v6098_v35, 8  ;;  %v6105_v36 = vrot.slane %v6091_v7, %v11532_v34  ;;  %v6106_v38 = vcombine.high %v6098_v35, %v6098_v35 }
 0xbee   :  { %v6854_v46 = vcombine.low %v6123_v37, %v6132_v39  ;;  %v10684_v47 = vcombine.high %v6123_v37, %v6132_v39  ;;  %7058 = vxpose.xlu1.b32.start.end [1/1] (short) (narrow) %v6081_v10, 8  ;;  %v6089_v52 = vcombine.high %v6081_v10, %v6081_v10  ;;  %v6088_v56 = vrot.slane %v6074_v11, %v11532_v34 }
 0xbef   :  { %v6869_v48 = vrot.slane %v6855_v24, %v11532_v34  ;;  %v6962_v6 = vrot.slane %v10685_v42, %v11532_v34  ;;  %v6107_v45 = vcombine.high %v6105_v36, %v6105_v36 }
 0xbf0   :  { %v6862_v40 = vrot.slane %v6854_v46, %v11532_v34  ;;  %v6955_v8 = vrot.slane %v10684_v47, %v11532_v34  ;;  %v6090_v59 = vcombine.high %v6088_v56, %v6088_v56 }
 0xbf1   :  { %7250 = vxpose.xlu0.b32.start.end [1/1] (short) (narrow) %v6105_v36, 8 }
 0xbf2   :  { %7218 = vxpose.xlu1.b32.start.end [1/1] (short) (narrow) %v6106_v38, 8  ;;  %v6870_v49 = vcombine.low %v6862_v40, %v6869_v48  ;;  %v6963_v22 = vcombine.low %v6955_v8, %v6962_v6 }
 0xbf4   :  { %11120 = vmatmul.mubr.msk.f32.vlgmr.msra.gmra.mrb[28].mxu1 %vm2000_vm2, %v6870_v49 }
 0xbf5   :  { %11123 = vmatpush3.msra.mxu1 %v6849_v51  ;;  %7090 = vxpose.xlu0.b32.start.end [1/1] (short) (narrow) %v6089_v52, 8 }
 0xbf6   :  { %7282 = vxpose.xlu1.b32.start.end [1/1] (short) (narrow) %v6107_v45, 8  ;;  %11124 = vmatprep.mubr.msk.f32.mxu1 %vm11407_vm0, %v11408_v12 }
 0xbf7   :  { %11132 = vmatprep.subr.mxu1 %v11408_v12 }
 0xbf8   :  { %11125 = vmatmul.mubr.msk.f32.vlgmr.msra.gmra.mrb[30].mxu1 %vm2000_vm2, %v6963_v22 }
 0xbf9   :  { %7122 = vxpose.xlu0.b32.start.end [1/1] (short) (narrow) %v6088_v56, 8  ;;  %11134 = vmatprep.mubr.msk.f32.mxu1 %vm11407_vm0, %v11408_v12 }
 0xbfa   :  { %7154 = vxpose.xlu1.b32.start.end [1/1] (short) (narrow) %v6090_v59, 8 }
 0xc6d   :  { %v7202_v54 = vpop.trf.xlu0 }
 0xc6e   :  { %v7074_v55 = vpop.trf.xlu1 }
 0xc71   :  { %v7266_v61 = vpop.trf.xlu0 }
 0xc72   :  { %v7234_v62 = vpop.trf.xlu1  ;;  %v7347_v0 = vcombine.high %v7202_v54, %v7266_v61  ;;  %v7346_v1 = vcombine.low %v7202_v54, %v7266_v61 }
 0xc74   :  { %v7354_v9 = vrot.slane %v7346_v1, %v11532_v34  ;;  %v7361_v13 = vrot.slane %v7347_v0, %v11532_v34 }
 0xc75   :  { %v7106_v2 = vpop.trf.xlu0 }
 0xc76   :  { %v7298_v3 = vpop.trf.xlu1 }
 0xc77   :  { %v7362_v14 = vcombine.low %v7234_v62, %v7298_v3  ;;  %v7363_v58 = vcombine.high %v7234_v62, %v7298_v3 }
 0xc79   :  { %v7370_v16 = vrot.slane %v7362_v14, %v11532_v34  ;;  %v7377_v17 = vrot.slane %v7363_v58, %v11532_v34  ;;  %v7138_v18 = vpop.trf.xlu0 }
 0xc7a   :  { %v7170_v19 = vpop.trf.xlu1  ;;  %v7314_v60 = vcombine.low %v7074_v55, %v7138_v18  ;;  %v7315_v53 = vcombine.high %v7074_v55, %v7138_v18 }
 0xc7b   :  { %v7410_v20 = vcombine.low %v7354_v9, %v7370_v16  ;;  %v7426_v4 = vcombine.low %v7361_v13, %v7377_v17  ;;  %v7427_v21 = vcombine.high %v7361_v13, %v7377_v17  ;;  %v7330_v23 = vcombine.low %v7106_v2, %v7170_v19 }
 0xc7c   :  { %v7331_v25 = vcombine.high %v7106_v2, %v7170_v19  ;;  %v7322_v26 = vrot.slane %v7314_v60, %v11532_v34  ;;  %v7329_v28 = vrot.slane %v7315_v53, %v11532_v34  ;;  %v7411_v50 = vcombine.high %v7354_v9, %v7370_v16 }
 0xc7d   :  { %v7338_v29 = vrot.slane %v7330_v23, %v11532_v34  ;;  %v7418_v31 = vrot.slane %v7410_v20, %v11516_v27  ;;  %v7434_v44 = vrot.slane %v7426_v4, %v11516_v27  ;;  %v7441_v5 = vrot.slane %v7427_v21, %v11516_v27  ;;  %v10693_v23 = vld [vmem:[%s12490_s3 + $0x60] sm:$0xff] }
 0xc7e   :  { %v7345_v30 = vrot.slane %v7331_v25, %v11532_v34  ;;  %v7425_v7 = vrot.slane %v7411_v50, %v11516_v27  ;;  %v10694_v25 = vld [vmem:[%s12490_s3 + $0x68] sm:$0xff] }
 0xc7f   :  { %v7378_v32 = vcombine.low %v7322_v26, %v7338_v29  ;;  %v7379_v33 = vcombine.high %v7322_v26, %v7338_v29 }
 0xc80   :  { %v7394_v41 = vcombine.low %v7329_v28, %v7345_v30  ;;  %v7395_v43 = vcombine.high %v7329_v28, %v7345_v30  ;;  %v11320_v28 = vpack.c.bf16 %v10694_v25, %v10693_v23  ;;  %v10691_v25 = vld [vmem:[%s12493_s6 + $0x10] sm:$0xff] }
 0xc81   :  { %v7386_v39 = vrot.slane %v7378_v32, %v11516_v27  ;;  %v7393_v10 = vrot.slane %v7379_v33, %v11516_v27 }
 0xc82   :  { %v7402_v35 = vrot.slane %v7394_v41, %v11516_v27  ;;  %v7409_v37 = vrot.slane %v7395_v43, %v11516_v27 }
 0xc83   :  { %v7443_v24 = vcombine.high %v7386_v39, %v7418_v31  ;;  %v7442_v42 = vcombine.low %v7386_v39, %v7418_v31  ;;  %v7444_v36 = vcombine.low %v7393_v10, %v7425_v7  ;;  %v7445_v40 = vcombine.high %v7393_v10, %v7425_v7 }
 0xc84   :  { %v7446_v46 = vcombine.low %v7402_v35, %v7434_v44  ;;  %v7447_v47 = vcombine.high %v7402_v35, %v7434_v44  ;;  %v7448_v48 = vcombine.low %v7409_v37, %v7441_v5  ;;  %v7449_v6 = vcombine.high %v7409_v37, %v7441_v5  ;;  %v10695_v44 = vld [vmem:[%s12490_s3 + $0x70] sm:$0xff]  ;;  %v10696_v5 = vld [vmem:[%s12490_s3 + $0x78] sm:$0xff] }
 0xc85   :  { %7482 = vxpose.xlu0.b32.start.end [1/1] (short) (narrow) %v7443_v24, 8  ;;  %7450 = vxpose.xlu1.b32.start.end [1/1] (short) (narrow) %v7442_v42, 8  ;;  %v11324_v10 = vpack.c.bf16 %v10696_v5, %v10695_v44  ;;  %v10709_v24 = vld [vmem:[%s12492_s5 + $0x60] sm:$0xff]  ;;  %v10710_v42 = vld [vmem:[%s12492_s5 + $0x68] sm:$0xff] }
 0xc89   :  { %7514 = vxpose.xlu0.b32.start.end [1/1] (short) (narrow) %v7444_v36, 8  ;;  %7546 = vxpose.xlu1.b32.start.end [1/1] (short) (narrow) %v7445_v40, 8  ;;  %v10698_v36 = vld [vmem:[%s12494_s7 + $0x3] ss:$0 sm:$0xff] }
 0xc8a   :  { %v8141_v40 = vcombine.low %v10698_v36, %v10698_v36 }
 0xcc7   :  { %v6939_v8 = vpop.f32.mrb[28].mxu1 }
 0xcc8   :  { %v11121_v11 = vpop.f32.mrb[29].mxu1  ;;  %v7036_v38 = vsel %vm2000_vm2, %v6939_v8, -inf }
 0xcc9   :  { %7037 = vmax.xlane.f32.xlu0 %v7036_v38 }
 0xccb   :  { %v7032_v49 = vpop.f32.mrb[30].mxu1 }
 0xccc   :  { %v11126_v22 = vpop.f32.mrb[31].mxu1  ;;  %v7039_v51 = vsel %vm2000_vm2, %v7032_v49, -inf }
 0xccd   :  { %7040 = vmax.xlane.f32.xlu1 %v7039_v51  ;;  %v8148_v22 = vrot.slane %v8141_v40, %v11532_v34 }
 0xccf   :  { %v8149_v51 = vcombine.low %v8148_v22, %v8148_v22 }
 0xcf6   :  { %7578 = vxpose.xlu0.b32.start.end [1/1] (short) (narrow) %v7446_v46, 8  ;;  %v11336_v46 = vpack.c.bf16 %v10710_v42, %v10709_v24 }
 0xd00   :  { %7610 = vxpose.xlu1.b32.start.end [1/1] (short) (narrow) %v7447_v47, 8  ;;  %v10711_v47 = vld [vmem:[%s12492_s5 + $0x70] sm:$0xff] }
 0xd05   :  { %v7498_v52 = vpop.trf.xlu0  ;;  %v7466_v45 = vpop.trf.xlu1 }
 0xd09   :  { %v7530_v56 = vpop.trf.xlu0  ;;  %v7562_v59 = vpop.trf.xlu1 }
 0xd0a   :  { %v7706_v54 = vcombine.low %v7466_v45, %v7530_v56  ;;  %v7714_v55 = vcombine.low %v7498_v52, %v7562_v59 }
 0xd0c   :  { %v7713_v61 = vrot.slane %v7706_v54, %v11532_v34  ;;  %v7721_v62 = vrot.slane %v7714_v55, %v11532_v34 }
 0xd0e   :  { %v7738_v0 = vcombine.low %v7713_v61, %v7721_v62 }
 0xd10   :  { %v7745_v7 = vrot.slane %v7738_v0, %v11516_v27 }
 0xd56   :  { %v7038_v1 = vpop.xlane.xlu0 %7037 }
 0xd57   :  { %v7042_v2 = vsub.f32 %v6939_v8, %v7038_v1 }
 0xd59   :  { %v7044_v3 = vmul.f32 1.442695, %v7042_v2 }
 0xd5a   :  { %v7041_v9 = vpop.xlane.xlu1 %7040 }
 0xd5b   :  { %11366 = vpow2.f32 %v7044_v3  ;;  %v7043_v13 = vsub.f32 %v7032_v49, %v7041_v9 }
 0xd5d   :  { %v7046_v14 = vmul.f32 1.442695, %v7043_v13 }
 0xd5f   :  { %11368 = vpow2.f32 %v7046_v14 }
 0xd65   :  { %v11367_v58 = vpop.eup %11366 }
 0xd66   :  { %v7048_v16 = vsel %vm2000_vm2, %v11367_v58, 0.0 }
 0xd67   :  { %7049 = vadd.xlane.f32.xlu0 %v7048_v16 }
 0xd69   :  { %v11369_v17 = vpop.eup %11368 }
 0xd6a   :  { %v7051_v18 = vsel %vm2000_vm2, %v11369_v17, 0.0 }
 0xd6b   :  { %7052 = vadd.xlane.f32.xlu1 %v7051_v18 }
 0xd76   :  { %v7594_v19 = vpop.trf.xlu0 }
 0xd80   :  { %v7626_v60 = vpop.trf.xlu1 }
 0xd94   :  { %7642 = vxpose.xlu0.b32.start.end [1/1] (short) (narrow) %v7448_v48, 8  ;;  %v10712_v48 = vld [vmem:[%s12492_s5 + $0x78] sm:$0xff] }
 0xd9e   :  { %7674 = vxpose.xlu1.b32.start.end [1/1] (short) (narrow) %v7449_v6, 8  ;;  %v11340_v6 = vpack.c.bf16 %v10712_v48, %v10711_v47 }
 0xdf4   :  { %v7050_v53 = vpop.xlane.xlu0 %7049 }
 0xdf5   :  { %11370 = vrcp.f32 %v7050_v53 }
 0xdf8   :  { %v7053_v20 = vpop.xlane.xlu1 %7052 }
 0xdf9   :  { %11372 = vrcp.f32 %v7053_v20 }
 0xdff   :  { %v11371_v4 = vpop.eup %11370 }
 0xe00   :  { %v7056_v21 = vmul.f32 %v11371_v4, %v11367_v58 }
 0xe02   :  { %11128 = vmatpush3.xpose.msk.msra.mxu0 %vm2000_vm2, %v7056_v21 }
 0xe03   :  { %v11373_v26 = vpop.eup %11372  ;;  %11137 = vmatprep.subr.mxu0 %v11408_v12 }
 0xe04   :  { %v7057_v50 = vmul.f32 %v11373_v26, %v11369_v17  ;;  %v10701_v26 = vld [vmem:[%s12491_s4 + $0x60] sm:$0xff] }
 0xe06   :  { %11133 = vmatpush3.xpose.msk.msra.mxu1 %vm2000_vm2, %v7057_v50 }
 0xe07   :  { %11321 = vmatprep.subr.bf16.mxu1 %v11320_v28 }
 0xe14   :  { %v7658_v29 = vpop.trf.xlu0 }
 0xe15   :  { %v7722_v30 = vcombine.low %v7594_v19, %v7658_v29 }
 0xe17   :  { %v7729_v33 = vrot.slane %v7722_v30, %v11532_v34 }
 0xe1e   :  { %v7690_v31 = vpop.trf.xlu1 }
 0xe1f   :  { %v7730_v32 = vcombine.low %v7626_v60, %v7690_v31 }
 0xe21   :  { %v7737_v41 = vrot.slane %v7730_v32, %v11532_v34 }
 0xe23   :  { %v7746_v43 = vcombine.low %v7729_v33, %v7737_v41 }
 0xe25   :  { %v7753_v35 = vrot.slane %v7746_v43, %v11516_v27 }
 0xe27   :  { %v7754_v37 = vcombine.low %v7745_v7, %v7753_v35  ;;  %v7755_v39 = vcombine.high %v7745_v7, %v7753_v35 }
 0xe29   :  { %11130 = vmatmul.mubr.msk.f32.vlgmr.msra.gmra.mrb[26].mxu0 %vm2000_vm2, %v7754_v37  ;;  %11135 = vmatmul.mubr.msk.f32.vlgmr.msra.gmra.mrb[32].mxu1 %vm2000_vm2, %v7755_v39 }
 0xe2a   :  { %11323 = vmatpush3.bf16.msra.mxu1 %v11320_v28  ;;  %11150 = vmatprep.mubr.msk.f32.mxu1 %vm197_vm1, %v11687_v57  ;;  %v10702_v28 = vld [vmem:[%s12491_s4 + $0x68] sm:$0xff] }
 0xe2b   :  { %11325 = vmatprep.subr.bf16.mxu1 %v11324_v10  ;;  %11139 = vmatprep.mubr.msk.f32.mxu0 %vm11407_vm0, %v11408_v12  ;;  %v11328_v30 = vpack.c.bf16 %v10702_v28, %v10701_v26 }
 0xe2c   :  { %11138 = vmatpush3.msra.mxu0 %v10691_v25 }
 0xe2d   :  { %11329 = vmatprep.subr.bf16.mxu0 %v11328_v30 }
 0xe2e   :  { %11327 = vmatpush3.bf16.msra.mxu1 %v11324_v10 }
 0xe2f   :  { %11337 = vmatprep.subr.bf16.mxu1 %v11336_v46 }
 0xe31   :  { %11151 = vmatmul.mubr.msk.f32.vlgmr.msra.gmra.mrb[34].mxu1 %vm197_vm1, %v11707_v15 }
 0xe32   :  { %11339 = vmatpush3.bf16.msra.mxu1 %v11336_v46  ;;  %11172 = vmatprep.mubr.msk.f32.mxu1 %vm197_vm1, %v11687_v57 }
 0xe33   :  { %11341 = vmatprep.subr.bf16.mxu1 %v11340_v6 }
 0xe36   :  { %11343 = vmatpush3.bf16.msra.mxu1 %v11340_v6 }
 0xe37   :  { %11185 = vmatprep.subr.mxu1 %v11408_v12 }
 0xe39   :  { %11173 = vmatmul.mubr.msk.f32.vlgmr.msra.gmra.mrb[36].mxu1 %vm197_vm1, %v11707_v15 }
 0xe3a   :  { %11187 = vmatprep.mubr.msk.f32.mxu1 %vm11407_vm0, %v11408_v12 }
 0xefc   :  { %v7828_v8 = vpop.f32.mrb[26].mxu0  ;;  %v7904_v11 = vpop.f32.mrb[32].mxu1 }
 0xefd   :  { %7940 = vxpose.xlu1.b32.start.end [1/1] (short) (narrow) %v7904_v11, 8  ;;  %v11136_v38 = vpop.f32.mrb[33].mxu1  ;;  %7908 = vxpose.xlu0.b32.start.end [1/1] (short) (narrow) %v7828_v8, 8  ;;  %v11131_v49 = vpop.f32.mrb[27].mxu0 }
 0xf04   :  { %v11152_v52 = vpop.f32.mrb[34].mxu1 }
 0xf05   :  { %v8223_v45 = vadd.f32 %v11152_v52, %v8149_v51  ;;  %v8217_v56 = vpop.f32.mrb[35].mxu1 }
 0xf06   :  { %v8218_v59 = vadd.f32 %v8217_v56, %v8149_v51 }
 0xf07   :  { %v8245_v54 = vcombine.high %v8223_v45, %v8223_v45  ;;  %v8252_v55 = vrot.slane %v8223_v45, %v11532_v34 }
 0xf08   :  { %v8228_v61 = vcombine.high %v8218_v59, %v8218_v59  ;;  %v8235_v62 = vrot.slane %v8218_v59, %v11532_v34 }
 0xf09   :  { %v8259_v0 = vrot.slane %v8245_v54, %v11532_v34  ;;  %v8260_v1 = vcombine.high %v8252_v55, %v8252_v55 }
 0xf0a   :  { %v8242_v2 = vrot.slane %v8228_v61, %v11532_v34  ;;  %v8243_v3 = vcombine.high %v8235_v62, %v8235_v62 }
 0xf0b   :  { %v8261_v9 = vcombine.high %v8259_v0, %v8259_v0  ;;  %v8570_v13 = vcombine.low %v8252_v55, %v8260_v1 }
 0xf0c   :  { %v8244_v14 = vcombine.high %v8242_v2, %v8242_v2  ;;  %v8552_v58 = vcombine.low %v8235_v62, %v8243_v3  ;;  %v12286_v16 = vpop.f32.mrb[36].mxu1 }
 0xf0d   :  { %v8579_v17 = vcombine.low %v8259_v0, %v8261_v9  ;;  %v12288_v18 = vpop.f32.mrb[37].mxu1  ;;  %v8577_v60 = vrot.slane %v8570_v13, %v11516_v27  ;;  %v10703_v9 = vld [vmem:[%s12491_s4 + $0x70] sm:$0xff]  ;;  %v10704_v13 = vld [vmem:[%s12491_s4 + $0x78] sm:$0xff] }
 0xf0e   :  { %v8561_v19 = vcombine.low %v8242_v2, %v8244_v14  ;;  %v8559_v20 = vrot.slane %v8552_v58, %v11516_v27 }
 0xf0f   :  { %v8586_v53 = vrot.slane %v8579_v17, %v11516_v27 }
 0xf10   :  { %v8568_v4 = vrot.slane %v8561_v19, %v11516_v27  ;;  %v11332_v19 = vpack.c.bf16 %v10704_v13, %v10703_v9 }
 0xf11   :  { %v9291_v21 = vcombine.low %v8577_v60, %v8586_v53  ;;  %v10719_v23 = vcombine.high %v8577_v60, %v8586_v53  ;;  %v10706_v60 = vld [vmem:[%s12495_s8 + $0x3] ss:$0 sm:$0xff] }
 0xf12   :  { %v9290_v50 = vcombine.low %v8559_v20, %v8568_v4  ;;  %v10718_v29 = vcombine.high %v8559_v20, %v8568_v4  ;;  %v8282_v53 = vcombine.low %v10706_v60, %v10706_v60 }
 0xf13   :  { %v12304_v31 = vrot.slane %v9291_v21, %v11532_v34  ;;  %v12307_v32 = vrot.slane %v10719_v23, %v11532_v34 }
 0xf14   :  { %v12310_v33 = vrot.slane %v9290_v50, %v11532_v34  ;;  %v12313_v41 = vrot.slane %v10718_v29, %v11532_v34  ;;  %v8289_v21 = vrot.slane %v8282_v53, %v11532_v34 }
 0xf16   :  { %v9306_v43 = vcombine.low %v12310_v33, %v12304_v31  ;;  %v9399_v44 = vcombine.low %v12313_v41, %v12307_v32  ;;  %v8290_v23 = vcombine.low %v8289_v21, %v8289_v21 }
 0xf7d   :  { %v7956_v5 = vpop.trf.xlu1  ;;  %v7924_v7 = vpop.trf.xlu0 }
 0xf7e   :  { %v7987_v35 = vcombine.high %v7956_v5, %v11408_v12  ;;  %v7994_v37 = vrot.slane %v7956_v5, %v11532_v34  ;;  %v7972_v39 = vcombine.high %v7924_v7, %v11408_v12  ;;  %v7979_v10 = vrot.slane %v7924_v7, %v11532_v34 }
 0xf80   :  { %v8001_v24 = vrot.slane %v7987_v35, %v11532_v34  ;;  %v7986_v42 = vrot.slane %v7972_v39, %v11532_v34  ;;  %v8002_v46 = vcombine.low %v7979_v10, %v7994_v37  ;;  %v8003_v47 = vcombine.high %v7979_v10, %v7994_v37 }
 0xf82   :  { %v8010_v48 = vrot.slane %v8002_v46, %v11516_v27  ;;  %v8017_v6 = vrot.slane %v8003_v47, %v11516_v27  ;;  %v8018_v36 = vcombine.low %v7986_v42, %v8001_v24  ;;  %v8019_v8 = vcombine.high %v7986_v42, %v8001_v24 }
 0xf84   :  { %v8034_v40 = vcombine.high %v8010_v48, %v11408_v12  ;;  %v8026_v11 = vrot.slane %v8018_v36, %v11516_v27  ;;  %v8035_v38 = vcombine.high %v8017_v6, %v11408_v12  ;;  %v8038_v49 = vsel %vm3168_vm3, %v8010_v48, 0.0 }
 0xf85   :  { %v8041_v52 = vsel %vm3168_vm3, %v8017_v6, 0.0  ;;  %v8033_v56 = vrot.slane %v8019_v8, %v11516_v27 }
 0xf86   :  { %v8039_v22 = vsel %vm3168_vm3, %v8034_v40, 0.0  ;;  %v8036_v59 = vcombine.high %v8026_v11, %v11408_v12  ;;  %v8043_v54 = vsel %vm3168_vm3, %v8035_v38, 0.0  ;;  %v8045_v61 = vsel %vm3168_vm3, %v8026_v11, 0.0 }
 0xf87   :  { %v8040_v51 = vadd.f32 %v8039_v22, %v8038_v49  ;;  %v8037_v0 = vcombine.high %v8033_v56, %v11408_v12  ;;  %v8049_v3 = vsel %vm3168_vm3, %v8033_v56, 0.0  ;;  %v10714_v22 = vld [vmem:[%s12496_s9 + $0x3] ss:$0 sm:$0xff] }
 0xf88   :  { %v8047_v1 = vsel %vm3168_vm3, %v8036_v59, 0.0 }
 0xf89   :  { %v8042_v45 = vadd.f32 %v8041_v52, %v8040_v51  ;;  %v8051_v58 = vsel %vm3168_vm3, %v8037_v0, 0.0 }
 0xf8b   :  { %v8044_v55 = vadd.f32 %v8043_v54, %v8042_v45 }
 0xf8d   :  { %v8046_v62 = vadd.f32 %v8045_v61, %v8044_v55 }
 0xf8f   :  { %v8048_v2 = vadd.f32 %v8047_v1, %v8046_v62  ;;  %v8423_v62 = vcombine.low %v10714_v22, %v10714_v22 }
 0xf91   :  { %v8050_v14 = vadd.f32 %v8049_v3, %v8048_v2 }
 0xf93   :  { %v8052_v17 = vadd.f32 %v8051_v58, %v8050_v14 }
 0xf95   :  { %11140 = vmatmul.mubr.msk.f32.vlgmr.msra.gmra.mrb[28].mxu0 %vm2000_vm2, %v8052_v17 }
 0xf96   :  { %11331 = vmatpush3.bf16.msra.mxu0 %v11328_v30  ;;  %11161 = vmatprep.mubr.msk.f32.mxu0 %vm197_vm1, %v11687_v57 }
 0xf97   :  { %11333 = vmatprep.subr.bf16.mxu0 %v11332_v19 }
 0xf9a   :  { %11335 = vmatpush3.bf16.msra.mxu0 %v11332_v19  ;;  %v8430_v19 = vrot.slane %v8423_v62, %v11532_v34 }
 0xf9b   :  { %11175 = vmatprep.subr.mxu0 %v11408_v12 }
 0xf9d   :  { %11162 = vmatmul.mubr.msk.f32.vlgmr.msra.gmra.mrb[30].mxu0 %vm197_vm1, %v11707_v15 }
 0xf9e   :  { %11177 = vmatprep.mubr.msk.f32.mxu0 %vm11407_vm0, %v11408_v12 }
0x1068   :  { %v8124_v20 = vpop.f32.mrb[28].mxu0 }
0x1069   :  { %v12359_v4 = vadd.f32 %v8124_v20, %v12178_v63  ;;  %v11141_v57 = vpop.f32.mrb[29].mxu0 }
0x1070   :  { %v11163_v25 = vpop.f32.mrb[30].mxu0 }
0x1071   :  { %v8364_v26 = vadd.f32 %v11163_v25, %v8290_v23  ;;  %v8358_v28 = vpop.f32.mrb[31].mxu0 }
0x1072   :  { %v8359_v15 = vadd.f32 %v8358_v28, %v8290_v23 }
0x1073   :  { %v8393_v50 = vrot.slane %v8364_v26, %v11532_v34  ;;  %v8386_v7 = vcombine.high %v8364_v26, %v8364_v26  ;;  %v8431_v26 = vcombine.low %v8430_v19, %v8430_v19 }
0x1074   :  { %v8369_v29 = vcombine.high %v8359_v15, %v8359_v15  ;;  %v8376_v30 = vrot.slane %v8359_v15, %v11532_v34 }
0x1075   :  { %8716 = vxpose.xlu0.b32.start.end [1/1] (short) (narrow) %v8393_v50, 8  ;;  %v8401_v5 = vcombine.high %v8393_v50, %v8393_v50  ;;  %v8400_v39 = vrot.slane %v8386_v7, %v11532_v34  ;;  %v8500_v7 = vadd.f32 %v12288_v18, %v8431_v26 }
0x1076   :  { %v8384_v63 = vcombine.high %v8376_v30, %v8376_v30  ;;  %v8383_v35 = vrot.slane %v8369_v29, %v11532_v34 }
0x1077   :  { %8748 = vxpose.xlu1.b32.start.end [1/1] (short) (narrow) %v8401_v5, 8  ;;  %v8402_v10 = vcombine.high %v8400_v39, %v8400_v39 }
0x1078   :  { %v8385_v37 = vcombine.high %v8383_v35, %v8383_v35 }
0x1079   :  { %8588 = vxpose.xlu0.b32.start.end [1/1] (short) (narrow) %v8376_v30, 8 }
0x107b   :  { %8620 = vxpose.xlu1.b32.start.end [1/1] (short) (narrow) %v8384_v63, 8 }
0x107d   :  { %8652 = vxpose.xlu0.b32.start.end [1/1] (short) (narrow) %v8383_v35, 8 }
0x107f   :  { %8684 = vxpose.xlu1.b32.start.end [1/1] (short) (narrow) %v8385_v37, 8 }
0x1081   :  { %8780 = vxpose.xlu0.b32.start.end [1/1] (short) (narrow) %v8400_v39, 8 }
0x1083   :  { %8812 = vxpose.xlu1.b32.start.end [1/1] (short) (narrow) %v8402_v10, 8  ;;  %v8510_v10 = vcombine.high %v8500_v7, %v8500_v7 }
0x10f5   :  { %v8732_v24 = vpop.trf.xlu0 }
0x10f7   :  { %v8764_v42 = vpop.trf.xlu1 }
0x10f9   :  { %v8604_v46 = vpop.trf.xlu0 }
0x10fb   :  { %v8636_v47 = vpop.trf.xlu1 }
0x10fd   :  { %v8668_v48 = vpop.trf.xlu0 }
0x10fe   :  { %v8844_v40 = vcombine.low %v8604_v46, %v8668_v48  ;;  %v8845_v0 = vcombine.high %v8604_v46, %v8668_v48  ;;  %v8524_v48 = vrot.slane %v8510_v10, %v11532_v34 }
0x10ff   :  { %v8700_v6 = vpop.trf.xlu1 }
0x1100   :  { %v8860_v36 = vcombine.low %v8636_v47, %v8700_v6  ;;  %v8852_v51 = vrot.slane %v8844_v40, %v11532_v34  ;;  %v8861_v56 = vcombine.high %v8636_v47, %v8700_v6  ;;  %v8859_v60 = vrot.slane %v8845_v0, %v11532_v34 }
0x1101   :  { %v8796_v8 = vpop.trf.xlu0  ;;  %v8505_v47 = vadd.f32 %v12286_v16, %v8431_v26  ;;  %v8526_v40 = vcombine.high %v8524_v48, %v8524_v48 }
0x1102   :  { %v8868_v11 = vrot.slane %v8860_v36, %v11532_v34  ;;  %v8876_v38 = vcombine.low %v8732_v24, %v8796_v8  ;;  %v8877_v54 = vcombine.high %v8732_v24, %v8796_v8  ;;  %v8875_v9 = vrot.slane %v8861_v56, %v11532_v34 }
0x1103   :  { %v8828_v49 = vpop.trf.xlu1  ;;  %v8517_v24 = vrot.slane %v8500_v7, %v11532_v34  ;;  %v8527_v6 = vcombine.high %v8505_v47, %v8505_v47  ;;  %v8534_v36 = vrot.slane %v8505_v47, %v11532_v34 }
0x1104   :  { %v8892_v52 = vcombine.low %v8764_v42, %v8828_v49  ;;  %v8893_v45 = vcombine.high %v8764_v42, %v8828_v49  ;;  %v8908_v59 = vcombine.low %v8852_v51, %v8868_v11  ;;  %v8884_v55 = vrot.slane %v8876_v38, %v11532_v34 }
0x1105   :  { %v8909_v13 = vcombine.high %v8852_v51, %v8868_v11  ;;  %v8891_v14 = vrot.slane %v8877_v54, %v11532_v34  ;;  %v8924_v23 = vcombine.low %v8859_v60, %v8875_v9  ;;  %v8925_v30 = vcombine.high %v8859_v60, %v8875_v9 }
0x1106   :  { %v8900_v61 = vrot.slane %v8892_v52, %v11532_v34  ;;  %v8907_v1 = vrot.slane %v8893_v45, %v11532_v34  ;;  %v8916_v58 = vrot.slane %v8908_v59, %v11516_v27  ;;  %v8525_v18 = vcombine.high %v8517_v24, %v8517_v24 }
0x1107   :  { %v8923_v25 = vrot.slane %v8909_v13, %v11516_v27  ;;  %v8932_v5 = vrot.slane %v8924_v23, %v11516_v27  ;;  %v8939_v39 = vrot.slane %v8925_v30, %v11516_v27  ;;  %v8541_v8 = vrot.slane %v8527_v6, %v11532_v34 }
0x1108   :  { %v8940_v2 = vcombine.low %v8884_v55, %v8900_v61  ;;  %v8941_v3 = vcombine.high %v8884_v55, %v8900_v61  ;;  %v8956_v53 = vcombine.low %v8891_v14, %v8907_v1  ;;  %v8957_v28 = vcombine.high %v8891_v14, %v8907_v1 }
0x1109   :  { %v8542_v11 = vcombine.high %v8534_v36, %v8534_v36  ;;  %v8543_v38 = vcombine.high %v8541_v8, %v8541_v8 }
0x110a   :  { %v8948_v17 = vrot.slane %v8940_v2, %v11516_v27  ;;  %v8955_v21 = vrot.slane %v8941_v3, %v11516_v27  ;;  %v8964_v29 = vrot.slane %v8956_v53, %v11516_v27  ;;  %v8971_v37 = vrot.slane %v8957_v28, %v11516_v27 }
0x110c   :  { %v8973_v20 = vcombine.high %v8916_v58, %v8948_v17  ;;  %v8972_v57 = vcombine.low %v8916_v58, %v8948_v17  ;;  %v8975_v15 = vcombine.high %v8923_v25, %v8955_v21  ;;  %v8974_v50 = vcombine.low %v8923_v25, %v8955_v21 }
0x110d   :  { %v8977_v63 = vcombine.high %v8932_v5, %v8964_v29  ;;  %v8976_v35 = vcombine.low %v8932_v5, %v8964_v29  ;;  %v8979_v42 = vcombine.high %v8939_v39, %v8971_v37  ;;  %v8978_v46 = vcombine.low %v8939_v39, %v8971_v37 }
0x110e   :  { %9012 = vxpose.xlu1.b32.start.end [1/1] (short) (narrow) %v8973_v20, 8  ;;  %8980 = vxpose.xlu0.b32.start.end [1/1] (short) (narrow) %v8972_v57, 8 }
0x1112   :  { %9076 = vxpose.xlu1.b32.start.end [1/1] (short) (narrow) %v8975_v15, 8  ;;  %9044 = vxpose.xlu0.b32.start.end [1/1] (short) (narrow) %v8974_v50, 8 }
0x1116   :  { %9140 = vxpose.xlu1.b32.start.end [1/1] (short) (narrow) %v8977_v63, 8  ;;  %9108 = vxpose.xlu0.b32.start.end [1/1] (short) (narrow) %v8976_v35, 8 }
0x111a   :  { %9204 = vxpose.xlu1.b32.start.end [1/1] (short) (narrow) %v8979_v42, 8  ;;  %9172 = vxpose.xlu0.b32.start.end [1/1] (short) (narrow) %v8978_v46, 8 }
0x111e   :  { %9494 = vxpose.xlu1.b32.start.end [1/1] (short) (narrow) %v8517_v24, 8  ;;  %9526 = vxpose.xlu0.b32.start.end [1/1] (short) (narrow) %v8525_v18, 8 }
0x1122   :  { %9590 = vxpose.xlu1.b32.start.end [1/1] (short) (narrow) %v8526_v40, 8  ;;  %9558 = vxpose.xlu0.b32.start.end [1/1] (short) (narrow) %v8524_v48, 8 }
0x1126   :  { %9654 = vxpose.xlu1.b32.start.end [1/1] (short) (narrow) %v8542_v11, 8  ;;  %9622 = vxpose.xlu0.b32.start.end [1/1] (short) (narrow) %v8534_v36, 8 }
0x112a   :  { %9718 = vxpose.xlu1.b32.start.end [1/1] (short) (narrow) %v8543_v38, 8  ;;  %9686 = vxpose.xlu0.b32.start.end [1/1] (short) (narrow) %v8541_v8, 8 }
0x118e   :  { %v9028_v16 = vpop.trf.xlu1  ;;  %v8996_v49 = vpop.trf.xlu0 }
0x1192   :  { %v9092_v22 = vpop.trf.xlu1  ;;  %v9060_v51 = vpop.trf.xlu0 }
0x1193   :  { %v9244_v52 = vcombine.low %v9028_v16, %v9092_v22  ;;  %v9236_v45 = vcombine.low %v8996_v49, %v9060_v51 }
0x1195   :  { %v9251_v54 = vrot.slane %v9244_v52, %v11532_v34  ;;  %v9243_v55 = vrot.slane %v9236_v45, %v11532_v34 }
0x1196   :  { %v9156_v56 = vpop.trf.xlu1  ;;  %v9124_v59 = vpop.trf.xlu0 }
0x1197   :  { %v9268_v2 = vcombine.low %v9243_v55, %v9251_v54 }
0x1199   :  { %v9275_v17 = vrot.slane %v9268_v2, %v11516_v27 }
0x119a   :  { %v9220_v61 = vpop.trf.xlu1  ;;  %v9188_v62 = vpop.trf.xlu0 }
0x119b   :  { %v9260_v0 = vcombine.low %v9156_v56, %v9220_v61  ;;  %v9252_v1 = vcombine.low %v9124_v59, %v9188_v62 }
0x119d   :  { %v9267_v3 = vrot.slane %v9260_v0, %v11532_v34  ;;  %v9259_v9 = vrot.slane %v9252_v1, %v11532_v34 }
0x119e   :  { %v9510_v13 = vpop.trf.xlu1  ;;  %v9542_v14 = vpop.trf.xlu0 }
0x119f   :  { %v9276_v58 = vcombine.low %v9259_v9, %v9267_v3 }
0x11a1   :  { %v9283_v19 = vrot.slane %v9276_v58, %v11516_v27 }
0x11a2   :  { %v9606_v60 = vpop.trf.xlu1  ;;  %v9574_v53 = vpop.trf.xlu0 }
0x11a3   :  { %v9284_v20 = vcombine.low %v9275_v17, %v9283_v19  ;;  %v9766_v57 = vcombine.low %v9542_v14, %v9606_v60  ;;  %v9767_v21 = vcombine.high %v9542_v14, %v9606_v60  ;;  %v9750_v23 = vcombine.low %v9510_v13, %v9574_v53 }
0x11a4   :  { %v9751_v25 = vcombine.high %v9510_v13, %v9574_v53  ;;  %v9285_v26 = vcombine.high %v9275_v17, %v9283_v19 }
0x11a5   :  { %11176 = vmatpush3.msra.mxu0 %v9284_v20  ;;  %v9781_v28 = vrot.slane %v9767_v21, %v11532_v34  ;;  %v9774_v15 = vrot.slane %v9766_v57, %v11532_v34  ;;  %v9758_v50 = vrot.slane %v9750_v23, %v11532_v34 }
0x11a6   :  { %11178 = vmatmul.mubr.msk.f32.vlgmr.msra.gmra.mrb[32].mxu0 %vm2000_vm2, %v9306_v43  ;;  %11180 = vmatprep.subr.mxu0 %v11408_v12  ;;  %v9765_v29 = vrot.slane %v9751_v25, %v11532_v34  ;;  %v9670_v30 = vpop.trf.xlu1  ;;  %v9638_v5 = vpop.trf.xlu0 }
0x11a7   :  { %11181 = vmatpush3.msra.mxu0 %v9285_v26  ;;  %11182 = vmatprep.mubr.msk.f32.mxu0 %vm11407_vm0, %v11408_v12  ;;  %v9814_v31 = vcombine.low %v9758_v50, %v9774_v15  ;;  %v9815_v24 = vcombine.high %v9758_v50, %v9774_v15 }
0x11a8   :  { %v9830_v7 = vcombine.low %v9765_v29, %v9781_v28  ;;  %v9831_v63 = vcombine.high %v9765_v29, %v9781_v28  ;;  %11190 = vmatprep.subr.mxu0 %v11408_v12 }
0x11a9   :  { %v9822_v41 = vrot.slane %v9814_v31, %v11516_v27  ;;  %v9829_v40 = vrot.slane %v9815_v24, %v11516_v27 }
0x11aa   :  { %11183 = vmatmul.mubr.msk.f32.vlgmr.msra.gmra.mrb[34].mxu0 %vm2000_vm2, %v9399_v44  ;;  %v9734_v33 = vpop.trf.xlu1  ;;  %v9702_v43 = vpop.trf.xlu0  ;;  %v9838_v22 = vrot.slane %v9830_v7, %v11516_v27  ;;  %v9845_v51 = vrot.slane %v9831_v63, %v11516_v27 }
0x11ab   :  { %v9798_v35 = vcombine.low %v9670_v30, %v9734_v33  ;;  %v9799_v37 = vcombine.high %v9670_v30, %v9734_v33  ;;  %v9782_v39 = vcombine.low %v9638_v5, %v9702_v43  ;;  %v9783_v10 = vcombine.high %v9638_v5, %v9702_v43  ;;  %11192 = vmatprep.mubr.msk.f32.mxu0 %vm11407_vm0, %v11408_v12 }
0x11ad   :  { %v9806_v42 = vrot.slane %v9798_v35, %v11532_v34  ;;  %v9813_v46 = vrot.slane %v9799_v37, %v11532_v34  ;;  %v9790_v47 = vrot.slane %v9782_v39, %v11532_v34  ;;  %v9797_v32 = vrot.slane %v9783_v10, %v11532_v34 }
0x11af   :  { %v9846_v44 = vcombine.low %v9790_v47, %v9806_v42  ;;  %v9847_v48 = vcombine.high %v9790_v47, %v9806_v42  ;;  %v9862_v18 = vcombine.low %v9797_v32, %v9813_v46  ;;  %v9863_v6 = vcombine.high %v9797_v32, %v9813_v46 }
0x11b1   :  { %v9854_v36 = vrot.slane %v9846_v44, %v11516_v27  ;;  %v9861_v8 = vrot.slane %v9847_v48, %v11516_v27  ;;  %v9870_v52 = vrot.slane %v9862_v18, %v11516_v27  ;;  %v9877_v45 = vrot.slane %v9863_v6, %v11516_v27 }
0x11b3   :  { %v9879_v11 = vcombine.high %v9822_v41, %v9854_v36  ;;  %v9878_v38 = vcombine.low %v9822_v41, %v9854_v36  ;;  %v9880_v16 = vcombine.low %v9829_v40, %v9861_v8  ;;  %v9881_v49 = vcombine.high %v9829_v40, %v9861_v8 }
0x11b4   :  { %v9882_v56 = vcombine.low %v9838_v22, %v9870_v52  ;;  %v9883_v59 = vcombine.high %v9838_v22, %v9870_v52  ;;  %v9884_v54 = vcombine.low %v9845_v51, %v9877_v45  ;;  %v9885_v55 = vcombine.high %v9845_v51, %v9877_v45 }
0x11b5   :  { %9918 = vxpose.xlu0.b32.start.end [1/1] (short) (narrow) %v9879_v11, 8  ;;  %9886 = vxpose.xlu1.b32.start.end [1/1] (short) (narrow) %v9878_v38, 8  ;;  %v10725_v11 = vld [vmem:[%s12493_s6 + $0x18] sm:$0xff] }
0x11b9   :  { %9950 = vxpose.xlu0.b32.start.end [1/1] (short) (narrow) %v9880_v16, 8  ;;  %9982 = vxpose.xlu1.b32.start.end [1/1] (short) (narrow) %v9881_v49, 8 }
0x1235   :  { %v9934_v61 = vpop.trf.xlu0  ;;  %v9902_v62 = vpop.trf.xlu1 }
0x1239   :  { %v9966_v0 = vpop.trf.xlu0  ;;  %v9998_v1 = vpop.trf.xlu1 }
0x123a   :  { %v10142_v2 = vcombine.low %v9902_v62, %v9966_v0  ;;  %v10150_v3 = vcombine.low %v9934_v61, %v9998_v1 }
0x123c   :  { %v10149_v9 = vrot.slane %v10142_v2, %v11532_v34  ;;  %v10157_v13 = vrot.slane %v10150_v3, %v11532_v34 }
0x123e   :  { %v10174_v14 = vcombine.low %v10149_v9, %v10157_v13 }
0x1240   :  { %v10181_v41 = vrot.slane %v10174_v14, %v11516_v27 }
0x1279   :  { %v9375_v58 = vpop.f32.mrb[32].mxu0 }
0x127a   :  { %v11179_v17 = vpop.f32.mrb[33].mxu0  ;;  %v9472_v19 = vsel %vm2000_vm2, %v9375_v58, -inf }
0x127b   :  { %9473 = vmax.xlane.f32.xlu0 %v9472_v19 }
0x127d   :  { %v9468_v60 = vpop.f32.mrb[34].mxu0 }
0x127e   :  { %v11184_v53 = vpop.f32.mrb[35].mxu0  ;;  %v9475_v20 = vsel %vm2000_vm2, %v9468_v60, -inf }
0x127f   :  { %9476 = vmax.xlane.f32.xlu1 %v9475_v20 }
0x12a8   :  { %10014 = vxpose.xlu0.b32.start.end [1/1] (short) (narrow) %v9882_v56, 8 }
0x12b2   :  { %10046 = vxpose.xlu1.b32.start.end [1/1] (short) (narrow) %v9883_v59, 8 }
0x1308   :  { %v9474_v57 = vpop.xlane.xlu0 %9473 }
0x1309   :  { %v9478_v21 = vsub.f32 %v9375_v58, %v9474_v57 }
0x130b   :  { %v9480_v23 = vmul.f32 1.442695, %v9478_v21 }
0x130c   :  { %v9477_v25 = vpop.xlane.xlu1 %9476 }
0x130d   :  { %11374 = vpow2.f32 %v9480_v23  ;;  %v9479_v26 = vsub.f32 %v9468_v60, %v9477_v25 }
0x130f   :  { %v9482_v28 = vmul.f32 1.442695, %v9479_v26 }
0x1311   :  { %11376 = vpow2.f32 %v9482_v28 }
0x1317   :  { %v11375_v15 = vpop.eup %11374 }
0x1318   :  { %v9484_v50 = vsel %vm2000_vm2, %v11375_v15, 0.0 }
0x1319   :  { %9485 = vadd.xlane.f32.xlu0 %v9484_v50 }
0x131b   :  { %v11377_v29 = vpop.eup %11376 }
0x131c   :  { %v9487_v30 = vsel %vm2000_vm2, %v11377_v29, 0.0 }
0x131d   :  { %9488 = vadd.xlane.f32.xlu1 %v9487_v30 }
0x1328   :  { %v10030_v5 = vpop.trf.xlu0 }
0x1332   :  { %v10062_v7 = vpop.trf.xlu1 }
0x1346   :  { %10078 = vxpose.xlu0.b32.start.end [1/1] (short) (narrow) %v9884_v54, 8 }
0x1350   :  { %10110 = vxpose.xlu1.b32.start.end [1/1] (short) (narrow) %v9885_v55, 8 }
0x13a6   :  { %v9486_v63 = vpop.xlane.xlu0 %9485 }
0x13a7   :  { %11378 = vrcp.f32 %v9486_v63 }
0x13aa   :  { %v9489_v31 = vpop.xlane.xlu1 %9488 }
0x13ab   :  { %11380 = vrcp.f32 %v9489_v31 }
0x13b1   :  { %v11379_v33 = vpop.eup %11378 }
0x13b2   :  { %v9492_v43 = vmul.f32 %v11379_v33, %v11375_v15 }
0x13b4   :  { %11186 = vmatpush3.xpose.msk.msra.mxu1 %vm2000_vm2, %v9492_v43 }
0x13b5   :  { %v11381_v35 = vpop.eup %11380  ;;  %11195 = vmatprep.subr.mxu1 %v11408_v12 }
0x13b6   :  { %v9493_v37 = vmul.f32 %v11381_v35, %v11377_v29  ;;  %v10727_v29 = vld [vmem:[%s12497_s10] ss:$0 sm:$0xff] }
0x13b8   :  { %11191 = vmatpush3.xpose.msk.msra.mxu0 %vm2000_vm2, %v9493_v37 }
0x13c6   :  { %v10094_v39 = vpop.trf.xlu0 }
0x13c7   :  { %v10158_v10 = vcombine.low %v10030_v5, %v10094_v39 }
0x13c9   :  { %v10165_v46 = vrot.slane %v10158_v10, %v11532_v34 }
0x13d0   :  { %v10126_v24 = vpop.trf.xlu1 }
0x13d1   :  { %v10166_v42 = vcombine.low %v10062_v7, %v10126_v24 }
0x13d3   :  { %v10173_v47 = vrot.slane %v10166_v42, %v11532_v34 }
0x13d5   :  { %v10182_v32 = vcombine.low %v10165_v46, %v10173_v47 }
0x13d7   :  { %v10189_v44 = vrot.slane %v10182_v32, %v11516_v27 }
0x13d9   :  { %v10190_v48 = vcombine.low %v10181_v41, %v10189_v44  ;;  %v10191_v18 = vcombine.high %v10181_v41, %v10189_v44 }
0x13db   :  { %11188 = vmatmul.mubr.msk.f32.vlgmr.msra.gmra.mrb[38].mxu1 %vm2000_vm2, %v10190_v48  ;;  %11193 = vmatmul.mubr.msk.f32.vlgmr.msra.gmra.mrb[36].mxu0 %vm2000_vm2, %v10191_v18 }
0x13dc   :  { %11197 = vmatprep.mubr.msk.f32.mxu1 %vm11407_vm0, %v11408_v12  ;;  %11196 = vmatpush3.msra.mxu1 %v10725_v11 }
0x14ae   :  { %v10264_v6 = vpop.f32.mrb[38].mxu1  ;;  %v10340_v36 = vpop.f32.mrb[36].mxu0 }
0x14af   :  { %10376 = vxpose.xlu1.b32.start.end [1/1] (short) (narrow) %v10340_v36, 8  ;;  %v11194_v40 = vpop.f32.mrb[37].mxu0  ;;  %10344 = vxpose.xlu0.b32.start.end [1/1] (short) (narrow) %v10264_v6, 8  ;;  %v11189_v8 = vpop.f32.mrb[39].mxu1 }
0x152f   :  { %v10392_v38 = vpop.trf.xlu1  ;;  %v10360_v16 = vpop.trf.xlu0 }
0x1530   :  { %v10423_v49 = vcombine.high %v10392_v38, %v11408_v12  ;;  %v10430_v22 = vrot.slane %v10392_v38, %v11532_v34  ;;  %v10408_v51 = vcombine.high %v10360_v16, %v11408_v12  ;;  %v10415_v52 = vrot.slane %v10360_v16, %v11532_v34 }
0x1532   :  { %v10437_v45 = vrot.slane %v10423_v49, %v11532_v34  ;;  %v10422_v56 = vrot.slane %v10408_v51, %v11532_v34  ;;  %v10438_v59 = vcombine.low %v10415_v52, %v10430_v22  ;;  %v10439_v54 = vcombine.high %v10415_v52, %v10430_v22 }
0x1534   :  { %v10446_v55 = vrot.slane %v10438_v59, %v11516_v27  ;;  %v10453_v61 = vrot.slane %v10439_v54, %v11516_v27  ;;  %v10454_v62 = vcombine.low %v10422_v56, %v10437_v45  ;;  %v10455_v1 = vcombine.high %v10422_v56, %v10437_v45 }
0x1536   :  { %v10470_v0 = vcombine.high %v10446_v55, %v11408_v12  ;;  %v10462_v2 = vrot.slane %v10454_v62, %v11516_v27  ;;  %v10471_v3 = vcombine.high %v10453_v61, %v11408_v12  ;;  %v10474_v9 = vsel %vm3168_vm3, %v10446_v55, 0.0 }
0x1537   :  { %v10477_v34 = vsel %vm3168_vm3, %v10453_v61, 0.0  ;;  %v10469_v17 = vrot.slane %v10455_v1, %v11516_v27 }
0x1538   :  { %v10475_v13 = vsel %vm3168_vm3, %v10470_v0, 0.0  ;;  %v10472_v19 = vcombine.high %v10462_v2, %v11408_v12  ;;  %v10479_v60 = vsel %vm3168_vm3, %v10471_v3, 0.0  ;;  %v10481_v20 = vsel %vm3168_vm3, %v10462_v2, 0.0 }
0x1539   :  { %v10476_v14 = vadd.f32 %v10475_v13, %v10474_v9  ;;  %v10473_v21 = vcombine.high %v10469_v17, %v11408_v12  ;;  %v10485_v26 = vsel %vm3168_vm3, %v10469_v17, 0.0 }
0x153a   :  { %v10483_v23 = vsel %vm3168_vm3, %v10472_v19, 0.0 }
0x153b   :  { %v10478_v58 = vadd.f32 %v10477_v34, %v10476_v14  ;;  %v10487_v15 = vsel %vm3168_vm3, %v10473_v21, 0.0 }
0x153d   :  { %v10480_v53 = vadd.f32 %v10479_v60, %v10478_v58 }
0x153f   :  { %v10482_v57 = vadd.f32 %v10481_v20, %v10480_v53 }
0x1541   :  { %v10484_v25 = vadd.f32 %v10483_v23, %v10482_v57 }
0x1543   :  { %v10486_v28 = vadd.f32 %v10485_v26, %v10484_v25 }
0x1545   :  { %v10488_v50 = vadd.f32 %v10487_v15, %v10486_v28 }
0x1547   :  { %11198 = vmatmul.mubr.msk.f32.vlgmr.msra.gmra.mrb[40].mxu1 %vm2000_vm2, %v10488_v50 }
0x161a   :  { %v10560_v27 = vpop.f32.mrb[40].mxu1 }
0x161b   :  { %v10564_v12 = vadd.f32 %v10560_v27, %v12359_v4  ;;  %v11199_v30 = vpop.f32.mrb[41].mxu1 }
0x161d   :  { %v10572_v5 = vadd.f32 %v10727_v29, %v10564_v12 }
0x161f   :  { %10574 = vst.msk [vmem:[#allocation2] sm:$0x3] %vm10573_vm4, %v10572_v5 }
0x1620   :  { %11393 = shalt.err (!%p11390_p4)
}
0x1621   :  { %s11394_s10 = scalar_lea.hbm %s12498_s11, 32 }
0x1622   :  { %p11395_p5 = scmp.ne.s32.totalorder %s12498_s11, %s11394_s10  ;;  %p11398_p6 = scmp.lt.u32.totalorder %s11394_s10, %s12498_s11 }
0x1624   :  { %p11400_p7 = pnand %p11398_p6, %p11395_p5 }
0x1626   :  { %11403 = shalt.err (!%p11400_p7)
}
0x1627   :  { %10584 = dma.vmem_to_hbm [thread:$0]  %s10582_s18, 32, %s12498_s11, [#allocation3]  }
0x1628   :  { %11404 = dma.done.wait [#allocation3], 32  }
0x1629   :  { %11405 = vsyncadd [#allocation3], 4294967264 }
0x162a   :  { %10588 = vsyncpa [#allocation3], 1 }

</bundles_post_ra>
